<compile_context>
chip_gen: v6e
topology: v6e:2x2x1
jax: 0.10.0
libtpu: 0.0.40
codegen_flags: <defaults>
</compile_context>

<pallas_src>
import jax
import jax.numpy as jnp
from jax import lax
from jax.experimental import pallas as pl
from jax.experimental.pallas import tpu as pltpu


# -----------------------------------------------------------------------------
# Kernel 1: fused 3x3 "same" conv + bias + ReLU + 2x2/2 max-pool.
# One batch sample per grid step.
# -----------------------------------------------------------------------------
def conv_relu_pool_kernel(x_ref, w_ref, b_ref, o_ref, xpad_ref, hpool_ref):
    # x_ref    : (1, H, W, Cin)        f32   one input sample
    # w_ref    : (9*Cin, Cout)         bf16  HWIO weights, rows = (kh, kw, ci)
    # b_ref    : (1, Cout)             f32
    # o_ref    : (1, H//2, W//2, Cout) f32
    # xpad_ref : (H+2, W+2, Cin)       f32   scratch, zero border = conv padding
    # hpool_ref: (H//2, W, Cout)       f32   scratch, H-pooled activation
    _, H, W, Cin = x_ref.shape
    Cout = o_ref.shape[-1]
    Ho, Wo = H // 2, W // 2

    # Build the zero-padded copy of this sample inside VMEM (no wrapper jnp.pad).
    # TODO(synk): border-only zeroing would shave one full-tile store pass; kept
    # whole-tile for robustness under "parallel" grid partitioning.
    xpad_ref[...] = jnp.zeros_like(xpad_ref)
    xpad_ref[pl.ds(1, H), pl.ds(1, W), :] = x_ref[0]

    # im2col along the contraction dim: (H, W, 9*Cin) -> (H*W, 9*Cin), bf16 for MXU.
    cols = [xpad_ref[pl.ds(kh, H), pl.ds(kw, W), :]
            for kh in range(3) for kw in range(3)]
    patches = jnp.concatenate(cols, axis=-1).reshape(H * W, 9 * Cin)
    acc = jnp.dot(patches.astype(jnp.bfloat16), w_ref[...],
                  preferred_element_type=jnp.float32)          # (H*W, Cout) f32

    acc = jnp.maximum(acc + b_ref[...], 0.0)                   # bias + ReLU

    # 2x2/2 max-pool.  H direction on the register value (free leading-dim split) ...
    acc = acc.reshape(Ho, 2, W, Cout)
    hpool_ref[...] = jnp.maximum(acc[:, 0], acc[:, 1])
    # ... W direction via stride-2 reads of the half-size scratch.
    o_ref[0] = jnp.maximum(hpool_ref[:, pl.ds(0, Wo, 2), :],
                           hpool_ref[:, pl.ds(1, Wo, 2), :]).astype(o_ref.dtype)


def conv_relu_pool(x_nhwc, w2d, b2d):
    N, H, W, Cin = x_nhwc.shape
    Cout = w2d.shape[-1]
    Ho, Wo = H // 2, W // 2
    return pl.pallas_call(
        conv_relu_pool_kernel,
        out_shape=jax.ShapeDtypeStruct((N, Ho, Wo, Cout), jnp.float32),
        grid=(N,),
        in_specs=[
            pl.BlockSpec((1, H, W, Cin), lambda n: (n, 0, 0, 0)),
            pl.BlockSpec((9 * Cin, Cout), lambda n: (0, 0)),
            pl.BlockSpec((1, Cout), lambda n: (0, 0)),
        ],
        out_specs=pl.BlockSpec((1, Ho, Wo, Cout), lambda n: (n, 0, 0, 0)),
        scratch_shapes=[
            pltpu.VMEM((H + 2, W + 2, Cin), jnp.float32),
            pltpu.VMEM((Ho, W, Cout), jnp.float32),
        ],
        compiler_params=pltpu.CompilerParams(
            dimension_semantics=("parallel",),
            vmem_limit_bytes=48 * 1024 * 1024,
        ),
    )(x_nhwc, w2d, b2d)


# -----------------------------------------------------------------------------
# Kernel 2: MLP head, fc1 streamed over K with an f32 accumulator (P3 pattern);
# fc2 + sigmoid on the last K step.  Dropout(0.5) is identity in eval mode.
# -----------------------------------------------------------------------------
def mlp_head_kernel(x_ref, w1_ref, b1_ref, w2_ref, b2_ref, o_ref, acc_ref):
    k = pl.program_id(0)

    @pl.when(k == 0)
    def _():
        acc_ref[...] = jnp.zeros_like(acc_ref)

    acc_ref[...] += jnp.dot(x_ref[...].astype(jnp.bfloat16), w1_ref[...],
                            preferred_element_type=jnp.float32)

    @pl.when(k == pl.num_programs(0) - 1)
    def _():
        h = jnp.maximum(acc_ref[...] + b1_ref[...], 0.0)       # fc1 + ReLU
        # TODO(synk): nn.Dropout(0.5) train-mode PRNG masking not implemented (eval = identity).
        z = jnp.dot(h, w2_ref[...], preferred_element_type=jnp.float32) + b2_ref[...]
        o_ref[...] = jax.nn.sigmoid(z).astype(o_ref.dtype)


def _pick_k_tile(F):
    for tk in (2048, 1024, 512, 256, 128):
        if F % tk == 0 and F // tk >= 2:
            return tk
    return F


def mlp_head(x_flat, w1, b1, w2, b2):
    N, F = x_flat.shape
    Dh = w1.shape[1]
    tk = _pick_k_tile(F)
    return pl.pallas_call(
        mlp_head_kernel,
        out_shape=jax.ShapeDtypeStruct((N, 1), jnp.float32),
        grid=(F // tk,),
        in_specs=[
            pl.BlockSpec((N, tk), lambda k: (0, k)),
            pl.BlockSpec((tk, Dh), lambda k: (k, 0)),
            pl.BlockSpec((1, Dh), lambda k: (0, 0)),
            pl.BlockSpec((Dh, 1), lambda k: (0, 0)),
            pl.BlockSpec((1, 1), lambda k: (0, 0)),
        ],
        out_specs=pl.BlockSpec((N, 1), lambda k: (0, 0)),
        scratch_shapes=[pltpu.VMEM((N, Dh), jnp.float32)],
        compiler_params=pltpu.CompilerParams(
            dimension_semantics=("arbitrary",),
            vmem_limit_bytes=32 * 1024 * 1024,
        ),
    )(x_flat, w1, b1, w2, b2)


# -----------------------------------------------------------------------------
# One-time parameter prep: bf16 matmul weights, im2col-flattened conv weights,
# and fc1 rows permuted so a direct NHWC flatten matches torch's NCHW view(N,-1).
# -----------------------------------------------------------------------------
def prepare_params(p, input_size):
    so = input_size // 4
    dh = p["fw1"].shape[1]
    fw1_nhwc = (p["fw1"].reshape(64, so, so, dh)
                        .transpose(1, 2, 0, 3)
                        .reshape(64 * so * so, dh))
    return {
        "cw1": p["cw1"].reshape(-1, p["cw1"].shape[-1]).astype(jnp.bfloat16),  # (27, 32)
        "cb1": p["cb1"].reshape(1, -1).astype(jnp.float32),
        "cw2": p["cw2"].reshape(-1, p["cw2"].shape[-1]).astype(jnp.bfloat16),  # (288, 64)
        "cb2": p["cb2"].reshape(1, -1).astype(jnp.float32),
        "fw1": fw1_nhwc.astype(jnp.bfloat16),
        "fb1": p["fb1"].reshape(1, -1).astype(jnp.float32),
        "fw2": p["fw2"].astype(jnp.float32),
        "fb2": p["fb2"].reshape(1, 1).astype(jnp.float32),
    }


@jax.jit
def baseline_cnn_forward(x_nchw, kp):
    x = jnp.transpose(x_nchw, (0, 2, 3, 1))                    # NCHW -> NHWC (one-time)
    x = conv_relu_pool(x, kp["cw1"], kp["cb1"])                # (N, H/2, W/2, 32)
    x = conv_relu_pool(x, kp["cw2"], kp["cb2"])                # (N, H/4, W/4, 64)
    n = x.shape[0]
    x_flat = x.reshape(n, -1)        # free row-major collapse; fw1 rows already permuted to match
    out = mlp_head(x_flat, kp["fw1"], kp["fb1"], kp["fw2"], kp["fb2"])
    return jnp.squeeze(out)          # same semantics as torch's x.squeeze()


# -----------------------------------------------------------------------------
# Pure-JAX f32 reference (same math, original torch-style params) for checking.
# -----------------------------------------------------------------------------
def reference_forward(x_nchw, p):
    x = jnp.transpose(x_nchw, (0, 2, 3, 1))

    def block(x, w, b):
        y = lax.conv_general_dilated(
            x, w, window_strides=(1, 1), padding=((1, 1), (1, 1)),
            dimension_numbers=("NHWC", "HWIO", "NHWC")) + b
        y = jnp.maximum(y, 0.0)
        return lax.reduce_window(y, -jnp.inf, lax.max,
                                 (1, 2, 2, 1), (1, 2, 2, 1), "VALID")

    x = block(x, p["cw1"], p["cb1"])
    x = block(x, p["cw2"], p["cb2"])
    x = jnp.transpose(x, (0, 3, 1, 2)).reshape(x.shape[0], -1)   # torch NCHW flatten
    x = jnp.maximum(x @ p["fw1"] + p["fb1"], 0.0)
    x = jax.nn.sigmoid(x @ p["fw2"] + p["fb2"])
    return jnp.squeeze(x)


def init_params(key, input_size):
    flat = 64 * (input_size // 4) * (input_size // 4)
    ks = jax.random.split(key, 8)
    s = 0.05
    return {
        "cw1": jax.random.normal(ks[0], (3, 3, 3, 32), jnp.float32) * s,
        "cb1": jax.random.normal(ks[1], (32,), jnp.float32) * s,
        "cw2": jax.random.normal(ks[2], (3, 3, 32, 64), jnp.float32) * s,
        "cb2": jax.random.normal(ks[3], (64,), jnp.float32) * s,
        "fw1": jax.random.normal(ks[4], (flat, 128), jnp.float32) * s,
        "fb1": jax.random.normal(ks[5], (128,), jnp.float32) * s,
        "fw2": jax.random.normal(ks[6], (128, 1), jnp.float32) * s,
        "fb2": jax.random.normal(ks[7], (1,), jnp.float32) * s,
    }


if __name__ == "__main__":
    INPUT_SIZE = 16   # small version of the 96x96 default
    BATCH = 2

    key = jax.random.PRNGKey(0)
    k_x, k_p = jax.random.split(key)
    x = jax.random.normal(k_x, (BATCH, 3, INPUT_SIZE, INPUT_SIZE), jnp.float32)
    params = init_params(k_p, INPUT_SIZE)
    kparams = prepare_params(params, INPUT_SIZE)      # one-time layout/dtype prep

    out = jax.block_until_ready(baseline_cnn_forward(x, kparams))
    ref = jax.block_until_ready(reference_forward(x, params))

    assert out.shape == (BATCH,), f"unexpected output shape {out.shape}"
    # bf16 MXU operands vs. f32 reference -> relaxed tolerance
    assert jnp.allclose(out.astype(jnp.float32), ref, rtol=2e-2, atol=2e-2), (out, ref)
    print("KERNEL_OK")
</pallas_src>

<mosaic_0001>
module attributes {stable_mosaic.version = 11 : i64} {
  func.func @conv_relu_pool_kernel(%arg0: i32, %arg1: memref<1x16x16x3xf32, #tpu.memory_space<vmem>>, %arg2: memref<27x32xbf16, #tpu.memory_space<vmem>>, %arg3: memref<1x32xf32, #tpu.memory_space<vmem>>, %arg4: memref<1x8x8x32xf32, #tpu.memory_space<vmem>>, %arg5: memref<18x18x3xf32, #tpu.memory_space<vmem>>, %arg6: memref<8x16x32xf32, #tpu.memory_space<vmem>>) attributes {dimension_semantics = [#tpu.dimension_semantics<parallel>], iteration_bounds = array<i64: 2>, scalar_prefetch = 0 : i64, scratch_operands = 2 : i64, tpu.core_type = #tpu.core_type<tc>, window_params = [{transform_indices = @transform_0, window_bounds = array<i64: 1, 16, 16, 3>}, {pipeline_mode = #tpu.pipeline_mode<synchronous>, transform_indices = @transform_1, window_bounds = array<i64: 27, 32>}, {pipeline_mode = #tpu.pipeline_mode<synchronous>, transform_indices = @transform_2, window_bounds = array<i64: 1, 32>}, {transform_indices = @transform_3, window_bounds = array<i64: 1, 8, 8, 32>}]} {
    %cst = arith.constant 0.000000e+00 : f32
    %0 = vector.broadcast %cst : f32 to vector<18x18x3xf32>
    %c0 = arith.constant 0 : index
    %c0_0 = arith.constant 0 : index
    %c0_1 = arith.constant 0 : index
    %1 = vector.load %arg5[%c0, %c0_0, %c0_1] : memref<18x18x3xf32, #tpu.memory_space<vmem>>, vector<18x18x3xf32>
    tpu.vector_store %arg5[%c0, %c0_0, %c0_1], %0 {strides = array<i32>} : memref<18x18x3xf32, #tpu.memory_space<vmem>>, vector<18x18x3xf32>,
    %c0_2 = arith.constant 0 : index
    %c0_3 = arith.constant 0 : index
    %c0_4 = arith.constant 0 : index
    %c0_5 = arith.constant 0 : index
    %2 = vector.load %arg1[%c0_2, %c0_3, %c0_4, %c0_5] : memref<1x16x16x3xf32, #tpu.memory_space<vmem>>, vector<1x16x16x3xf32>
    %3 = vector.shape_cast %2 : vector<1x16x16x3xf32> to vector<16x16x3xf32>
    %c1 = arith.constant 1 : index
    %c1_6 = arith.constant 1 : index
    %c0_7 = arith.constant 0 : index
    %4 = vector.load %arg5[%c1, %c1_6, %c0_7] : memref<18x18x3xf32, #tpu.memory_space<vmem>>, vector<16x16x3xf32>
    tpu.vector_store %arg5[%c1, %c1_6, %c0_7], %3 {strides = array<i32>} : memref<18x18x3xf32, #tpu.memory_space<vmem>>, vector<16x16x3xf32>,
    %c0_8 = arith.constant 0 : index
    %c0_9 = arith.constant 0 : index
    %c0_10 = arith.constant 0 : index
    %5 = vector.load %arg5[%c0_8, %c0_9, %c0_10] : memref<18x18x3xf32, #tpu.memory_space<vmem>>, vector<16x16x3xf32>
    %c0_11 = arith.constant 0 : index
    %c1_12 = arith.constant 1 : index
    %c0_13 = arith.constant 0 : index
    %6 = vector.load %arg5[%c0_11, %c1_12, %c0_13] : memref<18x18x3xf32, #tpu.memory_space<vmem>>, vector<16x16x3xf32>
    %c0_14 = arith.constant 0 : index
    %c2 = arith.constant 2 : index
    %c0_15 = arith.constant 0 : index
    %7 = vector.load %arg5[%c0_14, %c2, %c0_15] : memref<18x18x3xf32, #tpu.memory_space<vmem>>, vector<16x16x3xf32>
    %c1_16 = arith.constant 1 : index
    %c0_17 = arith.constant 0 : index
    %c0_18 = arith.constant 0 : index
    %8 = vector.load %arg5[%c1_16, %c0_17, %c0_18] : memref<18x18x3xf32, #tpu.memory_space<vmem>>, vector<16x16x3xf32>
    %c1_19 = arith.constant 1 : index
    %c1_20 = arith.constant 1 : index
    %c0_21 = arith.constant 0 : index
    %9 = vector.load %arg5[%c1_19, %c1_20, %c0_21] : memref<18x18x3xf32, #tpu.memory_space<vmem>>, vector<16x16x3xf32>
    %c1_22 = arith.constant 1 : index
    %c2_23 = arith.constant 2 : index
    %c0_24 = arith.constant 0 : index
    %10 = vector.load %arg5[%c1_22, %c2_23, %c0_24] : memref<18x18x3xf32, #tpu.memory_space<vmem>>, vector<16x16x3xf32>
    %c2_25 = arith.constant 2 : index
    %c0_26 = arith.constant 0 : index
    %c0_27 = arith.constant 0 : index
    %11 = vector.load %arg5[%c2_25, %c0_26, %c0_27] : memref<18x18x3xf32, #tpu.memory_space<vmem>>, vector<16x16x3xf32>
    %c2_28 = arith.constant 2 : index
    %c1_29 = arith.constant 1 : index
    %c0_30 = arith.constant 0 : index
    %12 = vector.load %arg5[%c2_28, %c1_29, %c0_30] : memref<18x18x3xf32, #tpu.memory_space<vmem>>, vector<16x16x3xf32>
    %c2_31 = arith.constant 2 : index
    %c2_32 = arith.constant 2 : index
    %c0_33 = arith.constant 0 : index
    %13 = vector.load %arg5[%c2_31, %c2_32, %c0_33] : memref<18x18x3xf32, #tpu.memory_space<vmem>>, vector<16x16x3xf32>
    %14 = tpu.concatenate %5, %6, %7, %8, %9, %10, %11, %12, %13 in 2 : vector<16x16x3xf32>, vector<16x16x3xf32>, vector<16x16x3xf32>, vector<16x16x3xf32>, vector<16x16x3xf32>, vector<16x16x3xf32>, vector<16x16x3xf32>, vector<16x16x3xf32>, vector<16x16x3xf32> -> vector<16x16x27xf32>
    %15 = vector.shape_cast %14 : vector<16x16x27xf32> to vector<256x27xf32>
    %16 = arith.truncf %15 : vector<256x27xf32> to vector<256x27xbf16>
    %c0_34 = arith.constant 0 : index
    %c0_35 = arith.constant 0 : index
    %17 = vector.load %arg2[%c0_34, %c0_35] : memref<27x32xbf16, #tpu.memory_space<vmem>>, vector<27x32xbf16>
    %cst_36 = arith.constant dense<0.000000e+00> : vector<256x32xf32>
    %18 = tpu.matmul %16, %17, %cst_36 {dimension_numbers = #tpu.dot_dimension_numbers<[1], [0], [0], [1], [0, 0, 1, 1], [], []>} : vector<256x27xbf16>, vector<27x32xbf16>, vector<256x32xf32> -> vector<256x32xf32>
    %c0_37 = arith.constant 0 : index
    %c0_38 = arith.constant 0 : index
    %19 = vector.load %arg3[%c0_37, %c0_38] : memref<1x32xf32, #tpu.memory_space<vmem>>, vector<1x32xf32>
    %20 = vector.broadcast %19 : vector<1x32xf32> to vector<256x32xf32>
    %21 = arith.addf %18, %20 : vector<256x32xf32>
    %cst_39 = arith.constant 0.000000e+00 : f32
    %22 = vector.broadcast %cst_39 : f32 to vector<256x32xf32>
    %23 = arith.maximumf %21, %22 : vector<256x32xf32>
    %24 = vector.shape_cast %23 : vector<256x32xf32> to vector<8x2x16x32xf32>
    %25 = vector.extract_strided_slice %24 {offsets = [0, 0, 0, 0], sizes = [8, 1, 16, 32], strides = [1, 1, 1, 1]} : vector<8x2x16x32xf32> to vector<8x1x16x32xf32>
    %26 = vector.shape_cast %25 : vector<8x1x16x32xf32> to vector<8x16x32xf32>
    %27 = vector.extract_strided_slice %24 {offsets = [0, 1, 0, 0], sizes = [8, 1, 16, 32], strides = [1, 1, 1, 1]} : vector<8x2x16x32xf32> to vector<8x1x16x32xf32>
    %28 = vector.shape_cast %27 : vector<8x1x16x32xf32> to vector<8x16x32xf32>
    %29 = arith.maximumf %26, %28 : vector<8x16x32xf32>
    %c0_40 = arith.constant 0 : index
    %c0_41 = arith.constant 0 : index
    %c0_42 = arith.constant 0 : index
    %30 = vector.load %arg6[%c0_40, %c0_41, %c0_42] : memref<8x16x32xf32, #tpu.memory_space<vmem>>, vector<8x16x32xf32>
    tpu.vector_store %arg6[%c0_40, %c0_41, %c0_42], %29 {strides = array<i32>} : memref<8x16x32xf32, #tpu.memory_space<vmem>>, vector<8x16x32xf32>,
    %c0_43 = arith.constant 0 : index
    %c0_44 = arith.constant 0 : index
    %c0_45 = arith.constant 0 : index
    %31 = tpu.strided_load %arg6[%c0_43, %c0_44, %c0_45] {strides = array<i32: 1, 2, 1>} : memref<8x16x32xf32, #tpu.memory_space<vmem>>, vector<8x8x32xf32>
    %c0_46 = arith.constant 0 : index
    %c1_47 = arith.constant 1 : index
    %c0_48 = arith.constant 0 : index
    %32 = tpu.strided_load %arg6[%c0_46, %c1_47, %c0_48] {strides = array<i32: 1, 2, 1>} : memref<8x16x32xf32, #tpu.memory_space<vmem>>, vector<8x8x32xf32>
    %33 = arith.maximumf %31, %32 : vector<8x8x32xf32>
    %c0_49 = arith.constant 0 : index
    %c0_50 = arith.constant 0 : index
    %c0_51 = arith.constant 0 : index
    %c0_52 = arith.constant 0 : index
    %34 = vector.load %arg4[%c0_49, %c0_50, %c0_51, %c0_52] : memref<1x8x8x32xf32, #tpu.memory_space<vmem>>, vector<1x8x8x32xf32>
    %35 = vector.shape_cast %34 : vector<1x8x8x32xf32> to vector<8x8x32xf32>
    %36 = vector.shape_cast %33 : vector<8x8x32xf32> to vector<1x8x8x32xf32>
    tpu.vector_store %arg4[%c0_49, %c0_50, %c0_51, %c0_52], %36 {strides = array<i32>} : memref<1x8x8x32xf32, #tpu.memory_space<vmem>>, vector<1x8x8x32xf32>,
    return
  }
  func.func @transform_0(%arg0: i32) -> (i32, i32, i32, i32) {
    %c0_i32 = arith.constant 0 : i32
    %c0_i32_0 = arith.constant 0 : i32
    %c0_i32_1 = arith.constant 0 : i32
    %c0_i32_2 = arith.constant 0 : i32
    return %arg0, %c0_i32, %c0_i32_0, %c0_i32_1 : i32, i32, i32, i32
  }
  func.func @transform_1(%arg0: i32) -> (i32, i32) {
    %c0_i32 = arith.constant 0 : i32
    %c0_i32_0 = arith.constant 0 : i32
    %c0_i32_1 = arith.constant 0 : i32
    return %c0_i32, %c0_i32_0 : i32, i32
  }
  func.func @transform_2(%arg0: i32) -> (i32, i32) {
    %c0_i32 = arith.constant 0 : i32
    %c0_i32_0 = arith.constant 0 : i32
    %c0_i32_1 = arith.constant 0 : i32
    return %c0_i32, %c0_i32_0 : i32, i32
  }
  func.func @transform_3(%arg0: i32) -> (i32, i32, i32, i32) {
    %c0_i32 = arith.constant 0 : i32
    %c0_i32_0 = arith.constant 0 : i32
    %c0_i32_1 = arith.constant 0 : i32
    %c0_i32_2 = arith.constant 0 : i32
    return %arg0, %c0_i32, %c0_i32_0, %c0_i32_1 : i32, i32, i32, i32
  }
}

module attributes {stable_mosaic.version = 11 : i64} {
  func.func @conv_relu_pool_kernel(%arg0: i32, %arg1: memref<1x8x8x32xf32, #tpu.memory_space<vmem>>, %arg2: memref<288x64xbf16, #tpu.memory_space<vmem>>, %arg3: memref<1x64xf32, #tpu.memory_space<vmem>>, %arg4: memref<1x4x4x64xf32, #tpu.memory_space<vmem>>, %arg5: memref<10x10x32xf32, #tpu.memory_space<vmem>>, %arg6: memref<4x8x64xf32, #tpu.memory_space<vmem>>) attributes {dimension_semantics = [#tpu.dimension_semantics<parallel>], iteration_bounds = array<i64: 2>, scalar_prefetch = 0 : i64, scratch_operands = 2 : i64, tpu.core_type = #tpu.core_type<tc>, window_params = [{transform_indices = @transform_0, window_bounds = array<i64: 1, 8, 8, 32>}, {pipeline_mode = #tpu.pipeline_mode<synchronous>, transform_indices = @transform_1, window_bounds = array<i64: 288, 64>}, {pipeline_mode = #tpu.pipeline_mode<synchronous>, transform_indices = @transform_2, window_bounds = array<i64: 1, 64>}, {transform_indices = @transform_3, window_bounds = array<i64: 1, 4, 4, 64>}]} {
    %cst = arith.constant 0.000000e+00 : f32
    %0 = vector.broadcast %cst : f32 to vector<10x10x32xf32>
    %c0 = arith.constant 0 : index
    %c0_0 = arith.constant 0 : index
    %c0_1 = arith.constant 0 : index
    %1 = vector.load %arg5[%c0, %c0_0, %c0_1] : memref<10x10x32xf32, #tpu.memory_space<vmem>>, vector<10x10x32xf32>
    tpu.vector_store %arg5[%c0, %c0_0, %c0_1], %0 {strides = array<i32>} : memref<10x10x32xf32, #tpu.memory_space<vmem>>, vector<10x10x32xf32>,
    %c0_2 = arith.constant 0 : index
    %c0_3 = arith.constant 0 : index
    %c0_4 = arith.constant 0 : index
    %c0_5 = arith.constant 0 : index
    %2 = vector.load %arg1[%c0_2, %c0_3, %c0_4, %c0_5] : memref<1x8x8x32xf32, #tpu.memory_space<vmem>>, vector<1x8x8x32xf32>
    %3 = vector.shape_cast %2 : vector<1x8x8x32xf32> to vector<8x8x32xf32>
    %c1 = arith.constant 1 : index
    %c1_6 = arith.constant 1 : index
    %c0_7 = arith.constant 0 : index
    %4 = vector.load %arg5[%c1, %c1_6, %c0_7] : memref<10x10x32xf32, #tpu.memory_space<vmem>>, vector<8x8x32xf32>
    tpu.vector_store %arg5[%c1, %c1_6, %c0_7], %3 {strides = array<i32>} : memref<10x10x32xf32, #tpu.memory_space<vmem>>, vector<8x8x32xf32>,
    %c0_8 = arith.constant 0 : index
    %c0_9 = arith.constant 0 : index
    %c0_10 = arith.constant 0 : index
    %5 = vector.load %arg5[%c0_8, %c0_9, %c0_10] : memref<10x10x32xf32, #tpu.memory_space<vmem>>, vector<8x8x32xf32>
    %c0_11 = arith.constant 0 : index
    %c1_12 = arith.constant 1 : index
    %c0_13 = arith.constant 0 : index
    %6 = vector.load %arg5[%c0_11, %c1_12, %c0_13] : memref<10x10x32xf32, #tpu.memory_space<vmem>>, vector<8x8x32xf32>
    %c0_14 = arith.constant 0 : index
    %c2 = arith.constant 2 : index
    %c0_15 = arith.constant 0 : index
    %7 = vector.load %arg5[%c0_14, %c2, %c0_15] : memref<10x10x32xf32, #tpu.memory_space<vmem>>, vector<8x8x32xf32>
    %c1_16 = arith.constant 1 : index
    %c0_17 = arith.constant 0 : index
    %c0_18 = arith.constant 0 : index
    %8 = vector.load %arg5[%c1_16, %c0_17, %c0_18] : memref<10x10x32xf32, #tpu.memory_space<vmem>>, vector<8x8x32xf32>
    %c1_19 = arith.constant 1 : index
    %c1_20 = arith.constant 1 : index
    %c0_21 = arith.constant 0 : index
    %9 = vector.load %arg5[%c1_19, %c1_20, %c0_21] : memref<10x10x32xf32, #tpu.memory_space<vmem>>, vector<8x8x32xf32>
    %c1_22 = arith.constant 1 : index
    %c2_23 = arith.constant 2 : index
    %c0_24 = arith.constant 0 : index
    %10 = vector.load %arg5[%c1_22, %c2_23, %c0_24] : memref<10x10x32xf32, #tpu.memory_space<vmem>>, vector<8x8x32xf32>
    %c2_25 = arith.constant 2 : index
    %c0_26 = arith.constant 0 : index
    %c0_27 = arith.constant 0 : index
    %11 = vector.load %arg5[%c2_25, %c0_26, %c0_27] : memref<10x10x32xf32, #tpu.memory_space<vmem>>, vector<8x8x32xf32>
    %c2_28 = arith.constant 2 : index
    %c1_29 = arith.constant 1 : index
    %c0_30 = arith.constant 0 : index
    %12 = vector.load %arg5[%c2_28, %c1_29, %c0_30] : memref<10x10x32xf32, #tpu.memory_space<vmem>>, vector<8x8x32xf32>
    %c2_31 = arith.constant 2 : index
    %c2_32 = arith.constant 2 : index
    %c0_33 = arith.constant 0 : index
    %13 = vector.load %arg5[%c2_31, %c2_32, %c0_33] : memref<10x10x32xf32, #tpu.memory_space<vmem>>, vector<8x8x32xf32>
    %14 = tpu.concatenate %5, %6, %7, %8, %9, %10, %11, %12, %13 in 2 : vector<8x8x32xf32>, vector<8x8x32xf32>, vector<8x8x32xf32>, vector<8x8x32xf32>, vector<8x8x32xf32>, vector<8x8x32xf32>, vector<8x8x32xf32>, vector<8x8x32xf32>, vector<8x8x32xf32> -> vector<8x8x288xf32>
    %15 = vector.shape_cast %14 : vector<8x8x288xf32> to vector<64x288xf32>
    %16 = arith.truncf %15 : vector<64x288xf32> to vector<64x288xbf16>
    %c0_34 = arith.constant 0 : index
    %c0_35 = arith.constant 0 : index
    %17 = vector.load %arg2[%c0_34, %c0_35] : memref<288x64xbf16, #tpu.memory_space<vmem>>, vector<288x64xbf16>
    %cst_36 = arith.constant dense<0.000000e+00> : vector<64x64xf32>
    %18 = tpu.matmul %16, %17, %cst_36 {dimension_numbers = #tpu.dot_dimension_numbers<[1], [0], [0], [1], [0, 0, 1, 1], [], []>} : vector<64x288xbf16>, vector<288x64xbf16>, vector<64x64xf32> -> vector<64x64xf32>
    %c0_37 = arith.constant 0 : index
    %c0_38 = arith.constant 0 : index
    %19 = vector.load %arg3[%c0_37, %c0_38] : memref<1x64xf32, #tpu.memory_space<vmem>>, vector<1x64xf32>
    %20 = vector.broadcast %19 : vector<1x64xf32> to vector<64x64xf32>
    %21 = arith.addf %18, %20 : vector<64x64xf32>
    %cst_39 = arith.constant 0.000000e+00 : f32
    %22 = vector.broadcast %cst_39 : f32 to vector<64x64xf32>
    %23 = arith.maximumf %21, %22 : vector<64x64xf32>
    %24 = vector.shape_cast %23 : vector<64x64xf32> to vector<4x2x8x64xf32>
    %25 = vector.extract_strided_slice %24 {offsets = [0, 0, 0, 0], sizes = [4, 1, 8, 64], strides = [1, 1, 1, 1]} : vector<4x2x8x64xf32> to vector<4x1x8x64xf32>
    %26 = vector.shape_cast %25 : vector<4x1x8x64xf32> to vector<4x8x64xf32>
    %27 = vector.extract_strided_slice %24 {offsets = [0, 1, 0, 0], sizes = [4, 1, 8, 64], strides = [1, 1, 1, 1]} : vector<4x2x8x64xf32> to vector<4x1x8x64xf32>
    %28 = vector.shape_cast %27 : vector<4x1x8x64xf32> to vector<4x8x64xf32>
    %29 = arith.maximumf %26, %28 : vector<4x8x64xf32>
    %c0_40 = arith.constant 0 : index
    %c0_41 = arith.constant 0 : index
    %c0_42 = arith.constant 0 : index
    %30 = vector.load %arg6[%c0_40, %c0_41, %c0_42] : memref<4x8x64xf32, #tpu.memory_space<vmem>>, vector<4x8x64xf32>
    tpu.vector_store %arg6[%c0_40, %c0_41, %c0_42], %29 {strides = array<i32>} : memref<4x8x64xf32, #tpu.memory_space<vmem>>, vector<4x8x64xf32>,
    %c0_43 = arith.constant 0 : index
    %c0_44 = arith.constant 0 : index
    %c0_45 = arith.constant 0 : index
    %31 = tpu.strided_load %arg6[%c0_43, %c0_44, %c0_45] {strides = array<i32: 1, 2, 1>} : memref<4x8x64xf32, #tpu.memory_space<vmem>>, vector<4x4x64xf32>
    %c0_46 = arith.constant 0 : index
    %c1_47 = arith.constant 1 : index
    %c0_48 = arith.constant 0 : index
    %32 = tpu.strided_load %arg6[%c0_46, %c1_47, %c0_48] {strides = array<i32: 1, 2, 1>} : memref<4x8x64xf32, #tpu.memory_space<vmem>>, vector<4x4x64xf32>
    %33 = arith.maximumf %31, %32 : vector<4x4x64xf32>
    %c0_49 = arith.constant 0 : index
    %c0_50 = arith.constant 0 : index
    %c0_51 = arith.constant 0 : index
    %c0_52 = arith.constant 0 : index
    %34 = vector.load %arg4[%c0_49, %c0_50, %c0_51, %c0_52] : memref<1x4x4x64xf32, #tpu.memory_space<vmem>>, vector<1x4x4x64xf32>
    %35 = vector.shape_cast %34 : vector<1x4x4x64xf32> to vector<4x4x64xf32>
    %36 = vector.shape_cast %33 : vector<4x4x64xf32> to vector<1x4x4x64xf32>
    tpu.vector_store %arg4[%c0_49, %c0_50, %c0_51, %c0_52], %36 {strides = array<i32>} : memref<1x4x4x64xf32, #tpu.memory_space<vmem>>, vector<1x4x4x64xf32>,
    return
  }
  func.func @transform_0(%arg0: i32) -> (i32, i32, i32, i32) {
    %c0_i32 = arith.constant 0 : i32
    %c0_i32_0 = arith.constant 0 : i32
    %c0_i32_1 = arith.constant 0 : i32
    %c0_i32_2 = arith.constant 0 : i32
    return %arg0, %c0_i32, %c0_i32_0, %c0_i32_1 : i32, i32, i32, i32
  }
  func.func @transform_1(%arg0: i32) -> (i32, i32) {
    %c0_i32 = arith.constant 0 : i32
    %c0_i32_0 = arith.constant 0 : i32
    %c0_i32_1 = arith.constant 0 : i32
    return %c0_i32, %c0_i32_0 : i32, i32
  }
  func.func @transform_2(%arg0: i32) -> (i32, i32) {
    %c0_i32 = arith.constant 0 : i32
    %c0_i32_0 = arith.constant 0 : i32
    %c0_i32_1 = arith.constant 0 : i32
    return %c0_i32, %c0_i32_0 : i32, i32
  }
  func.func @transform_3(%arg0: i32) -> (i32, i32, i32, i32) {
    %c0_i32 = arith.constant 0 : i32
    %c0_i32_0 = arith.constant 0 : i32
    %c0_i32_1 = arith.constant 0 : i32
    %c0_i32_2 = arith.constant 0 : i32
    return %arg0, %c0_i32, %c0_i32_0, %c0_i32_1 : i32, i32, i32, i32
  }
}

module attributes {stable_mosaic.version = 11 : i64} {
  func.func @mlp_head_kernel(%arg0: i32, %arg1: memref<2x512xf32, #tpu.memory_space<vmem>>, %arg2: memref<512x128xbf16, #tpu.memory_space<vmem>>, %arg3: memref<1x128xf32, #tpu.memory_space<vmem>>, %arg4: memref<128x1xf32, #tpu.memory_space<vmem>>, %arg5: memref<1x1xf32, #tpu.memory_space<vmem>>, %arg6: memref<2x1xf32, #tpu.memory_space<vmem>>, %arg7: memref<2x128xf32, #tpu.memory_space<vmem>>) attributes {dimension_semantics = [#tpu.dimension_semantics<arbitrary>], iteration_bounds = array<i64: 2>, scalar_prefetch = 0 : i64, scratch_operands = 1 : i64, tpu.core_type = #tpu.core_type<tc>, window_params = [{transform_indices = @transform_0, window_bounds = array<i64: 2, 512>}, {transform_indices = @transform_1, window_bounds = array<i64: 512, 128>}, {pipeline_mode = #tpu.pipeline_mode<synchronous>, transform_indices = @transform_2, window_bounds = array<i64: 1, 128>}, {pipeline_mode = #tpu.pipeline_mode<synchronous>, transform_indices = @transform_3, window_bounds = array<i64: 128, 1>}, {pipeline_mode = #tpu.pipeline_mode<synchronous>, transform_indices = @transform_4, window_bounds = array<i64: 1, 1>}, {pipeline_mode = #tpu.pipeline_mode<synchronous>, transform_indices = @transform_5, window_bounds = array<i64: 2, 1>}]} {
    %c0_i32 = arith.constant 0 : i32
    %0 = arith.cmpi eq, %arg0, %c0_i32 : i32
    %1 = arith.extui %0 : i1 to i32
    %c0_i32_0 = arith.constant 0 : i32
    %2 = arith.cmpi ne, %1, %c0_i32_0 : i32
    scf.if %2 {
      %cst_9 = arith.constant 0.000000e+00 : f32
      %13 = vector.broadcast %cst_9 : f32 to vector<2x128xf32>
      %c0_10 = arith.constant 0 : index
      %c0_11 = arith.constant 0 : index
      %14 = vector.load %arg7[%c0_10, %c0_11] : memref<2x128xf32, #tpu.memory_space<vmem>>, vector<2x128xf32>
      tpu.vector_store %arg7[%c0_10, %c0_11], %13 {strides = array<i32>} : memref<2x128xf32, #tpu.memory_space<vmem>>, vector<2x128xf32>,
    } else {
    }
    %c0 = arith.constant 0 : index
    %c0_1 = arith.constant 0 : index
    %3 = vector.load %arg7[%c0, %c0_1] : memref<2x128xf32, #tpu.memory_space<vmem>>, vector<2x128xf32>
    %c0_2 = arith.constant 0 : index
    %c0_3 = arith.constant 0 : index
    %4 = vector.load %arg1[%c0_2, %c0_3] : memref<2x512xf32, #tpu.memory_space<vmem>>, vector<2x512xf32>
    %5 = arith.truncf %4 : vector<2x512xf32> to vector<2x512xbf16>
    %c0_4 = arith.constant 0 : index
    %c0_5 = arith.constant 0 : index
    %6 = vector.load %arg2[%c0_4, %c0_5] : memref<512x128xbf16, #tpu.memory_space<vmem>>, vector<512x128xbf16>
    %cst = arith.constant dense<0.000000e+00> : vector<2x128xf32>
    %7 = tpu.matmul %5, %6, %cst {dimension_numbers = #tpu.dot_dimension_numbers<[1], [0], [0], [1], [0, 0, 1, 1], [], []>} : vector<2x512xbf16>, vector<512x128xbf16>, vector<2x128xf32> -> vector<2x128xf32>
    %8 = arith.addf %3, %7 : vector<2x128xf32>
    %c0_6 = arith.constant 0 : index
    %c0_7 = arith.constant 0 : index
    %9 = vector.load %arg7[%c0_6, %c0_7] : memref<2x128xf32, #tpu.memory_space<vmem>>, vector<2x128xf32>
    tpu.vector_store %arg7[%c0_6, %c0_7], %8 {strides = array<i32>} : memref<2x128xf32, #tpu.memory_space<vmem>>, vector<2x128xf32>,
    %c1_i32 = arith.constant 1 : i32
    %10 = arith.cmpi eq, %arg0, %c1_i32 : i32
    %11 = arith.extui %10 : i1 to i32
    %c0_i32_8 = arith.constant 0 : i32
    %12 = arith.cmpi ne, %11, %c0_i32_8 : i32
    scf.if %12 {
      %c0_9 = arith.constant 0 : index
      %c0_10 = arith.constant 0 : index
      %13 = vector.load %arg7[%c0_9, %c0_10] : memref<2x128xf32, #tpu.memory_space<vmem>>, vector<2x128xf32>
      %c0_11 = arith.constant 0 : index
      %c0_12 = arith.constant 0 : index
      %14 = vector.load %arg3[%c0_11, %c0_12] : memref<1x128xf32, #tpu.memory_space<vmem>>, vector<1x128xf32>
      %15 = vector.broadcast %14 : vector<1x128xf32> to vector<2x128xf32>
      %16 = arith.addf %13, %15 : vector<2x128xf32>
      %cst_13 = arith.constant 0.000000e+00 : f32
      %17 = vector.broadcast %cst_13 : f32 to vector<2x128xf32>
      %18 = arith.maximumf %16, %17 : vector<2x128xf32>
      %c0_14 = arith.constant 0 : index
      %c0_15 = arith.constant 0 : index
      %19 = vector.load %arg4[%c0_14, %c0_15] : memref<128x1xf32, #tpu.memory_space<vmem>>, vector<128x1xf32>
      %cst_16 = arith.constant dense<0.000000e+00> : vector<2x1xf32>
      %20 = tpu.matmul %18, %19, %cst_16 {dimension_numbers = #tpu.dot_dimension_numbers<[1], [0], [0], [1], [0, 0, 1, 1], [], []>} : vector<2x128xf32>, vector<128x1xf32>, vector<2x1xf32> -> vector<2x1xf32>
      %c0_17 = arith.constant 0 : index
      %c0_18 = arith.constant 0 : index
      %21 = vector.load %arg5[%c0_17, %c0_18] : memref<1x1xf32, #tpu.memory_space<vmem>>, vector<1x1xf32>
      %22 = vector.broadcast %21 : vector<1x1xf32> to vector<2x1xf32>
      %23 = arith.addf %20, %22 : vector<2x1xf32>
      %24 = arith.negf %23 : vector<2x1xf32>
      %25 = math.exp %24 : vector<2x1xf32>
      %cst_19 = arith.constant 1.000000e+00 : f32
      %26 = vector.broadcast %cst_19 : f32 to vector<2x1xf32>
      %27 = arith.addf %26, %25 : vector<2x1xf32>
      %28 = arith.divf %26, %27 : vector<2x1xf32>
      %c0_20 = arith.constant 0 : index
      %c0_21 = arith.constant 0 : index
      %29 = vector.load %arg6[%c0_20, %c0_21] : memref<2x1xf32, #tpu.memory_space<vmem>>, vector<2x1xf32>
      tpu.vector_store %arg6[%c0_20, %c0_21], %28 {strides = array<i32>} : memref<2x1xf32, #tpu.memory_space<vmem>>, vector<2x1xf32>,
    } else {
    }
    return
  }
  func.func @transform_0(%arg0: i32) -> (i32, i32) {
    %c0_i32 = arith.constant 0 : i32
    %c0_i32_0 = arith.constant 0 : i32
    return %c0_i32, %arg0 : i32, i32
  }
  func.func @transform_1(%arg0: i32) -> (i32, i32) {
    %c0_i32 = arith.constant 0 : i32
    %c0_i32_0 = arith.constant 0 : i32
    return %arg0, %c0_i32 : i32, i32
  }
  func.func @transform_2(%arg0: i32) -> (i32, i32) {
    %c0_i32 = arith.constant 0 : i32
    %c0_i32_0 = arith.constant 0 : i32
    %c0_i32_1 = arith.constant 0 : i32
    return %c0_i32, %c0_i32_0 : i32, i32
  }
  func.func @transform_3(%arg0: i32) -> (i32, i32) {
    %c0_i32 = arith.constant 0 : i32
    %c0_i32_0 = arith.constant 0 : i32
    %c0_i32_1 = arith.constant 0 : i32
    return %c0_i32, %c0_i32_0 : i32, i32
  }
  func.func @transform_4(%arg0: i32) -> (i32, i32) {
    %c0_i32 = arith.constant 0 : i32
    %c0_i32_0 = arith.constant 0 : i32
    %c0_i32_1 = arith.constant 0 : i32
    return %c0_i32, %c0_i32_0 : i32, i32
  }
  func.func @transform_5(%arg0: i32) -> (i32, i32) {
    %c0_i32 = arith.constant 0 : i32
    %c0_i32_0 = arith.constant 0 : i32
    %c0_i32_1 = arith.constant 0 : i32
    return %c0_i32, %c0_i32_0 : i32, i32
  }
}

</mosaic_0001>

<bundles_post_ra>
// kernel: baseline_cnn_forward.4
= control target key start
LH: loop header
LB: loop body
LE: loop exit
PB: predicated region body
PF: predicated region fallthrough
CT: control target
= control target key end

     0   :  { %s1218_s12 = smov 0   ;;  %s1530_s0 = inlined_call_operand.vmem [shape: f32[2,8,8,32], index: 0, kind: input, shape index: {}]   ;;  %s1531_s1 = inlined_call_operand.vmem [shape: bf16[288,64], index: 1, kind: input, shape index: {}]   ;;  %s1532_s2 = inlined_call_operand.vmem [shape: f32[1,64], index: 2, kind: input, shape index: {}]   ;;  %s1533_s3 = inlined_call_operand.vmem [shape: f32[2,4,4,64], index: 3, kind: output, shape index: {}]  }
   0x1 LB: > { %s926_s13 = sadd.s32 4294967295, %s1192_s12   ;;  %p930_p0 = scmp.ge.s32.totalorder %s1192_s12, 1  ;;  %s1192_s12 = sphi %s1218_s12, %s13_s12  }
   0x2   : > { %p137_p1 = scmp.lt.s32.totalorder %s1192_s12, 3 }
   0x4   : > { %p138_p2 = pnand %p930_p0, %p137_p1 }
   0x5   : > { %p1228_p3 = scmp.lt.s32.totalorder (!%p138_p2), %s926_s13, 1  ;;  %s1195_s10 = smov (!%p138_p2), 64  }
   0x6   : > { %141 = sbr.rel (%p138_p2) target bundleno = 418 (0x1a2), region = 32  ;;  %s1196_s11 = smov (!%p138_p2), 32  }
   0x7   : > { %s1197_s20 = smov (!%p138_p2), 96  }
   0xb   : > { %vm172_vm0 = vcmask 261120   ;;  %vm174_vm1 = vcmask 254976   ;;  %v1168_v0 = vld [vmem:[%s1531_s1 + $0x78] sm:$0xff]   ;;  %v1194_v1 = vmov 0.0   ;;  %s1536_s13 = smov (!%p1228_p3, %s926_s13), 1  ;;  %v1170_v3 = vld [vmem:[%s1531_s1 + $0x70] sm:$0xff]  }
   0xc   : > { %178 = vst.msk [vmem:[#allocation2 + $0x20] sm:$0xff] %vm172_vm0, %v1194_v1  ;;  %180 = vst.msk [vmem:[#allocation2 + $0x30] sm:$0xff] %vm172_vm0, %v1194_v1  ;;  %962 = vmatprep.subr.bf16.mxu0 %v1168_v0  ;;  %v1169_v2 = vld [vmem:[%s1531_s1 + $0x38] sm:$0xff]   ;;  %1020 = vmatprep.subr.bf16.mxu1 %v1168_v0  ;;  %s960_s21 = sshll.u32 %s1536_s13, 6  ;;  %v1171_v4 = vld [vmem:[%s1531_s1 + $0x30] sm:$0xff]   ;;  %vm484_vm2 = vcmask 523264  }
   0xd   : > { %179 = vst.msk [vmem:[#allocation2 + $0x28] sm:$0x3] %vm174_vm1, %v1194_v1  ;;  %181 = vst.msk [vmem:[#allocation2 + $0x38] sm:$0x3] %vm174_vm1, %v1194_v1  ;;  %963 = vmatpush3.bf16.msra.mxu0 %v1169_v2  ;;  %1028 = vmatpush3.bf16.msra.mxu1 %v1169_v2  ;;  %s165_s26 = scalar_lea.vmem %s1530_s0, %s960_s21  ;;  %v1172_v5 = vld [vmem:[%s1531_s1 + $0x68] sm:$0xff]   ;;  %v1174_v15 = vld [vmem:[%s1531_s1 + $0x60] sm:$0xff]  }
   0xe   : > { %173 = vst.msk [vmem:[#allocation2] sm:$0xff] %vm172_vm0, %v1194_v1  ;;  %176 = vst.msk [vmem:[#allocation2 + $0x10] sm:$0xff] %vm172_vm0, %v1194_v1  ;;  %964 = vmatprep.subr.bf16.mxu0 %v1170_v3  ;;  %1021 = vmatprep.subr.bf16.mxu1 %v1170_v3  ;;  %v195_v6 = vld [vmem:[%s165_s26 + $0x8] sm:$0xff]  ;;  %v196_v7 = vld [vmem:[%s165_s26 + $0x10] sm:$0xff]  ;;  %vm493_vm3 = vcmask 785408   ;;  %s961_s8 = sshll.u32 %s1536_s13, 4 }
   0xf   : > { %175 = vst.msk [vmem:[#allocation2 + $0x8] sm:$0x3] %vm174_vm1, %v1194_v1  ;;  %177 = vst.msk [vmem:[#allocation2 + $0x18] sm:$0x3] %vm174_vm1, %v1194_v1  ;;  %v194_v8 = vld [vmem:[%s165_s26] sm:$0xff]  ;;  %v199_v9 = vld [vmem:[%s165_s26 + $0x28] sm:$0xff] }
  0x10   : > { %182 = vst.msk [vmem:[#allocation2 + $0x40] sm:$0xff] %vm172_vm0, %v1194_v1  ;;  %184 = vst.msk [vmem:[#allocation2 + $0x50] sm:$0xff] %vm172_vm0, %v1194_v1  ;;  %v200_v10 = vld [vmem:[%s165_s26 + $0x30] sm:$0xff]  ;;  %v201_v11 = vld [vmem:[%s165_s26 + $0x38] sm:$0xff]  ;;  %vm866_vm4 = vcmask 519168  }
  0x11   : > { %183 = vst.msk [vmem:[#allocation2 + $0x48] sm:$0x3] %vm174_vm1, %v1194_v1  ;;  %185 = vst.msk [vmem:[#allocation2 + $0x58] sm:$0x3] %vm174_vm1, %v1194_v1  ;;  %965 = vmatpush3.bf16.msra.mxu0 %v1171_v4  ;;  %1029 = vmatpush3.bf16.msra.mxu1 %v1171_v4  ;;  %v197_v12 = vld [vmem:[%s165_s26 + $0x18] sm:$0xff]  ;;  %v198_v13 = vld [vmem:[%s165_s26 + $0x20] sm:$0xff] }
  0x12   : > { %186 = vst.msk [vmem:[#allocation2 + $0x60] sm:$0xff] %vm172_vm0, %v1194_v1  ;;  %188 = vst.msk [vmem:[#allocation2 + $0x70] sm:$0xff] %vm172_vm0, %v1194_v1  ;;  %966 = vmatprep.subr.bf16.mxu0 %v1172_v5  ;;  %1022 = vmatprep.subr.bf16.mxu1 %v1172_v5  ;;  %v1173_v14 = vld [vmem:[%s1531_s1 + $0x28] sm:$0xff]   ;;  %v1175_v17 = vld [vmem:[%s1531_s1 + $0x20] sm:$0xff]  }
  0x13   : > { %187 = vst.msk [vmem:[#allocation2 + $0x68] sm:$0x3] %vm174_vm1, %v1194_v1  ;;  %189 = vst.msk [vmem:[#allocation2 + $0x78] sm:$0x3] %vm174_vm1, %v1194_v1  ;;  %v1176_v18 = vld [vmem:[%s1531_s1 + $0x58] sm:$0xff]   ;;  %v1178_v39 = vld [vmem:[%s1531_s1 + $0x50] sm:$0xff]  }
  0x14   : > { %190 = vst.msk [vmem:[#allocation2 + $0x80] sm:$0xff] %vm172_vm0, %v1194_v1  ;;  %192 = vst.msk [vmem:[#allocation2 + $0x90] sm:$0xff] %vm172_vm0, %v1194_v1  ;;  %v1177_v38 = vld [vmem:[%s1531_s1 + $0x18] sm:$0xff]   ;;  %v1179_v40 = vld [vmem:[%s1531_s1 + $0x10] sm:$0xff]  }
  0x15   : > { %191 = vst.msk [vmem:[#allocation2 + $0x88] sm:$0x3] %vm174_vm1, %v1194_v1  ;;  %193 = vst.msk [vmem:[#allocation2 + $0x98] sm:$0x3] %vm174_vm1, %v1194_v1  ;;  %967 = vmatpush3.bf16.msra.mxu0 %v1173_v14  ;;  %1030 = vmatpush3.bf16.msra.mxu1 %v1173_v14  ;;  %v1180_v45 = vld [vmem:[%s1531_s1 + $0x48] sm:$0xff]   ;;  %v1182_v49 = vld [vmem:[%s1531_s1 + $0x40] sm:$0xff]  }
  0x16   : > { %204 = vst.msk [vmem:[#allocation2 + $0x21] sm:$0xff] %vm172_vm0, %v195_v6  ;;  %205 = vst.msk [vmem:[#allocation2 + $0x31] sm:$0xff] %vm172_vm0, %v196_v7  ;;  %v227_v16 = vld [vmem:[#allocation2 + $0x2] sm:$0xff]  ;;  %968 = vmatprep.subr.bf16.mxu0 %v1174_v15  ;;  %1023 = vmatprep.subr.bf16.mxu1 %v1174_v15 }
  0x17   : > { %203 = vst.msk [vmem:[#allocation2 + $0x11] sm:$0xff] %vm172_vm0, %v194_v8  ;;  %208 = vst.msk [vmem:[#allocation2 + $0x61] sm:$0xff] %vm172_vm0, %v199_v9  ;;  %v219_v24 = vld [vmem:[#allocation2 + $0x1] sm:$0xff] }
  0x18   : > { %209 = vst.msk [vmem:[#allocation2 + $0x71] sm:$0xff] %vm172_vm0, %v200_v10  ;;  %210 = vst.msk [vmem:[#allocation2 + $0x81] sm:$0xff] %vm172_vm0, %v201_v11  ;;  %v1181_v47 = vld [vmem:[%s1531_s1 + $0x8] sm:$0xff]   ;;  %v1183_v54 = vld [vmem:[%s1531_s1] sm:$0xff]  }
  0x19   : > { %206 = vst.msk [vmem:[#allocation2 + $0x41] sm:$0xff] %vm172_vm0, %v197_v12  ;;  %207 = vst.msk [vmem:[#allocation2 + $0x51] sm:$0xff] %vm172_vm0, %v198_v13  ;;  %969 = vmatpush3.bf16.msra.mxu0 %v1175_v17  ;;  %1031 = vmatpush3.bf16.msra.mxu1 %v1175_v17  ;;  %v1376_v56 = vld [vmem:[%s1531_s1 + $0x88] sm:$0xff]  }
  0x1a   : > { %970 = vmatprep.subr.bf16.mxu0 %v1176_v18  ;;  %1024 = vmatprep.subr.bf16.mxu1 %v1176_v18 }
  0x1b   : > { %v267_v43 = vld [vmem:[#allocation2 + $0x90] sm:$0xff] }
  0x1c   : > { %v275_v53 = vld [vmem:[#allocation2 + $0x91] sm:$0xff] }
  0x1d   : > { %v1297_v19 = vld [vmem:[#allocation2 + $0x20] sm:$0xff]  ;;  %v1299_v20 = vld [vmem:[#allocation2 + $0x30] sm:$0xff]  ;;  %971 = vmatpush3.bf16.msra.mxu0 %v1177_v38  ;;  %1032 = vmatpush3.bf16.msra.mxu1 %v1177_v38 }
  0x1e   : > { %v251_v21 = vld [vmem:[#allocation2 + $0x12] sm:$0xff]  ;;  %v1058_v22 = vpack.i.bf16 %v1299_v20, %v1297_v19  ;;  %v1303_v23 = vld [vmem:[#allocation2 + $0x22] sm:$0xff]  ;;  %972 = vmatprep.subr.bf16.mxu0 %v1178_v39  ;;  %1025 = vmatprep.subr.bf16.mxu1 %v1178_v39 }
  0x1f   : > { %v1305_v25 = vld [vmem:[#allocation2 + $0x11] sm:$0xff]  ;;  %v1048_v26 = vpack.i.bf16 %v1303_v23, %v251_v21  ;;  %v1063_v27 = vpack.i.bf16 %v251_v21, %v227_v16  ;;  %v1313_v30 = vld [vmem:[#allocation2 + $0x21] sm:$0xff] }
  0x20   : > { %1059 = vrot.lane.b32.xlu1 %v1058_v22, %s1195_s10  ;;  %v1053_v28 = vpack.i.bf16 %v1305_v25, %v219_v24  ;;  %v1311_v29 = vld [vmem:[#allocation2 + $0x10] sm:$0xff]  ;;  %v1317_v32 = vld [vmem:[#allocation2 + $0x61] sm:$0xff] }
  0x21   : > { %1049 = vrot.lane.b32.xlu0 %v1048_v26, %s1196_s11  ;;  %v1315_v31 = vld [vmem:[#allocation2 + $0x31] sm:$0xff]  ;;  %v1073_v33 = vpack.i.bf16 %v1297_v19, %v1311_v29  ;;  %v1326_v36 = vld [vmem:[#allocation2 + $0x82] sm:$0xff]  ;;  %973 = vmatpush3.bf16.msra.mxu0 %v1179_v40 }
  0x22   : > { %v1322_v34 = vld [vmem:[#allocation2 + $0x71] sm:$0xff]  ;;  %v1068_v37 = vpack.i.bf16 %v1315_v31, %v1313_v30  ;;  %v1345_v42 = vld [vmem:[#allocation2 + $0x62] sm:$0xff]  ;;  %1033 = vmatpush3.bf16.msra.mxu1 %v1179_v40  ;;  %974 = vmatprep.subr.bf16.mxu0 %v1180_v45 }
  0x23   : > { %v1324_v35 = vld [vmem:[#allocation2 + $0x72] sm:$0xff]  ;;  %v1343_v41 = vpack.i.bf16 %v1322_v34, %v1317_v32  ;;  %v266_v46 = vld [vmem:[#allocation2 + $0x80] sm:$0xff]  ;;  %1026 = vmatprep.subr.bf16.mxu1 %v1180_v45 }
  0x24   : > { %1064 = vrot.lane.b32.xlu1 %v1063_v27, %s1195_s10  ;;  %v1078_v44 = vpack.i.bf16 %v1326_v36, %v1324_v35  ;;  %v1093_v48 = vpack.i.bf16 %v1324_v35, %v1345_v42  ;;  %v1088_v50 = vpack.i.bf16 %v267_v43, %v266_v46  ;;  %v1364_v51 = vld [vmem:[#allocation2 + $0x70] sm:$0xff]  ;;  %v1366_v52 = vld [vmem:[#allocation2 + $0x81] sm:$0xff]  ;;  %v534_v6 = vpack.c.bf16 %v1324_v35, %v1345_v42 }
  0x25   : > { %1054 = vrot.lane.b32.xlu0 %v1053_v28, %s1196_s11  ;;  %975 = vmatpush3.bf16.msra.mxu0 %v1181_v47  ;;  %v1103_v55 = vpack.i.bf16 %v266_v46, %v1364_v51  ;;  %v1098_v57 = vpack.i.bf16 %v275_v53, %v1366_v52  ;;  %v1380_v58 = vld [vmem:[#allocation2 + $0x32] sm:$0xff]  ;;  %v1382_v59 = vld [vmem:[#allocation2 + $0x42] sm:$0xff] }
  0x26   : > { %1034 = vmatpush3.bf16.msra.mxu1 %v1181_v47  ;;  %976 = vmatprep.subr.bf16.mxu0 %v1182_v49  ;;  %v1384_v60 = vld [vmem:[#allocation2 + $0x52] sm:$0xff]  ;;  %v528_v61 = vpack.c.bf16 %v1380_v58, %v1303_v23  ;;  %v1108_v63 = vpack.i.bf16 %v1382_v59, %v1380_v58  ;;  %v1395_v0 = vld [vmem:[#allocation2 + $0x40] sm:$0xff]  ;;  %v1123_v2 = vpack.i.bf16 %v1380_v58, %v1303_v23 }
  0x27   : > { %1027 = vmatprep.subr.bf16.mxu1 %v1182_v49  ;;  %v531_v62 = vpack.c.bf16 %v1384_v60, %v1382_v59  ;;  %v1397_v1 = vld [vmem:[#allocation2 + $0x50] sm:$0xff]  ;;  %v1405_v4 = vld [vmem:[#allocation2 + $0x41] sm:$0xff]  ;;  %v1133_v7 = vpack.i.bf16 %v1395_v0, %v1299_v20  ;;  %v1138_v9 = vpack.i.bf16 %v1345_v42, %v1384_v60  ;;  %v1153_v11 = vpack.i.bf16 %v1384_v60, %v1382_v59 }
  0x28   : > { %1074 = vrot.lane.b32.xlu1 %v1073_v33, %s1197_s20  ;;  %v1118_v3 = vpack.i.bf16 %v1397_v1, %v1395_v0  ;;  %v1407_v5 = vld [vmem:[#allocation2 + $0x51] sm:$0xff]  ;;  %v264_v10 = vld [vmem:[#allocation2 + $0x60] sm:$0xff] }
  0x29   : > { %1069 = vrot.lane.b32.xlu0 %v1068_v37, %s1197_s20  ;;  %977 = vmatpush3.bf16.msra.mxu0 %v1183_v54  ;;  %v1128_v8 = vpack.i.bf16 %v1407_v5, %v1405_v4  ;;  %v1148_v12 = vpack.i.bf16 %v1364_v51, %v264_v10  ;;  %v1163_v13 = vpack.i.bf16 %v264_v10, %v1397_v1  ;;  %v211_v21 = vld [vmem:[#allocation2] sm:$0xff] }
  0x2a   : > { %1035 = vmatpush3.bf16.msra.mxu1 %v1183_v54 }
  0x2b   : > { %1008 = vmatprep.subr.bf16.mxu1 %v1376_v56 }
  0x2c   : > { %1084 = vrot.lane.b32.xlu1 %v1343_v41, %s1196_s11 }
  0x2d   : > { %1079 = vrot.lane.b32.xlu0 %v1078_v44, %s1196_s11 }
  0x30   : > { %1094 = vrot.lane.b32.xlu1 %v1093_v48, %s1195_s10 }
  0x31   : > { %1089 = vrot.lane.b32.xlu0 %v1088_v50, %s1195_s10 }
  0x34   : > { %1104 = vrot.lane.b32.xlu1 %v1103_v55, %s1197_s20 }
  0x35   : > { %1099 = vrot.lane.b32.xlu0 %v1098_v57, %s1197_s20 }
  0x38   : > { %1114 = vrot.lane.b32.xlu1 %v1068_v37, %s1196_s11 }
  0x39   : > { %1109 = vrot.lane.b32.xlu0 %v1108_v63, %s1196_s11 }
  0x3c   : > { %1124 = vrot.lane.b32.xlu1 %v1123_v2, %s1195_s10 }
  0x3d   : > { %1119 = vrot.lane.b32.xlu0 %v1118_v3, %s1195_s10 }
  0x40   : > { %1134 = vrot.lane.b32.xlu1 %v1133_v7, %s1197_s20 }
  0x41   : > { %1129 = vrot.lane.b32.xlu0 %v1128_v8, %s1197_s20 }
  0x44   : > { %1144 = vrot.lane.b32.xlu1 %v1128_v8, %s1196_s11 }
  0x45   : > { %1139 = vrot.lane.b32.xlu0 %v1138_v9, %s1196_s11  ;;  %s170_s11 = scalar_lea.vmem %s1533_s3, %s961_s8 }
  0x48   : > { %1154 = vrot.lane.b32.xlu1 %v1153_v11, %s1195_s10 }
  0x49   : > { %1149 = vrot.lane.b32.xlu0 %v1148_v12, %s1195_s10 }
  0x4c   : > { %1164 = vrot.lane.b32.xlu1 %v1163_v13, %s1197_s20 }
  0x4d   : > { %1159 = vrot.lane.b32.xlu0 %v1343_v41, %s1197_s20 }
  0x92   : > { %v1060_v14 = vpop.permute.xlu1 %1059 }
  0x93   : > { %v1050_v15 = vpop.permute.xlu0 %1049  ;;  %v1062_v33 = vunpack.i.h.bf16 %v1060_v14  ;;  %v1061_v37 = vunpack.i.l.bf16 %v1060_v14 }
  0x94   : > { %v1052_v16 = vunpack.i.h.bf16 %v1050_v15  ;;  %v1051_v17 = vunpack.i.l.bf16 %v1050_v15 }
  0x96   : > { %v1065_v18 = vpop.permute.xlu1 %1064  ;;  %v502_v41 = vsel %vm172_vm0, %v1305_v25, %v1051_v17  ;;  %v503_v43 = vsel %vm172_vm0, %v1313_v30, %v1052_v16 }
  0x97   : > { %v1055_v22 = vpop.permute.xlu0 %1054  ;;  %v1067_v24 = vunpack.i.h.bf16 %v1065_v18  ;;  %v1066_v26 = vunpack.i.l.bf16 %v1065_v18  ;;  %v510_v53 = vsel %vm484_vm2, %v502_v41, %v1061_v37 }
  0x98   : > { %v1057_v27 = vunpack.i.h.bf16 %v1055_v22  ;;  %v1056_v28 = vunpack.i.l.bf16 %v1055_v22 }
  0x9a   : > { %v476_v38 = vsel %vm172_vm0, %v211_v21, %v1056_v28  ;;  %v477_v39 = vsel %vm172_vm0, %v1311_v29, %v1057_v27  ;;  %v1075_v40 = vpop.permute.xlu1 %1074  ;;  %v511_v29 = vsel %vm484_vm2, %v503_v43, %v1062_v33 }
  0x9b   : > { %v1077_v44 = vunpack.i.h.bf16 %v1075_v40  ;;  %v1076_v45 = vunpack.i.l.bf16 %v1075_v40  ;;  %v1070_v46 = vpop.permute.xlu0 %1069  ;;  %v485_v49 = vsel %vm484_vm2, %v476_v38, %v1066_v26  ;;  %v486_v50 = vsel %vm484_vm2, %v477_v39, %v1067_v24 }
  0x9c   : > { %v1072_v47 = vunpack.i.h.bf16 %v1070_v46  ;;  %v1071_v48 = vunpack.i.l.bf16 %v1070_v46 }
  0x9d   : > { %v494_v54 = vsel %vm493_vm3, %v485_v49, %v1076_v45  ;;  %v495_v25 = vsel %vm493_vm3, %v486_v50, %v1077_v44 }
  0x9e   : > { %v1085_v55 = vpop.permute.xlu1 %1084  ;;  %v518_v30 = vsel %vm493_vm3, %v510_v53, %v1071_v48  ;;  %v519_v57 = vsel %vm493_vm3, %v511_v29, %v1072_v47  ;;  %v526_v63 = vpack.c.bf16 %v495_v25, %v494_v54  ;;  %v1185_v48 = vld [vmem:[%s1531_s1 + $0x80] sm:$0xff]  }
  0x9f   : > { %v1080_v2 = vpop.permute.xlu0 %1079  ;;  %v527_v3 = vpack.c.bf16 %v519_v57, %v518_v30  ;;  %v1087_v7 = vunpack.i.h.bf16 %v1085_v55  ;;  %v1086_v8 = vunpack.i.l.bf16 %v1085_v55 }
  0xa0   : > { %v1082_v11 = vunpack.i.h.bf16 %v1080_v2  ;;  %v1081_v12 = vunpack.i.l.bf16 %v1080_v2 }
  0xa1   : > { %733 = vmatprep.mubr.bf16.mxu0 %v527_v3  ;;  %v483_v18 = vsel %vm172_vm0, %v1364_v51, %v1087_v7  ;;  %v482_v21 = vsel %vm172_vm0, %v264_v10, %v1086_v8 }
  0xa2   : > { %734 = vmatmul.mubr.bf16.vlgmr.msra.gmra.mxu0 %v526_v63  ;;  %v1095_v9 = vpop.permute.xlu1 %1094  ;;  %v508_v28 = vsel %vm172_vm0, %v1322_v34, %v1081_v12  ;;  %v509_v33 = vsel %vm172_vm0, %v1366_v52, %v1082_v11 }
  0xa3   : > { %v1090_v13 = vpop.permute.xlu0 %1089  ;;  %v1097_v14 = vunpack.i.h.bf16 %v1095_v9  ;;  %v1096_v15 = vunpack.i.l.bf16 %v1095_v9 }
  0xa4   : > { %v1092_v16 = vunpack.i.h.bf16 %v1090_v13  ;;  %v1091_v17 = vunpack.i.l.bf16 %v1090_v13 }
  0xa5   : > { %v491_v37 = vsel %vm484_vm2, %v482_v21, %v1096_v15  ;;  %v492_v38 = vsel %vm484_vm2, %v483_v18, %v1097_v14 }
  0xa6   : > { %v1105_v22 = vpop.permute.xlu1 %1104  ;;  %v516_v51 = vsel %vm484_vm2, %v508_v28, %v1091_v17  ;;  %v517_v10 = vsel %vm484_vm2, %v509_v33, %v1092_v16 }
  0xa7   : > { %v1107_v24 = vunpack.i.h.bf16 %v1105_v22  ;;  %v1106_v26 = vunpack.i.l.bf16 %v1105_v22  ;;  %v1100_v27 = vpop.permute.xlu0 %1099  ;;  %v283_v22 = vld [vmem:[#allocation2 + $0x92] sm:$0xff] }
  0xa8   : > { %v1102_v39 = vunpack.i.h.bf16 %v1100_v27  ;;  %v1101_v40 = vunpack.i.l.bf16 %v1100_v27  ;;  %v537_v60 = vpack.c.bf16 %v283_v22, %v1326_v36 }
  0xa9   : > { %v500_v41 = vsel %vm493_vm3, %v491_v37, %v1106_v26  ;;  %v501_v43 = vsel %vm493_vm3, %v492_v38, %v1107_v24 }
  0xaa   : > { %v1115_v44 = vpop.permute.xlu1 %1114  ;;  %v524_v34 = vsel %vm493_vm3, %v516_v51, %v1101_v40  ;;  %v525_v45 = vsel %vm493_vm3, %v517_v10, %v1102_v39  ;;  %v535_v52 = vpack.c.bf16 %v501_v43, %v500_v41 }
  0xab   : > { %v1110_v46 = vpop.permute.xlu0 %1109  ;;  %v536_v47 = vpack.c.bf16 %v525_v45, %v524_v34  ;;  %v1117_v49 = vunpack.i.h.bf16 %v1115_v44  ;;  %v1116_v50 = vunpack.i.l.bf16 %v1115_v44 }
  0xac   : > { %v1112_v29 = vunpack.i.h.bf16 %v1110_v46  ;;  %v1111_v54 = vunpack.i.l.bf16 %v1110_v46 }
  0xad   : > { %757 = vmatprep.mubr.bf16.mxu1 %v536_v47  ;;  %v479_v2 = vsel %vm172_vm0, %v1299_v20, %v1117_v49  ;;  %v478_v3 = vsel %vm172_vm0, %v1297_v19, %v1116_v50 }
  0xae   : > { %758 = vmatmul.mubr.bf16.vlgmr.msra.gmra.mxu1 %v535_v52  ;;  %v1125_v53 = vpop.permute.xlu1 %1124  ;;  %v504_v23 = vsel %vm172_vm0, %v1315_v31, %v1111_v54 }
  0xaf   : > { %v1120_v25 = vpop.permute.xlu0 %1119  ;;  %1009 = vmatpush3.bf16.msra.mxu1 %v1376_v56  ;;  %1012 = vmatprep.mubr.msk.bf16.mxu1 %vm172_vm0, %v528_v61  ;;  %v1127_v55 = vunpack.i.h.bf16 %v1125_v53  ;;  %v1126_v30 = vunpack.i.l.bf16 %v1125_v53  ;;  %v505_v56 = vsel %vm172_vm0, %v1405_v4, %v1112_v29 }
  0xb0   : > { %1010 = vmatprep.subr.bf16.mxu1 %v1185_v48  ;;  %v1122_v57 = vunpack.i.h.bf16 %v1120_v25  ;;  %v1121_v63 = vunpack.i.l.bf16 %v1120_v25 }
  0xb1   : > { %v487_v9 = vsel %vm484_vm2, %v478_v3, %v1126_v30  ;;  %v488_v11 = vsel %vm484_vm2, %v479_v2, %v1127_v55  ;;  %v935_v2 = vld [vmem:[%s1532_s2] ss:$0 sm:$0xff] }
  0xb2   : > { %v1135_v7 = vpop.permute.xlu1 %1134  ;;  %v512_v13 = vsel %vm484_vm2, %v504_v23, %v1121_v63  ;;  %v513_v19 = vsel %vm484_vm2, %v505_v56, %v1122_v57 }
  0xb3   : > { %v1137_v58 = vunpack.i.h.bf16 %v1135_v7  ;;  %v1136_v61 = vunpack.i.l.bf16 %v1135_v7  ;;  %v1130_v8 = vpop.permute.xlu0 %1129  ;;  %1011 = vmatpush3.bf16.msra.mxu1 %v1185_v48 }
  0xb4   : > { %v1132_v12 = vunpack.i.h.bf16 %v1130_v8  ;;  %v1131_v20 = vunpack.i.l.bf16 %v1130_v8 }
  0xb5   : > { %v496_v14 = vsel %vm493_vm3, %v487_v9, %v1136_v61  ;;  %v497_v4 = vsel %vm493_vm3, %v488_v11, %v1137_v58 }
  0xb6   : > { %1013 = vmatmul.mubr.msk.bf16.vlgmr.msra.gmra.mxu1 %vm172_vm0, %v531_v62  ;;  %v1145_v31 = vpop.permute.xlu1 %1144  ;;  %v520_v15 = vsel %vm493_vm3, %v512_v13, %v1131_v20  ;;  %v521_v16 = vsel %vm493_vm3, %v513_v19, %v1132_v12  ;;  %v529_v17 = vpack.c.bf16 %v497_v4, %v496_v14 }
  0xb7   : > { %v1140_v18 = vpop.permute.xlu0 %1139  ;;  %v530_v21 = vpack.c.bf16 %v521_v16, %v520_v15  ;;  %1016 = vmatprep.mubr.msk.bf16.mxu1 %vm172_vm0, %v534_v6  ;;  %v1147_v24 = vunpack.i.h.bf16 %v1145_v31  ;;  %v1146_v26 = vunpack.i.l.bf16 %v1145_v31 }
  0xb8   : > { %v1142_v62 = vunpack.i.h.bf16 %v1140_v18  ;;  %v1141_v27 = vunpack.i.l.bf16 %v1140_v18 }
  0xb9   : > { %741 = vmatprep.mubr.bf16.mxu0 %v530_v21  ;;  %v481_v35 = vsel %vm172_vm0, %v1397_v1, %v1147_v24  ;;  %v480_v42 = vsel %vm172_vm0, %v1395_v0, %v1146_v26 }
  0xba   : > { %742 = vmatmul.mubr.bf16.gmra.mxu0 %v529_v17  ;;  %v1155_v59 = vpop.permute.xlu1 %1154  ;;  %v507_v40 = vsel %vm172_vm0, %v1317_v32, %v1142_v62  ;;  %v506_v36 = vsel %vm172_vm0, %v1407_v5, %v1141_v27 }
  0xbb   : > { %v1150_v28 = vpop.permute.xlu0 %1149  ;;  %v1157_v33 = vunpack.i.h.bf16 %v1155_v59  ;;  %v1156_v37 = vunpack.i.l.bf16 %v1155_v59 }
  0xbc   : > { %v1152_v38 = vunpack.i.h.bf16 %v1150_v28  ;;  %v1151_v39 = vunpack.i.l.bf16 %v1150_v28 }
  0xbd   : > { %v489_v43 = vsel %vm484_vm2, %v480_v42, %v1156_v37  ;;  %v490_v44 = vsel %vm484_vm2, %v481_v35, %v1157_v33 }
  0xbe   : > { %1017 = vmatmul.mubr.msk.bf16.gmra.mxu1 %vm172_vm0, %v537_v60  ;;  %v1165_v6 = vpop.permute.xlu1 %1164  ;;  %v514_v0 = vsel %vm484_vm2, %v506_v36, %v1151_v39  ;;  %v515_v45 = vsel %vm484_vm2, %v507_v40, %v1152_v38 }
  0xbf   : > { %v1167_v51 = vunpack.i.h.bf16 %v1165_v6  ;;  %v1166_v10 = vunpack.i.l.bf16 %v1165_v6  ;;  %v1160_v41 = vpop.permute.xlu0 %1159 }
  0xc0   : > { %v1162_v1 = vunpack.i.h.bf16 %v1160_v41  ;;  %v1161_v34 = vunpack.i.l.bf16 %v1160_v41 }
  0xc1   : > { %v498_v52 = vsel %vm493_vm3, %v489_v43, %v1166_v10  ;;  %v499_v32 = vsel %vm493_vm3, %v490_v44, %v1167_v51 }
  0xc2   : > { %v522_v46 = vsel %vm493_vm3, %v514_v0, %v1161_v34  ;;  %v523_v5 = vsel %vm493_vm3, %v515_v45, %v1162_v1  ;;  %v532_v47 = vpack.c.bf16 %v499_v32, %v498_v52 }
  0xc3   : > { %v533_v48 = vpack.c.bf16 %v523_v5, %v522_v46 }
  0xc5   : > { %749 = vmatprep.mubr.bf16.mxu0 %v533_v48 }
  0xc6   : > { %750 = vmatmul.mubr.bf16.gmra.mxu0 %v532_v47 }
 0x162   : > { %v978_v49 = vpop.f32.mrf.mxu0 }
 0x164   : > { %v979_v50 = vpop.f32.mrf.mxu0 }
 0x165   : > { %v980_v57 = vadd.f32 %v979_v50, %v978_v49 }
 0x166   : > { %v981_v29 = vpop.f32.mrf.mxu0 }
 0x167   : > { %v736_v56 = vadd.f32 %v980_v57, %v935_v2 }
 0x168   : > { %v982_v55 = vpop.f32.mrf.mxu0 }
 0x169   : > { %v983_v3 = vadd.f32 %v982_v55, %v981_v29 }
 0x16b   : > { %v739_v9 = vadd.f32 %v983_v3, %v935_v2 }
 0x16e   : > { %v996_v53 = vpop.f32.mrf.mxu1 }
 0x170   : > { %v997_v54 = vpop.f32.mrf.mxu1 }
 0x171   : > { %v998_v61 = vadd.f32 %v997_v54, %v996_v53 }
 0x172   : > { %v999_v25 = vpop.f32.mrf.mxu1 }
 0x173   : > { %v760_v17 = vadd.f32 %v998_v61, %v935_v2 }
 0x174   : > { %v1000_v30 = vpop.f32.mrf.mxu1 }
 0x175   : > { %v1001_v20 = vadd.f32 %v1000_v30, %v999_v25 }
 0x176   : > { %v1014_v63 = vpop.f32.mrf.mxu1 }
 0x177   : > { %v763_v59 = vadd.f32 %v1001_v20, %v935_v2 }
 0x178   : > { %v800_v7 = vpop.f32.mrf.mxu1 }
 0x179   : > { %v801_v8 = vadd.f32 %v800_v7, %v736_v56 }
 0x17a   : > { %v984_v23 = vpop.f32.mrf.mxu0  ;;  %v1015_v58 = vpop.f32.mrf.mxu1 }
 0x17b   : > { %v831_v31 = vmax.f32 %v801_v8, 0.0 }
 0x17c   : > { %v985_v11 = vpop.f32.mrf.mxu0  ;;  %v803_v12 = vpop.f32.mrf.mxu1 }
 0x17d   : > { %v986_v13 = vadd.f32 %v985_v11, %v984_v23  ;;  %v804_v19 = vadd.f32 %v803_v12, %v739_v9 }
 0x17e   : > { %v987_v14 = vpop.f32.mrf.mxu0  ;;  %v1018_v4 = vpop.f32.mrf.mxu1 }
 0x17f   : > { %v744_v15 = vadd.f32 %v986_v13, %v935_v2  ;;  %v832_v16 = vmax.f32 %v804_v19, 0.0  ;;  %v825_v24 = vadd.f32 %v1018_v4, %v760_v17 }
 0x180   : > { %v988_v18 = vpop.f32.mrf.mxu0  ;;  %v816_v21 = vpop.f32.mrf.mxu1 }
 0x181   : > { %v839_v22 = vmax.f32 %v831_v31, %v832_v16  ;;  %v989_v26 = vadd.f32 %v988_v18, %v987_v14  ;;  %v809_v62 = vadd.f32 %v1014_v63, %v744_v15  ;;  %v837_v33 = vmax.f32 %v825_v24, 0.0 }
 0x182   : > { %v1019_v60 = vpop.f32.mrf.mxu1 }
 0x183   : > { %843 = vst.msk [vmem:[#allocation3] sm:$0xff] %vm484_vm2, %v839_v22  ;;  %v747_v27 = vadd.f32 %v989_v26, %v935_v2  ;;  %v828_v28 = vadd.f32 %v1019_v60, %v763_v59  ;;  %v833_v35 = vmax.f32 %v809_v62, 0.0 }
 0x184   : > { %v819_v5 = vpop.f32.mrf.mxu1 }
 0x185   : > { %v812_v37 = vadd.f32 %v1015_v58, %v747_v27  ;;  %v838_v38 = vmax.f32 %v828_v28, 0.0 }
 0x186   : > { %v990_v39 = vpop.f32.mrf.mxu0 }
 0x187   : > { %v834_v42 = vmax.f32 %v812_v37, 0.0  ;;  %v842_v6 = vmax.f32 %v837_v33, %v838_v38 }
 0x188   : > { %v991_v40 = vpop.f32.mrf.mxu0 }
 0x189   : > { %v840_v36 = vmax.f32 %v833_v35, %v834_v42  ;;  %846 = vst.msk [vmem:[#allocation3 + $0x18] sm:$0xff] %vm484_vm2, %v842_v6  ;;  %v992_v51 = vadd.f32 %v991_v40, %v990_v39 }
 0x18a   : > { %v847_v10 = vld [vmem:[#allocation3] ss:$2 sm:$0xf]  ;;  %v855_v41 = vld [vmem:[#allocation3 + $0x1] ss:$2 sm:$0xf]  ;;  %v993_v43 = vpop.f32.mrf.mxu0 }
 0x18b   : > { %v862_v44 = vmax.f32 %v847_v10, %v855_v41  ;;  %844 = vst.msk [vmem:[#allocation3 + $0x8] sm:$0xff] %vm484_vm2, %v840_v36  ;;  %v752_v1 = vadd.f32 %v992_v51, %v935_v2 }
 0x18c   : > { %v994_v34 = vpop.f32.mrf.mxu0 }
 0x18d   : > { %867 = vst.msk [vmem:[%s170_s11] sm:$0xf] %vm866_vm4, %v862_v44  ;;  %v995_v0 = vadd.f32 %v994_v34, %v993_v43  ;;  %v817_v45 = vadd.f32 %v816_v21, %v752_v1 }
 0x18f   : > { %v755_v52 = vadd.f32 %v995_v0, %v935_v2  ;;  %v835_v29 = vmax.f32 %v817_v45, 0.0 }
 0x190   : > { %v853_v32 = vld [vmem:[#allocation3 + $0x18] ss:$2 sm:$0xf]  ;;  %v861_v46 = vld [vmem:[#allocation3 + $0x19] ss:$2 sm:$0xf] }
 0x191   : > { %v865_v47 = vmax.f32 %v853_v32, %v861_v46  ;;  %v820_v48 = vadd.f32 %v819_v5, %v755_v52 }
 0x192   : > { %v849_v49 = vld [vmem:[#allocation3 + $0x8] ss:$2 sm:$0xf]  ;;  %v857_v50 = vld [vmem:[#allocation3 + $0x9] ss:$2 sm:$0xf] }
 0x193   : > { %v863_v53 = vmax.f32 %v849_v49, %v857_v50  ;;  %870 = vst.msk [vmem:[%s170_s11 + $0xc] sm:$0xf] %vm866_vm4, %v865_v47  ;;  %v836_v54 = vmax.f32 %v820_v48, 0.0 }
 0x195   : > { %868 = vst.msk [vmem:[%s170_s11 + $0x4] sm:$0xf] %vm866_vm4, %v863_v53  ;;  %v841_v25 = vmax.f32 %v835_v29, %v836_v54 }
 0x197   : > { %845 = vst.msk [vmem:[#allocation3 + $0x10] sm:$0xff] %vm484_vm2, %v841_v25 }
 0x19e   : > { %v851_v55 = vld [vmem:[#allocation3 + $0x10] ss:$2 sm:$0xf]  ;;  %v859_v30 = vld [vmem:[#allocation3 + $0x11] ss:$2 sm:$0xf] }
 0x19f   : > { %v864_v57 = vmax.f32 %v851_v55, %v859_v30 }
 0x1a1   : > { %869 = vst.msk [vmem:[%s170_s11 + $0x8] sm:$0xf] %vm866_vm4, %v864_v57 }
 0x1a2 PF: > { %s13_s12 = sadd.s32 1, %s1192_s12  }
 0x1a3   : > { %p10_p4 = scmp.ge.s32.totalorder %s13_s12, 4  }
 0x1a5   :  { %12 = sbr.rel (!%p10_p4) target bundleno = 1 (0x1), region = 71 }

// kernel: baseline_cnn_forward.5
= control target key start
LH: loop header
LB: loop body
LE: loop exit
PB: predicated region body
PF: predicated region fallthrough
CT: control target
= control target key end

     0   :  { %s1000_s20 = smov 0   ;;  %s1114_s0 = inlined_call_operand.vmem [shape: f32[2,1024], index: 0, kind: input, shape index: {}]   ;;  %s1115_s1 = inlined_call_operand.vmem [shape: bf16[1024,128], index: 1, kind: input, shape index: {}]   ;;  %s1116_s2 = inlined_call_operand.vmem [shape: f32[1,128], index: 2, kind: input, shape index: {}]   ;;  %s1117_s3 = inlined_call_operand.vmem [shape: f32[128,1], index: 3, kind: input, shape index: {}]   ;;  %s1118_s4 = inlined_call_operand.<no memory space> [shape: f32[1,1], index: 4, kind: input, shape index: {}]   ;;  %s1119_s5 = inlined_call_operand.vmem [shape: f32[2,1], index: 5, kind: output, shape index: {}]  }
   0x1   :  { %v10_v0 = vstv %s1118_s4 }
   0x2   :  { %11 = vst [vmem:[#allocation3] sm:$0x1] %v10_v0 }
   0x3 LB: > { %s1006_s21 = sadd.s32 4294967295, %s961_s20   ;;  %p766_p0 = scmp.ge.s32.totalorder %s961_s20, 1  ;;  %s961_s20 = sphi %s1000_s20, %s17_s20  }
   0x4   : > { %p196_p1 = scmp.lt.s32.totalorder %s961_s20, 3 }
   0x6   : > { %p197_p2 = pnand %p766_p0, %p196_p1 }
   0x7   : > { %s767_s4 = sshll.u32 (!%p197_p2), %s1006_s21, 2  ;;  %s769_s22 = sshll.u32 (!%p197_p2), %s1006_s21, 6 }
   0x8   : > { %200 = sbr.rel (%p197_p2) target bundleno = 521 (0x209), region = 40  ;;  %p225_p3 = scmp.lt.s32.totalorder (!%p197_p2), %s767_s4, 7 }
   0x9   : > { %p231_p4 = scmp.lt.s32.totalorder (!%p197_p2), %s769_s22, 127  ;;  %p771_p5 = scmp.ne.s32.totalorder (!%p197_p2), %s1006_s21, 0 }
   0xd   : > { %s1121_s4 = smov (!%p225_p3, %s767_s4), 7  ;;  %s1123_s22 = smov (!%p231_p4, %s769_s22), 127 }
   0xe   : > { %s768_s23 = sshll.u32 %s1121_s4, 1  ;;  %s770_s27 = sshll.u32 %s1123_s22, 2 }
   0xf   : > { %s1015_s26 = scalar_lea.vmem %s1114_s0, %s768_s23  ;;  %s1020_s30 = scalar_lea.vmem %s1115_s1, %s770_s27 }
  0x10   : > { %240 = sbr.rel (%p771_p5) target bundleno = 23 (0x17), region = 44 }
  0x15   : > { %v963_v1 = vmov 0.0  }
  0x16   : > { %241 = vst [vmem:[#allocation2] sm:$0x3] %v963_v1 }
  0x17 PF: > { %v918_v2 = vld [vmem:[%s1020_s30 + $0x78] sm:$0xff]   ;;  %v922_v6 = vld [vmem:[%s1020_s30 + $0x70] sm:$0xff]   ;;  %v926_v10 = vld [vmem:[%s1020_s30 + $0x68] sm:$0xff]   ;;  %v249_v32 = vlaneseq  ;;  %v964_v36 = vmov 1983009808   ;;  %p804_p6 = scmp.ne.s32.totalorder %s1006_s21, 1 }
  0x18   : > { %v919_v3 = vld [vmem:[%s1020_s30 + $0xf8] sm:$0xff]   ;;  %810 = vmatprep.subr.bf16.mxu0 %v918_v2  ;;  %v923_v7 = vld [vmem:[%s1020_s30 + $0xf0] sm:$0xff]   ;;  %v927_v11 = vld [vmem:[%s1020_s30 + $0xe8] sm:$0xff]   ;;  %v247_v37 = vunpack.c.l.s4 %v964_v36 }
  0x19   : > { %v920_v4 = vld [vmem:[%s1020_s30 + $0x38] sm:$0xff]   ;;  %832 = vmatprep.subr.bf16.mxu1 %v919_v3  ;;  %v924_v8 = vld [vmem:[%s1020_s30 + $0x30] sm:$0xff]   ;;  %v928_v12 = vld [vmem:[%s1020_s30 + $0x28] sm:$0xff]   ;;  %v250_v38 = vshrl.u32 %v249_v32, 7 }
  0x1a   : > { %v921_v5 = vld [vmem:[%s1020_s30 + $0xb8] sm:$0xff]   ;;  %811 = vmatpush3.bf16.msra.mxu0 %v920_v4  ;;  %v925_v9 = vld [vmem:[%s1020_s30 + $0xb0] sm:$0xff]   ;;  %v929_v13 = vld [vmem:[%s1020_s30 + $0xa8] sm:$0xff]   ;;  %v248_v39 = vunpack.c.0.s8 %v247_v37 }
  0x1b   : > { %833 = vmatpush3.bf16.msra.mxu1 %v921_v5  ;;  %812 = vmatprep.subr.bf16.mxu0 %v922_v6  ;;  %v930_v14 = vld [vmem:[%s1020_s30 + $0x60] sm:$0xff]   ;;  %v934_v18 = vld [vmem:[%s1020_s30 + $0x58] sm:$0xff]   ;;  %v938_v22 = vld [vmem:[%s1020_s30 + $0x50] sm:$0xff]  }
  0x1c   : > { %834 = vmatprep.subr.bf16.mxu1 %v923_v7  ;;  %v931_v15 = vld [vmem:[%s1020_s30 + $0xe0] sm:$0xff]   ;;  %v935_v19 = vld [vmem:[%s1020_s30 + $0xd8] sm:$0xff]   ;;  %v939_v23 = vld [vmem:[%s1020_s30 + $0xd0] sm:$0xff]   ;;  %v251_v41 = vsub.s32 %v248_v39, %v250_v38 }
  0x1d   : > { %v932_v16 = vld [vmem:[%s1020_s30 + $0x20] sm:$0xff]   ;;  %v936_v20 = vld [vmem:[%s1020_s30 + $0x18] sm:$0xff]   ;;  %v940_v24 = vld [vmem:[%s1020_s30 + $0x10] sm:$0xff]  }
  0x1e   : > { %813 = vmatpush3.bf16.msra.mxu0 %v924_v8  ;;  %v933_v17 = vld [vmem:[%s1020_s30 + $0xa0] sm:$0xff]   ;;  %v937_v21 = vld [vmem:[%s1020_s30 + $0x98] sm:$0xff]   ;;  %v941_v25 = vld [vmem:[%s1020_s30 + $0x90] sm:$0xff]  }
  0x1f   : > { %835 = vmatpush3.bf16.msra.mxu1 %v925_v9  ;;  %814 = vmatprep.subr.bf16.mxu0 %v926_v10  ;;  %v942_v26 = vld [vmem:[%s1020_s30 + $0x48] sm:$0xff]   ;;  %v946_v30 = vld [vmem:[%s1020_s30 + $0x40] sm:$0xff]  }
  0x20   : > { %836 = vmatprep.subr.bf16.mxu1 %v927_v11  ;;  %v943_v27 = vld [vmem:[%s1020_s30 + $0xc8] sm:$0xff]   ;;  %v947_v31 = vld [vmem:[%s1020_s30 + $0xc0] sm:$0xff]  }
  0x21   : > { %v944_v28 = vld [vmem:[%s1020_s30 + $0x8] sm:$0xff]   ;;  %v948_v33 = vld [vmem:[%s1020_s30] sm:$0xff]  }
  0x22   : > { %815 = vmatpush3.bf16.msra.mxu0 %v928_v12  ;;  %v945_v29 = vld [vmem:[%s1020_s30 + $0x88] sm:$0xff]   ;;  %v949_v34 = vld [vmem:[%s1020_s30 + $0x80] sm:$0xff]  }
  0x23   : > { %837 = vmatpush3.bf16.msra.mxu1 %v929_v13  ;;  %816 = vmatprep.subr.bf16.mxu0 %v930_v14  ;;  %v243_v35 = vld [vmem:[%s1015_s26] sm:$0xff] }
  0x24   : > { %838 = vmatprep.subr.bf16.mxu1 %v931_v15  ;;  %v245_v40 = vcombine.high %v243_v35, %v243_v35  ;;  %v252_v42 = vrot.slane %v243_v35, %v251_v41  ;;  %v242_v56 = vld [vmem:[#allocation2] sm:$0x3] }
  0x26   : > { %817 = vmatpush3.bf16.msra.mxu0 %v932_v16  ;;  %v259_v43 = vrot.slane %v245_v40, %v251_v41  ;;  %v260_v44 = vcombine.high %v252_v42, %v252_v42  ;;  %v266_v46 = vpack.c.bf16 %v252_v42, %v252_v42 }
  0x27   : > { %839 = vmatpush3.bf16.msra.mxu1 %v933_v17  ;;  %818 = vmatprep.subr.bf16.mxu0 %v934_v18 }
  0x28   : > { %840 = vmatprep.subr.bf16.mxu1 %v935_v19  ;;  %v261_v45 = vcombine.high %v259_v43, %v259_v43  ;;  %v268_v47 = vpack.c.bf16 %v259_v43, %v259_v43  ;;  %v267_v48 = vpack.c.bf16 %v260_v44, %v260_v44 }
  0x2a   : > { %819 = vmatpush3.bf16.msra.mxu0 %v936_v20  ;;  %v269_v49 = vpack.c.bf16 %v261_v45, %v261_v45  ;;  %558 = vmatprep.mubr.bf16.mxu0 %v267_v48 }
  0x2b   : > { %841 = vmatpush3.bf16.msra.mxu1 %v937_v21  ;;  %820 = vmatprep.subr.bf16.mxu0 %v938_v22 }
  0x2c   : > { %842 = vmatprep.subr.bf16.mxu1 %v939_v23  ;;  %598 = vmatprep.mubr.bf16.mxu1 %v269_v49 }
  0x2e   : > { %821 = vmatpush3.bf16.msra.mxu0 %v940_v24 }
  0x2f   : > { %843 = vmatpush3.bf16.msra.mxu1 %v941_v25  ;;  %822 = vmatprep.subr.bf16.mxu0 %v942_v26 }
  0x30   : > { %844 = vmatprep.subr.bf16.mxu1 %v943_v27 }
  0x32   : > { %823 = vmatpush3.bf16.msra.mxu0 %v944_v28 }
  0x33   : > { %845 = vmatpush3.bf16.msra.mxu1 %v945_v29  ;;  %824 = vmatprep.subr.bf16.mxu0 %v946_v30 }
  0x34   : > { %846 = vmatprep.subr.bf16.mxu1 %v947_v31 }
  0x36   : > { %825 = vmatpush3.bf16.msra.mxu0 %v948_v33 }
  0x37   : > { %847 = vmatpush3.bf16.msra.mxu1 %v949_v34 }
  0x39   : > { %559 = vmatmul.mubr.bf16.vlgmr.msra.gmra.mxu0 %v266_v46 }
  0x3a   : > { %599 = vmatmul.mubr.bf16.vlgmr.msra.gmra.mxu1 %v268_v47 }
  0xf9   : > { %v826_v50 = vpop.f32.mrf.mxu0 }
  0xfa   : > { %v848_v51 = vpop.f32.mrf.mxu1 }
  0xfb   : > { %v827_v52 = vpop.f32.mrf.mxu0 }
  0xfc   : > { %v849_v53 = vpop.f32.mrf.mxu1  ;;  %v828_v54 = vadd.f32 %v827_v52, %v826_v50 }
  0xfd   : > { %v850_v55 = vadd.f32 %v849_v53, %v848_v51  ;;  %v829_v57 = vpop.f32.mrf.mxu0 }
  0xfe   : > { %v851_v58 = vpop.f32.mrf.mxu1 }
  0xff   : > { %v601_v59 = vadd.f32 %v850_v55, %v828_v54  ;;  %v830_v60 = vpop.f32.mrf.mxu0  ;;  %611 = sbr.rel (%p804_p6) target bundleno = 521 (0x209), region = 48 }
 0x100   : > { %v852_v61 = vpop.f32.mrf.mxu1 }
 0x101   : > { %v606_v62 = vadd.f32 %v601_v59, %v242_v56 }
 0x103   : > { %607 = vst [vmem:[#allocation2] sm:$0x3] %v606_v62 }
 0x104   : > { %v637_v63 = vld [vmem:[%s1117_s3 + $0x78] sm:$0xff]  ;;  %v965_v0 = vmov 0.0   ;;  %v636_v1 = vld [vmem:[%s1117_s3 + $0x70] sm:$0xff]  ;;  %vm966_vm0 = vmmov 0   ;;  %v635_v2 = vld [vmem:[%s1117_s3 + $0x68] sm:$0xff]  ;;  %vm721_vm1 = vcmask 1024  }
 0x105   : > { %871 = vmatprep.subr.mxu0 %v965_v0  ;;  %903 = vmatprep.mubr.msk.f32.mxu0 %vm966_vm0, %v965_v0  ;;  %v634_v3 = vld [vmem:[%s1117_s3 + $0x60] sm:$0xff]  ;;  %v633_v4 = vld [vmem:[%s1117_s3 + $0x58] sm:$0xff]  ;;  %v632_v5 = vld [vmem:[%s1117_s3 + $0x50] sm:$0xff] }
 0x106   : > { %872 = vmatpush3.msra.mxu0 %v637_v63  ;;  %v631_v6 = vld [vmem:[%s1117_s3 + $0x48] sm:$0xff]  ;;  %v630_v7 = vld [vmem:[%s1117_s3 + $0x40] sm:$0xff]  ;;  %v629_v8 = vld [vmem:[%s1117_s3 + $0x38] sm:$0xff] }
 0x107   : > { %873 = vmatprep.subr.mxu0 %v965_v0  ;;  %v628_v9 = vld [vmem:[%s1117_s3 + $0x30] sm:$0xff]  ;;  %v627_v10 = vld [vmem:[%s1117_s3 + $0x28] sm:$0xff]  ;;  %v626_v11 = vld [vmem:[%s1117_s3 + $0x20] sm:$0xff] }
 0x108   : > { %874 = vmatpush3.msra.mxu0 %v636_v1  ;;  %v805_v13 = vld [vmem:[%s1116_s2] ss:$0 sm:$0xff]  ;;  %v625_v14 = vld [vmem:[%s1117_s3 + $0x18] sm:$0xff]  ;;  %v624_v15 = vld [vmem:[%s1117_s3 + $0x10] sm:$0xff] }
 0x109   : > { %875 = vmatprep.subr.mxu0 %v965_v0  ;;  %v623_v17 = vld [vmem:[%s1117_s3 + $0x8] sm:$0xff]  ;;  %v622_v18 = vld [vmem:[%s1117_s3] sm:$0xff] }
 0x10a   : > { %876 = vmatpush3.msra.mxu0 %v635_v2  ;;  %v612_v12 = vld [vmem:[#allocation2] sm:$0x3]  ;;  %v806_v20 = vld [vmem:[#allocation3] ss:$0 sm:$0xff] }
 0x10b   : > { %877 = vmatprep.subr.mxu0 %v965_v0  ;;  %v620_v16 = vadd.f32 %v805_v13, %v612_v12 }
 0x10c   : > { %878 = vmatpush3.msra.mxu0 %v634_v3 }
 0x10d   : > { %879 = vmatprep.subr.mxu0 %v965_v0  ;;  %v621_v19 = vmax.f32 %v620_v16, 0.0 }
 0x10e   : > { %880 = vmatpush3.msra.mxu0 %v633_v4 }
 0x10f   : > { %881 = vmatprep.subr.mxu0 %v965_v0 }
 0x110   : > { %882 = vmatpush3.msra.mxu0 %v632_v5 }
 0x111   : > { %883 = vmatprep.subr.mxu0 %v965_v0 }
 0x112   : > { %884 = vmatpush3.msra.mxu0 %v631_v6 }
 0x113   : > { %885 = vmatprep.subr.mxu0 %v965_v0 }
 0x114   : > { %886 = vmatpush3.msra.mxu0 %v630_v7 }
 0x115   : > { %887 = vmatprep.subr.mxu0 %v965_v0 }
 0x116   : > { %888 = vmatpush3.msra.mxu0 %v629_v8 }
 0x117   : > { %889 = vmatprep.subr.mxu0 %v965_v0 }
 0x118   : > { %890 = vmatpush3.msra.mxu0 %v628_v9 }
 0x119   : > { %891 = vmatprep.subr.mxu0 %v965_v0 }
 0x11a   : > { %892 = vmatpush3.msra.mxu0 %v627_v10 }
 0x11b   : > { %893 = vmatprep.subr.mxu0 %v965_v0 }
 0x11c   : > { %894 = vmatpush3.msra.mxu0 %v626_v11 }
 0x11d   : > { %895 = vmatprep.subr.mxu0 %v965_v0 }
 0x11e   : > { %896 = vmatpush3.msra.mxu0 %v625_v14 }
 0x11f   : > { %897 = vmatprep.subr.mxu0 %v965_v0 }
 0x120   : > { %898 = vmatpush3.msra.mxu0 %v624_v15 }
 0x121   : > { %899 = vmatprep.subr.mxu0 %v965_v0 }
 0x122   : > { %900 = vmatpush3.msra.mxu0 %v623_v17 }
 0x123   : > { %901 = vmatprep.subr.mxu0 %v965_v0 }
 0x124   : > { %902 = vmatpush3.msra.mxu0 %v622_v18 }
 0x125   : > { %904 = vmatmul.mubr.f32.vlgmr.msra.gmra.mxu0 %v621_v19 }
 0x1e5   : > { %v711_v21 = vpop.f32.mrf.mxu0 }
 0x1e6   : > { %v712_v22 = vadd.f32 %v806_v20, %v711_v21 }
 0x1e7   : > { %v905_v23 = vpop.f32.mrf.mxu0 }
 0x1e8   : > { %v807_v24 = vmul.f32 -1.442695, %v712_v22 }
 0x1ea   : > { %951 = vpow2.f32 %v807_v24 }
 0x1f7   : > { %v952_v25 = vpop.eup %951 }
 0x1f8   : > { %v718_v26 = vadd.f32 1.0, %v952_v25 }
 0x1fa   : > { %953 = vrcp.f32 %v718_v26 }
 0x207   : > { %v954_v27 = vpop.eup %953 }
 0x208   : > { %722 = vst.msk [vmem:[%s1119_s5] sm:$0x3] %vm721_vm1, %v954_v27 }
 0x209 PF: > { %s17_s20 = sadd.s32 1, %s961_s20  }
 0x20a   : > { %p14_p7 = scmp.ge.s32.totalorder %s17_s20, 4  }
 0x20c   :  { %16 = sbr.rel (!%p14_p7) target bundleno = 3 (0x3), region = 77 }

// kernel: baseline_cnn_forward.3
= control target key start
LH: loop header
LB: loop body
LE: loop exit
PB: predicated region body
PF: predicated region fallthrough
CT: control target
= control target key end

     0   :  { %s3083_s12 = smov 0   ;;  %s4354_s0 = inlined_call_operand.vmem [shape: f32[2,16,16,3], index: 0, kind: input, shape index: {}]   ;;  %s4355_s1 = inlined_call_operand.vmem [shape: bf16[27,32], index: 1, kind: input, shape index: {}]   ;;  %s4356_s2 = inlined_call_operand.vmem [shape: f32[1,32], index: 2, kind: input, shape index: {}]   ;;  %s4357_s3 = inlined_call_operand.vmem [shape: f32[2,8,8,32], index: 3, kind: output, shape index: {}]  }
   0x1 LB: > { %s2291_s13 = sadd.s32 4294967295, %s3051_s12   ;;  %p2295_p0 = scmp.ge.s32.totalorder %s3051_s12, 1  ;;  %s3051_s12 = sphi %s3083_s12, %s13_s12  }
   0x2   : > { %p137_p1 = scmp.lt.s32.totalorder %s3051_s12, 3 }
   0x4   : > { %p138_p2 = pnand %p2295_p0, %p137_p1 }
   0x6   : > { %141 = sbr.rel (%p138_p2) target bundleno = 637 (0x27d), region = 32 }
   0xb   : > { %vm172_vm0 = vcmask 23552   ;;  %vm175_vm1 = vcmask 17408   ;;  %p3093_p3 = scmp.lt.s32.totalorder %s2291_s13, 1  ;;  %v3053_v0 = vmov 0.0   ;;  %s3054_s19 = smov 3   ;;  %vm1956_vm2 = vcmask 1044480  }
   0xc   : > { %173 = vst.msk [vmem:[#allocation2] sm:$0xff] %vm172_vm0, %v3053_v0  ;;  %174 = vst.msk [vmem:[#allocation2 + $0x8] sm:$0xff] %vm172_vm0, %v3053_v0  ;;  %s3055_s20 = smov 6   ;;  %s3056_s21 = smov 9   ;;  %vm1957_vm3 = vcmask 1045504   ;;  %vm1638_vm4 = vcmask 48128  }
   0xd   : > { %176 = vst.msk [vmem:[#allocation2 + $0x10] sm:$0x3] %vm175_vm1, %v3053_v0  ;;  %179 = vst.msk [vmem:[#allocation2 + $0x28] sm:$0x3] %vm175_vm1, %v3053_v0  ;;  %s4447_s13 = smov (!%p3093_p3, %s2291_s13), 1  ;;  %s3057_s22 = smov 12  }
   0xe   : > { %177 = vst.msk [vmem:[#allocation2 + $0x18] sm:$0xff] %vm172_vm0, %v3053_v0  ;;  %178 = vst.msk [vmem:[#allocation2 + $0x20] sm:$0xff] %vm172_vm0, %v3053_v0  ;;  %s2321_s15 = sshll.u32 %s4447_s13, 8  ;;  %s3058_s23 = smov 15   ;;  %vm1671_vm5 = vcmask 72704   ;;  %vm1704_vm6 = vcmask 97280  }
   0xf   : > { %180 = vst.msk [vmem:[#allocation2 + $0x30] sm:$0xff] %vm172_vm0, %v3053_v0  ;;  %181 = vst.msk [vmem:[#allocation2 + $0x38] sm:$0xff] %vm172_vm0, %v3053_v0  ;;  %s3161_s18 = scalar_lea.vmem %s4354_s0, %s2321_s15  ;;  %s3059_s24 = smov 18   ;;  %vm1737_vm7 = vcmask 121856   ;;  %vm1770_vm8 = vcmask 146432   ;;  %vm1803_vm9 = vcmask 171008  }
  0x10   : > { %182 = vst.msk [vmem:[#allocation2 + $0x40] sm:$0x3] %vm175_vm1, %v3053_v0  ;;  %185 = vst.msk [vmem:[#allocation2 + $0x58] sm:$0x3] %vm175_vm1, %v3053_v0  ;;  %v230_v1 = vld [vmem:[%s3161_s18 + $0x10] sm:$0xff]  ;;  %v231_v2 = vld [vmem:[%s3161_s18 + $0x18] sm:$0xff] }
  0x11   : > { %183 = vst.msk [vmem:[#allocation2 + $0x48] sm:$0xff] %vm172_vm0, %v3053_v0  ;;  %184 = vst.msk [vmem:[#allocation2 + $0x50] sm:$0xff] %vm172_vm0, %v3053_v0  ;;  %v228_v3 = vld [vmem:[%s3161_s18] sm:$0xff]  ;;  %v229_v4 = vld [vmem:[%s3161_s18 + $0x8] sm:$0xff]  ;;  %s3061_s29 = smov 21   ;;  %s3062_s30 = smov 24  }
  0x12   : > { %186 = vst.msk [vmem:[#allocation2 + $0x60] sm:$0xff] %vm172_vm0, %v3053_v0  ;;  %187 = vst.msk [vmem:[#allocation2 + $0x68] sm:$0xff] %vm172_vm0, %v3053_v0  ;;  %v232_v5 = vld [vmem:[%s3161_s18 + $0x20] sm:$0xff]  ;;  %v233_v6 = vld [vmem:[%s3161_s18 + $0x28] sm:$0xff]  ;;  %vm1836_vm10 = vcmask 195584   ;;  %vm1907_vm11 = vcmask 220160  }
  0x13   : > { %188 = vst.msk [vmem:[#allocation2 + $0x70] sm:$0x3] %vm175_vm1, %v3053_v0  ;;  %191 = vst.msk [vmem:[#allocation2 + $0x88] sm:$0x3] %vm175_vm1, %v3053_v0  ;;  %v325_v7 = vld [vmem:[#allocation2 + $0x1] sm:$0xff]  ;;  %v234_v9 = vld [vmem:[%s3161_s18 + $0x30] sm:$0xff] }
  0x14   : > { %189 = vst.msk [vmem:[#allocation2 + $0x78] sm:$0xff] %vm172_vm0, %v3053_v0  ;;  %190 = vst.msk [vmem:[#allocation2 + $0x80] sm:$0xff] %vm172_vm0, %v3053_v0  ;;  %v326_v8 = vld [vmem:[#allocation2 + $0x9] sm:$0xff]  ;;  %v235_v11 = vld [vmem:[%s3161_s18 + $0x38] sm:$0xff]  ;;  %vm2172_vm12 = vcmask 261120   ;;  %s2322_s6 = sshll.u32 %s4447_s13, 6 }
  0x15   : > { %192 = vst.msk [vmem:[#allocation2 + $0x90] sm:$0xff] %vm172_vm0, %v3053_v0  ;;  %193 = vst.msk [vmem:[#allocation2 + $0x98] sm:$0xff] %vm172_vm0, %v3053_v0  ;;  %v2399_v10 = vpack.i.bf16 %v326_v8, %v325_v7  ;;  %v236_v12 = vld [vmem:[%s3161_s18 + $0x40] sm:$0xff]  ;;  %v237_v13 = vld [vmem:[%s3161_s18 + $0x48] sm:$0xff]  ;;  %s4297_s9 = scalar_lea.vmem %s4357_s3, %s2322_s6 }
  0x16   : > { %194 = vst.msk [vmem:[#allocation2 + $0xa0] sm:$0x3] %vm175_vm1, %v3053_v0  ;;  %197 = vst.msk [vmem:[#allocation2 + $0xb8] sm:$0x3] %vm175_vm1, %v3053_v0  ;;  %v238_v14 = vld [vmem:[%s3161_s18 + $0x50] sm:$0xff]  ;;  %v239_v15 = vld [vmem:[%s3161_s18 + $0x58] sm:$0xff] }
  0x17   : > { %195 = vst.msk [vmem:[#allocation2 + $0xa8] sm:$0xff] %vm172_vm0, %v3053_v0  ;;  %196 = vst.msk [vmem:[#allocation2 + $0xb0] sm:$0xff] %vm172_vm0, %v3053_v0  ;;  %v240_v16 = vld [vmem:[%s3161_s18 + $0x60] sm:$0xff]  ;;  %2400 = vrot.lane.b32.xlu0 %v2399_v10, %s3054_s19  ;;  %v241_v17 = vld [vmem:[%s3161_s18 + $0x68] sm:$0xff] }
  0x18   : > { %198 = vst.msk [vmem:[#allocation2 + $0xc0] sm:$0xff] %vm172_vm0, %v3053_v0  ;;  %199 = vst.msk [vmem:[#allocation2 + $0xc8] sm:$0xff] %vm172_vm0, %v3053_v0  ;;  %v242_v18 = vld [vmem:[%s3161_s18 + $0x70] sm:$0xff]  ;;  %v243_v19 = vld [vmem:[%s3161_s18 + $0x78] sm:$0xff] }
  0x19   : > { %200 = vst.msk [vmem:[#allocation2 + $0xd0] sm:$0x3] %vm175_vm1, %v3053_v0  ;;  %203 = vst.msk [vmem:[#allocation2 + $0xe8] sm:$0x3] %vm175_vm1, %v3053_v0  ;;  %v244_v20 = vld [vmem:[%s3161_s18 + $0x80] sm:$0xff]  ;;  %v245_v21 = vld [vmem:[%s3161_s18 + $0x88] sm:$0xff] }
  0x1a   : > { %201 = vst.msk [vmem:[#allocation2 + $0xd8] sm:$0xff] %vm172_vm0, %v3053_v0  ;;  %202 = vst.msk [vmem:[#allocation2 + $0xe0] sm:$0xff] %vm172_vm0, %v3053_v0  ;;  %v246_v22 = vld [vmem:[%s3161_s18 + $0x90] sm:$0xff]  ;;  %v247_v23 = vld [vmem:[%s3161_s18 + $0x98] sm:$0xff] }
  0x1b   : > { %204 = vst.msk [vmem:[#allocation2 + $0xf0] sm:$0xff] %vm172_vm0, %v3053_v0  ;;  %205 = vst.msk [vmem:[#allocation2 + $0xf8] sm:$0xff] %vm172_vm0, %v3053_v0  ;;  %v248_v24 = vld [vmem:[%s3161_s18 + $0xa0] sm:$0xff]  ;;  %v249_v25 = vld [vmem:[%s3161_s18 + $0xa8] sm:$0xff] }
  0x1c   : > { %206 = vst.msk [vmem:[#allocation2 + $0x100] sm:$0x3] %vm175_vm1, %v3053_v0  ;;  %209 = vst.msk [vmem:[#allocation2 + $0x118] sm:$0x3] %vm175_vm1, %v3053_v0  ;;  %v250_v35 = vld [vmem:[%s3161_s18 + $0xb0] sm:$0xff]  ;;  %v251_v36 = vld [vmem:[%s3161_s18 + $0xb8] sm:$0xff] }
  0x1d   : > { %207 = vst.msk [vmem:[#allocation2 + $0x108] sm:$0xff] %vm172_vm0, %v3053_v0  ;;  %208 = vst.msk [vmem:[#allocation2 + $0x110] sm:$0xff] %vm172_vm0, %v3053_v0  ;;  %v252_v50 = vld [vmem:[%s3161_s18 + $0xc0] sm:$0xff]  ;;  %v253_v51 = vld [vmem:[%s3161_s18 + $0xc8] sm:$0xff] }
  0x1e   : > { %210 = vst.msk [vmem:[#allocation2 + $0x120] sm:$0xff] %vm172_vm0, %v3053_v0  ;;  %211 = vst.msk [vmem:[#allocation2 + $0x128] sm:$0xff] %vm172_vm0, %v3053_v0  ;;  %v254_v52 = vld [vmem:[%s3161_s18 + $0xd0] sm:$0xff]  ;;  %v255_v53 = vld [vmem:[%s3161_s18 + $0xd8] sm:$0xff] }
  0x1f   : > { %212 = vst.msk [vmem:[#allocation2 + $0x130] sm:$0x3] %vm175_vm1, %v3053_v0  ;;  %215 = vst.msk [vmem:[#allocation2 + $0x148] sm:$0x3] %vm175_vm1, %v3053_v0  ;;  %v256_v54 = vld [vmem:[%s3161_s18 + $0xe0] sm:$0xff]  ;;  %v257_v55 = vld [vmem:[%s3161_s18 + $0xe8] sm:$0xff] }
  0x20   : > { %213 = vst.msk [vmem:[#allocation2 + $0x138] sm:$0xff] %vm172_vm0, %v3053_v0  ;;  %214 = vst.msk [vmem:[#allocation2 + $0x140] sm:$0xff] %vm172_vm0, %v3053_v0 }
  0x21   : > { %216 = vst.msk [vmem:[#allocation2 + $0x150] sm:$0xff] %vm172_vm0, %v3053_v0  ;;  %217 = vst.msk [vmem:[#allocation2 + $0x158] sm:$0xff] %vm172_vm0, %v3053_v0 }
  0x22   : > { %218 = vst.msk [vmem:[#allocation2 + $0x160] sm:$0x3] %vm175_vm1, %v3053_v0  ;;  %221 = vst.msk [vmem:[#allocation2 + $0x178] sm:$0x3] %vm175_vm1, %v3053_v0 }
  0x23   : > { %219 = vst.msk [vmem:[#allocation2 + $0x168] sm:$0xff] %vm172_vm0, %v3053_v0  ;;  %220 = vst.msk [vmem:[#allocation2 + $0x170] sm:$0xff] %vm172_vm0, %v3053_v0 }
  0x24   : > { %222 = vst.msk [vmem:[#allocation2 + $0x180] sm:$0xff] %vm172_vm0, %v3053_v0  ;;  %223 = vst.msk [vmem:[#allocation2 + $0x188] sm:$0xff] %vm172_vm0, %v3053_v0 }
  0x25   : > { %224 = vst.msk [vmem:[#allocation2 + $0x190] sm:$0x3] %vm175_vm1, %v3053_v0  ;;  %227 = vst.msk [vmem:[#allocation2 + $0x1a8] sm:$0x3] %vm175_vm1, %v3053_v0 }
  0x26   : > { %225 = vst.msk [vmem:[#allocation2 + $0x198] sm:$0xff] %vm172_vm0, %v3053_v0  ;;  %226 = vst.msk [vmem:[#allocation2 + $0x1a0] sm:$0xff] %vm172_vm0, %v3053_v0 }
  0x27   : > { %263 = vst.msk [vmem:[#allocation2 + $0x31] sm:$0xff] %vm172_vm0, %v230_v1  ;;  %264 = vst.msk [vmem:[#allocation2 + $0x39] sm:$0xff] %vm172_vm0, %v231_v2 }
  0x28   : > { %261 = vst.msk [vmem:[#allocation2 + $0x19] sm:$0xff] %vm172_vm0, %v228_v3  ;;  %262 = vst.msk [vmem:[#allocation2 + $0x21] sm:$0xff] %vm172_vm0, %v229_v4 }
  0x29   : > { %265 = vst.msk [vmem:[#allocation2 + $0x49] sm:$0xff] %vm172_vm0, %v232_v5  ;;  %266 = vst.msk [vmem:[#allocation2 + $0x51] sm:$0xff] %vm172_vm0, %v233_v6 }
  0x2a   : > { %267 = vst.msk [vmem:[#allocation2 + $0x61] sm:$0xff] %vm172_vm0, %v234_v9  ;;  %268 = vst.msk [vmem:[#allocation2 + $0x69] sm:$0xff] %vm172_vm0, %v235_v11 }
  0x2b   : > { %269 = vst.msk [vmem:[#allocation2 + $0x79] sm:$0xff] %vm172_vm0, %v236_v12  ;;  %270 = vst.msk [vmem:[#allocation2 + $0x81] sm:$0xff] %vm172_vm0, %v237_v13 }
  0x2c   : > { %271 = vst.msk [vmem:[#allocation2 + $0x91] sm:$0xff] %vm172_vm0, %v238_v14  ;;  %272 = vst.msk [vmem:[#allocation2 + $0x99] sm:$0xff] %vm172_vm0, %v239_v15  ;;  %v357_v14 = vld [vmem:[#allocation2 + $0x2] sm:$0xff]  ;;  %v358_v15 = vld [vmem:[#allocation2 + $0xa] sm:$0xff] }
  0x2d   : > { %273 = vst.msk [vmem:[#allocation2 + $0xa9] sm:$0xff] %vm172_vm0, %v240_v16  ;;  %274 = vst.msk [vmem:[#allocation2 + $0xb1] sm:$0xff] %vm172_vm0, %v241_v17  ;;  %v2479_v17 = vpack.i.bf16 %v358_v15, %v357_v14 }
  0x2e   : > { %275 = vst.msk [vmem:[#allocation2 + $0xc1] sm:$0xff] %vm172_vm0, %v242_v18  ;;  %276 = vst.msk [vmem:[#allocation2 + $0xc9] sm:$0xff] %vm172_vm0, %v243_v19  ;;  %v329_v26 = vld [vmem:[#allocation2 + $0x31] sm:$0xff]  ;;  %v330_v27 = vld [vmem:[#allocation2 + $0x39] sm:$0xff] }
  0x2f   : > { %277 = vst.msk [vmem:[#allocation2 + $0xd9] sm:$0xff] %vm172_vm0, %v244_v20  ;;  %278 = vst.msk [vmem:[#allocation2 + $0xe1] sm:$0xff] %vm172_vm0, %v245_v21  ;;  %v327_v28 = vld [vmem:[#allocation2 + $0x19] sm:$0xff]  ;;  %v3208_v29 = vpack.i.bf16 %v330_v27, %v329_v26  ;;  %v328_v30 = vld [vmem:[#allocation2 + $0x21] sm:$0xff] }
  0x30   : > { %279 = vst.msk [vmem:[#allocation2 + $0xf1] sm:$0xff] %vm172_vm0, %v246_v22  ;;  %280 = vst.msk [vmem:[#allocation2 + $0xf9] sm:$0xff] %vm172_vm0, %v247_v23  ;;  %v331_v31 = vld [vmem:[#allocation2 + $0x49] sm:$0xff]  ;;  %v332_v32 = vld [vmem:[#allocation2 + $0x51] sm:$0xff]  ;;  %v3210_v33 = vpack.i.bf16 %v328_v30, %v327_v28 }
  0x31   : > { %281 = vst.msk [vmem:[#allocation2 + $0x109] sm:$0xff] %vm172_vm0, %v248_v24  ;;  %282 = vst.msk [vmem:[#allocation2 + $0x111] sm:$0xff] %vm172_vm0, %v249_v25  ;;  %v333_v34 = vld [vmem:[#allocation2 + $0x61] sm:$0xff]  ;;  %2410 = vrot.lane.b32.xlu1 %v3208_v29, %s3054_s19  ;;  %v3216_v37 = vpack.i.bf16 %v332_v32, %v331_v31  ;;  %v334_v38 = vld [vmem:[#allocation2 + $0x69] sm:$0xff] }
  0x32   : > { %283 = vst.msk [vmem:[#allocation2 + $0x121] sm:$0xff] %vm172_vm0, %v250_v35  ;;  %284 = vst.msk [vmem:[#allocation2 + $0x129] sm:$0xff] %vm172_vm0, %v251_v36  ;;  %2405 = vrot.lane.b32.xlu0 %v3210_v33, %s3054_s19  ;;  %v3222_v39 = vpack.i.bf16 %v334_v38, %v333_v34  ;;  %v335_v40 = vld [vmem:[#allocation2 + $0x79] sm:$0xff]  ;;  %v336_v41 = vld [vmem:[#allocation2 + $0x81] sm:$0xff] }
  0x33   : > { %v337_v42 = vld [vmem:[#allocation2 + $0x91] sm:$0xff]  ;;  %v338_v43 = vld [vmem:[#allocation2 + $0x99] sm:$0xff]  ;;  %v2424_v45 = vpack.i.bf16 %v336_v41, %v335_v40  ;;  %285 = vst.msk [vmem:[#allocation2 + $0x139] sm:$0xff] %vm172_vm0, %v252_v50  ;;  %286 = vst.msk [vmem:[#allocation2 + $0x141] sm:$0xff] %vm172_vm0, %v253_v51 }
  0x34   : > { %v339_v44 = vld [vmem:[#allocation2 + $0xa9] sm:$0xff]  ;;  %v340_v46 = vld [vmem:[#allocation2 + $0xb1] sm:$0xff]  ;;  %v2429_v49 = vpack.i.bf16 %v338_v43, %v337_v42  ;;  %287 = vst.msk [vmem:[#allocation2 + $0x151] sm:$0xff] %vm172_vm0, %v254_v52  ;;  %288 = vst.msk [vmem:[#allocation2 + $0x159] sm:$0xff] %vm172_vm0, %v255_v53 }
  0x35   : > { %2415 = vrot.lane.b32.xlu1 %v3216_v37, %s3054_s19  ;;  %v341_v47 = vld [vmem:[#allocation2 + $0xc1] sm:$0xff]  ;;  %v342_v48 = vld [vmem:[#allocation2 + $0xc9] sm:$0xff]  ;;  %289 = vst.msk [vmem:[#allocation2 + $0x169] sm:$0xff] %vm172_vm0, %v256_v54  ;;  %290 = vst.msk [vmem:[#allocation2 + $0x171] sm:$0xff] %vm172_vm0, %v257_v55  ;;  %v2434_v56 = vpack.i.bf16 %v340_v46, %v339_v44 }
  0x36   : > { %2420 = vrot.lane.b32.xlu0 %v3222_v39, %s3054_s19  ;;  %v2439_v57 = vpack.i.bf16 %v342_v48, %v341_v47  ;;  %v343_v58 = vld [vmem:[#allocation2 + $0xd9] sm:$0xff]  ;;  %v344_v59 = vld [vmem:[#allocation2 + $0xe1] sm:$0xff]  ;;  %v363_v24 = vld [vmem:[#allocation2 + $0x4a] sm:$0xff] }
  0x37   : > { %v345_v60 = vld [vmem:[#allocation2 + $0xf1] sm:$0xff]  ;;  %v346_v61 = vld [vmem:[#allocation2 + $0xf9] sm:$0xff]  ;;  %v3243_v62 = vpack.i.bf16 %v344_v59, %v343_v58  ;;  %v360_v19 = vld [vmem:[#allocation2 + $0x22] sm:$0xff] }
  0x38   : > { %v3246_v63 = vpack.i.bf16 %v346_v61, %v345_v60  ;;  %v347_v0 = vld [vmem:[#allocation2 + $0x109] sm:$0xff]  ;;  %v348_v1 = vld [vmem:[#allocation2 + $0x111] sm:$0xff]  ;;  %v359_v18 = vld [vmem:[#allocation2 + $0x1a] sm:$0xff] }
  0x39   : > { %2425 = vrot.lane.b32.xlu1 %v2424_v45, %s3054_s19  ;;  %v349_v2 = vld [vmem:[#allocation2 + $0x121] sm:$0xff]  ;;  %v350_v3 = vld [vmem:[#allocation2 + $0x129] sm:$0xff]  ;;  %v3250_v4 = vpack.i.bf16 %v348_v1, %v347_v0  ;;  %v361_v20 = vld [vmem:[#allocation2 + $0x32] sm:$0xff]  ;;  %v3266_v22 = vpack.i.bf16 %v360_v19, %v359_v18 }
  0x3a   : > { %2430 = vrot.lane.b32.xlu0 %v2429_v49, %s3054_s19  ;;  %v3254_v5 = vpack.i.bf16 %v350_v3, %v349_v2  ;;  %v351_v6 = vld [vmem:[#allocation2 + $0x139] sm:$0xff]  ;;  %v352_v7 = vld [vmem:[#allocation2 + $0x141] sm:$0xff]  ;;  %v366_v27 = vld [vmem:[#allocation2 + $0x6a] sm:$0xff] }
  0x3b   : > { %v353_v8 = vld [vmem:[#allocation2 + $0x151] sm:$0xff]  ;;  %v354_v9 = vld [vmem:[#allocation2 + $0x159] sm:$0xff]  ;;  %v3258_v10 = vpack.i.bf16 %v352_v7, %v351_v6  ;;  %v365_v26 = vld [vmem:[#allocation2 + $0x62] sm:$0xff] }
  0x3c   : > { %v2469_v11 = vpack.i.bf16 %v354_v9, %v353_v8  ;;  %v355_v12 = vld [vmem:[#allocation2 + $0x169] sm:$0xff]  ;;  %v356_v13 = vld [vmem:[#allocation2 + $0x171] sm:$0xff]  ;;  %v362_v21 = vld [vmem:[#allocation2 + $0x3a] sm:$0xff]  ;;  %v3281_v32 = vpack.i.bf16 %v366_v27, %v365_v26 }
  0x3d   : > { %2435 = vrot.lane.b32.xlu1 %v2434_v56, %s3054_s19  ;;  %v2474_v16 = vpack.i.bf16 %v356_v13, %v355_v12  ;;  %v3269_v23 = vpack.i.bf16 %v362_v21, %v361_v20  ;;  %v364_v25 = vld [vmem:[#allocation2 + $0x52] sm:$0xff]  ;;  %v367_v34 = vld [vmem:[#allocation2 + $0x7a] sm:$0xff]  ;;  %v368_v35 = vld [vmem:[#allocation2 + $0x82] sm:$0xff] }
  0x3e   : > { %2440 = vrot.lane.b32.xlu0 %v2439_v57, %s3054_s19  ;;  %v258_v28 = vld [vmem:[%s3161_s18 + $0xf0] sm:$0xff]  ;;  %v259_v30 = vld [vmem:[%s3161_s18 + $0xf8] sm:$0xff]  ;;  %v3277_v31 = vpack.i.bf16 %v364_v25, %v363_v24  ;;  %v3285_v40 = vpack.i.bf16 %v368_v35, %v367_v34  ;;  %v373_v44 = vld [vmem:[#allocation2 + $0xc2] sm:$0xff] }
  0x3f   : > { %291 = vst.msk [vmem:[#allocation2 + $0x181] sm:$0xff] %vm172_vm0, %v258_v28  ;;  %292 = vst.msk [vmem:[#allocation2 + $0x189] sm:$0xff] %vm172_vm0, %v259_v30  ;;  %v369_v36 = vld [vmem:[#allocation2 + $0x92] sm:$0xff]  ;;  %v370_v38 = vld [vmem:[#allocation2 + $0x9a] sm:$0xff] }
  0x40   : > { %v2509_v41 = vpack.i.bf16 %v370_v38, %v369_v36  ;;  %v371_v42 = vld [vmem:[#allocation2 + $0xaa] sm:$0xff]  ;;  %v372_v43 = vld [vmem:[#allocation2 + $0xb2] sm:$0xff]  ;;  %v375_v48 = vld [vmem:[#allocation2 + $0xda] sm:$0xff] }
  0x41   : > { %2445 = vrot.lane.b32.xlu1 %v3243_v62, %s3054_s19  ;;  %v374_v45 = vld [vmem:[#allocation2 + $0xca] sm:$0xff]  ;;  %v2514_v46 = vpack.i.bf16 %v372_v43, %v371_v42  ;;  %v376_v49 = vld [vmem:[#allocation2 + $0xe2] sm:$0xff]  ;;  %v377_v50 = vld [vmem:[#allocation2 + $0xf2] sm:$0xff] }
  0x42   : > { %2450 = vrot.lane.b32.xlu0 %v3246_v63, %s3054_s19  ;;  %v2519_v47 = vpack.i.bf16 %v374_v45, %v373_v44  ;;  %v378_v51 = vld [vmem:[#allocation2 + $0xfa] sm:$0xff]  ;;  %v3293_v52 = vpack.i.bf16 %v376_v49, %v375_v48  ;;  %v379_v54 = vld [vmem:[#allocation2 + $0x10a] sm:$0xff]  ;;  %v380_v55 = vld [vmem:[#allocation2 + $0x112] sm:$0xff] }
  0x43   : > { %v3296_v53 = vpack.i.bf16 %v378_v51, %v377_v50  ;;  %v381_v56 = vld [vmem:[#allocation2 + $0x122] sm:$0xff]  ;;  %v382_v57 = vld [vmem:[#allocation2 + $0x12a] sm:$0xff]  ;;  %v3300_v58 = vpack.i.bf16 %v380_v55, %v379_v54  ;;  %v383_v60 = vld [vmem:[#allocation2 + $0x13a] sm:$0xff] }
  0x44   : > { %v3304_v59 = vpack.i.bf16 %v382_v57, %v381_v56  ;;  %v384_v61 = vld [vmem:[#allocation2 + $0x142] sm:$0xff]  ;;  %v385_v0 = vld [vmem:[#allocation2 + $0x152] sm:$0xff]  ;;  %v386_v1 = vld [vmem:[#allocation2 + $0x15a] sm:$0xff] }
  0x45   : > { %2455 = vrot.lane.b32.xlu1 %v3250_v4, %s3054_s19  ;;  %v3308_v2 = vpack.i.bf16 %v384_v61, %v383_v60  ;;  %v3312_v3 = vpack.i.bf16 %v386_v1, %v385_v0  ;;  %v387_v6 = vld [vmem:[#allocation2 + $0x16a] sm:$0xff]  ;;  %v388_v7 = vld [vmem:[#allocation2 + $0x172] sm:$0xff]  ;;  %v3316_v9 = vld [vmem:[#allocation2 + $0x20] sm:$0xff] }
  0x46   : > { %2460 = vrot.lane.b32.xlu0 %v3254_v5, %s3054_s19  ;;  %v3314_v8 = vld [vmem:[#allocation2 + $0x18] sm:$0xff]  ;;  %4377 = vst [vmem:[#allocation5_spill] sm:$0xff] %v3316_v9  ;;  %v3324_v13 = vld [vmem:[#allocation2 + $0x30] sm:$0xff]  ;;  %v3328_v15 = vld [vmem:[#allocation2 + $0x48] sm:$0xff] }
  0x47   : > { %4376 = vst [vmem:[#allocation4_spill] sm:$0xff] %v3314_v8  ;;  %v2559_v12 = vpack.i.bf16 %v3316_v9, %v3314_v8  ;;  %v3326_v14 = vld [vmem:[#allocation2 + $0x38] sm:$0xff]  ;;  %v3342_v19 = vld [vmem:[#allocation2 + $0x60] sm:$0xff]  ;;  %v3344_v20 = vld [vmem:[#allocation2 + $0x68] sm:$0xff] }
  0x48   : > { %v3346_v21 = vld [vmem:[#allocation2 + $0x78] sm:$0xff]  ;;  %v3348_v24 = vld [vmem:[#allocation2 + $0x80] sm:$0xff]  ;;  %v3354_v25 = vpack.i.bf16 %v3344_v20, %v3342_v19  ;;  %v3362_v27 = vld [vmem:[#allocation2 + $0x90] sm:$0xff] }
  0x49   : > { %2465 = vrot.lane.b32.xlu1 %v3258_v10, %s3054_s19  ;;  %v3360_v26 = vpack.i.bf16 %v3348_v24, %v3346_v21  ;;  %v3364_v28 = vld [vmem:[#allocation2 + $0x98] sm:$0xff]  ;;  %v3366_v30 = vld [vmem:[#allocation2 + $0xa8] sm:$0xff]  ;;  %v3368_v34 = vld [vmem:[#allocation2 + $0xb0] sm:$0xff] }
  0x4a   : > { %2470 = vrot.lane.b32.xlu0 %v2469_v11, %s3054_s19  ;;  %v2554_v11 = vpack.i.bf16 %v388_v7, %v387_v6  ;;  %v3374_v35 = vpack.i.bf16 %v3364_v28, %v3362_v27  ;;  %v3380_v36 = vpack.i.bf16 %v3368_v34, %v3366_v30  ;;  %v3382_v38 = vld [vmem:[#allocation2 + $0xc0] sm:$0xff]  ;;  %v3386_v42 = vld [vmem:[#allocation2 + $0xd8] sm:$0xff]  ;;  %v409_v48 = vld [vmem:[#allocation2 + $0x108] sm:$0xff] }
  0x4b   : > { %4378 = vst [vmem:[#allocation6_spill] sm:$0xff] %v3382_v38  ;;  %4380 = vst [vmem:[#allocation8_spill] sm:$0xff] %v3386_v42  ;;  %v3388_v43 = vld [vmem:[#allocation2 + $0xe0] sm:$0xff]  ;;  %v410_v49 = vld [vmem:[#allocation2 + $0x110] sm:$0xff] }
  0x4c   : > { %4381 = vst [vmem:[#allocation9_spill] sm:$0xff] %v3388_v43  ;;  %v2599_v45 = vpack.i.bf16 %v3388_v43, %v3386_v42  ;;  %v2609_v51 = vpack.i.bf16 %v410_v49, %v409_v48  ;;  %v3400_v54 = vld [vmem:[#allocation2 + $0x120] sm:$0xff]  ;;  %v3402_v55 = vld [vmem:[#allocation2 + $0x128] sm:$0xff]  ;;  %v3404_v56 = vld [vmem:[#allocation2 + $0x138] sm:$0xff] }
  0x4d   : > { %2475 = vrot.lane.b32.xlu1 %v2474_v16, %s3054_s19  ;;  %v3330_v16 = vld [vmem:[#allocation2 + $0x50] sm:$0xff]  ;;  %v3406_v57 = vld [vmem:[#allocation2 + $0x140] sm:$0xff]  ;;  %v3411_v60 = vpack.i.bf16 %v3402_v55, %v3400_v54  ;;  %v3420_v1 = vld [vmem:[#allocation2 + $0x158] sm:$0xff] }
  0x4e   : > { %2480 = vrot.lane.b32.xlu0 %v2479_v17, %s3055_s20  ;;  %v3335_v17 = vpack.i.bf16 %v3326_v14, %v3324_v13  ;;  %v3340_v18 = vpack.i.bf16 %v3330_v16, %v3328_v15  ;;  %v3416_v61 = vpack.i.bf16 %v3406_v57, %v3404_v56  ;;  %v3418_v0 = vld [vmem:[#allocation2 + $0x150] sm:$0xff]  ;;  %v3422_v6 = vld [vmem:[#allocation2 + $0x168] sm:$0xff] }
  0x4f   : > { %v3424_v7 = vld [vmem:[#allocation2 + $0x170] sm:$0xff] }
  0x51   : > { %2485 = vrot.lane.b32.xlu1 %v3266_v22, %s3055_s20 }
  0x52   : > { %2490 = vrot.lane.b32.xlu0 %v3269_v23, %s3055_s20 }
  0x55   : > { %2495 = vrot.lane.b32.xlu1 %v3277_v31, %s3055_s20 }
  0x56   : > { %2500 = vrot.lane.b32.xlu0 %v3281_v32, %s3055_s20 }
  0x59   : > { %2505 = vrot.lane.b32.xlu1 %v3285_v40, %s3055_s20 }
  0x5a   : > { %2510 = vrot.lane.b32.xlu0 %v2509_v41, %s3055_s20  ;;  %v3384_v41 = vld [vmem:[#allocation2 + $0xc8] sm:$0xff] }
  0x5b   : > { %4379 = vst [vmem:[#allocation7_spill] sm:$0xff] %v3384_v41  ;;  %v2594_v44 = vpack.i.bf16 %v3384_v41, %v3382_v38 }
  0x5d   : > { %2515 = vrot.lane.b32.xlu1 %v2514_v46, %s3055_s20  ;;  %v407_v46 = vld [vmem:[#allocation2 + $0xf0] sm:$0xff] }
  0x5e   : > { %2520 = vrot.lane.b32.xlu0 %v2519_v47, %s3055_s20  ;;  %v408_v47 = vld [vmem:[#allocation2 + $0xf8] sm:$0xff] }
  0x5f   : > { %v2604_v50 = vpack.i.bf16 %v408_v47, %v407_v46 }
  0x61   : > { %2525 = vrot.lane.b32.xlu1 %v3293_v52, %s3055_s20 }
  0x62   : > { %2530 = vrot.lane.b32.xlu0 %v3296_v53, %s3055_s20 }
  0x65   : > { %2535 = vrot.lane.b32.xlu1 %v3300_v58, %s3055_s20 }
  0x66   : > { %2540 = vrot.lane.b32.xlu0 %v3304_v59, %s3055_s20 }
  0x69   : > { %2545 = vrot.lane.b32.xlu1 %v3308_v2, %s3055_s20 }
  0x6a   : > { %2550 = vrot.lane.b32.xlu0 %v3312_v3, %s3055_s20 }
  0x6d   : > { %2555 = vrot.lane.b32.xlu1 %v2554_v11, %s3055_s20  ;;  %v3430_v11 = vpack.i.bf16 %v3420_v1, %v3418_v0 }
  0x6e   : > { %2560 = vrot.lane.b32.xlu0 %v2559_v12, %s3056_s21  ;;  %v3436_v12 = vpack.i.bf16 %v3424_v7, %v3422_v6 }
  0x71   : > { %2565 = vrot.lane.b32.xlu1 %v3335_v17, %s3056_s21 }
  0x72   : > { %2570 = vrot.lane.b32.xlu0 %v3340_v18, %s3056_s21 }
  0x75   : > { %2575 = vrot.lane.b32.xlu1 %v3354_v25, %s3056_s21 }
  0x76   : > { %2580 = vrot.lane.b32.xlu0 %v3360_v26, %s3056_s21 }
  0x79   : > { %2585 = vrot.lane.b32.xlu1 %v3374_v35, %s3056_s21 }
  0x7a   : > { %2590 = vrot.lane.b32.xlu0 %v3380_v36, %s3056_s21 }
  0x7d   : > { %2595 = vrot.lane.b32.xlu1 %v2594_v44, %s3056_s21  ;;  %v419_v44 = vld [vmem:[#allocation2 + $0x180] sm:$0xff] }
  0x7e   : > { %2600 = vrot.lane.b32.xlu0 %v2599_v45, %s3056_s21  ;;  %v420_v45 = vld [vmem:[#allocation2 + $0x188] sm:$0xff] }
  0x7f   : > { %v2634_v46 = vpack.i.bf16 %v420_v45, %v419_v44 }
  0x81   : > { %2605 = vrot.lane.b32.xlu1 %v2604_v50, %s3056_s21 }
  0x82   : > { %2610 = vrot.lane.b32.xlu0 %v2609_v51, %s3056_s21 }
  0x85   : > { %2615 = vrot.lane.b32.xlu1 %v3411_v60, %s3056_s21 }
  0x86   : > { %2620 = vrot.lane.b32.xlu0 %v3416_v61, %s3056_s21 }
  0x89   : > { %2625 = vrot.lane.b32.xlu1 %v3430_v11, %s3056_s21 }
  0x8a   : > { %2630 = vrot.lane.b32.xlu0 %v3436_v12, %s3056_s21 }
  0x8d   : > { %2635 = vrot.lane.b32.xlu1 %v2634_v46, %s3056_s21  ;;  %v3040_v46 = vld [vmem:[%s4355_s1] sm:$0xff]  }
  0x8e   : > { %2640 = vrot.lane.b32.xlu0 %v3210_v33, %s3057_s22  ;;  %v3461_v33 = vpop.permute.xlu0 %2400 }
  0x91   : > { %2645 = vrot.lane.b32.xlu1 %v3208_v29, %s3057_s22 }
  0x92   : > { %2650 = vrot.lane.b32.xlu0 %v3216_v37, %s3057_s22 }
  0x95   : > { %2655 = vrot.lane.b32.xlu1 %v3222_v39, %s3057_s22 }
  0x96   : > { %2660 = vrot.lane.b32.xlu0 %v3243_v62, %s3057_s22  ;;  %v3039_v62 = vld [vmem:[%s4355_s1 + $0x8] sm:$0x3f]  }
  0x99   : > { %2665 = vrot.lane.b32.xlu1 %v3246_v63, %s3057_s22 }
  0x9a   : > { %2670 = vrot.lane.b32.xlu0 %v3266_v22, %s3058_s23  ;;  %v3060_v22 = vmov 65535  }
  0x9d   : > { %2675 = vrot.lane.b32.xlu1 %v3293_v52, %s3058_s23  ;;  %v1958_v52 = vsel %vm1956_vm2, 4294967295, %v3060_v22 }
  0x9e   : > { %2680 = vrot.lane.b32.xlu0 %v3269_v23, %s3058_s23  ;;  %v1959_v48 = vsel %vm1957_vm3, %v1958_v52, 0 }
  0x9f   : > { %v1961_v44 = vand.u32 %v3039_v62, %v1959_v48 }
  0xa1   : > { %2685 = vrot.lane.b32.xlu1 %v3296_v53, %s3058_s23  ;;  %2341 = vmatprep.subr.bf16.mxu0 %v1961_v44 }
  0xa2   : > { %2690 = vrot.lane.b32.xlu0 %v3335_v17, %s3059_s24  ;;  %2342 = vmatpush3.bf16.msra.mxu0 %v1961_v44 }
  0xa3   : > { %v3470_v47 = vpop.permute.xlu1 %2410  ;;  %2377 = vmatprep.subr.bf16.mxu1 %v1961_v44  ;;  %2343 = vmatprep.subr.bf16.mxu0 %v3040_v46 }
  0xa4   : > { %v3472_v49 = vpop.permute.xlu0 %2405  ;;  %2379 = vmatpush3.bf16.msra.mxu1 %v1961_v44 }
  0xa5   : > { %4382 = vst [vmem:[#allocation10_spill] sm:$0xff] %v3472_v49  ;;  %2695 = vrot.lane.b32.xlu1 %v2604_v50, %s3059_s24  ;;  %2378 = vmatprep.subr.bf16.mxu1 %v3040_v46 }
  0xa6   : > { %2700 = vrot.lane.b32.xlu0 %v3340_v18, %s3059_s24  ;;  %2344 = vmatpush3.bf16.msra.mxu0 %v3040_v46 }
  0xa7   : > { %v3477_v17 = vpop.permute.xlu1 %2415 }
  0xa8   : > { %v3479_v45 = vpop.permute.xlu0 %2420  ;;  %2380 = vmatpush3.bf16.msra.mxu1 %v3040_v46 }
  0xa9   : > { %2705 = vrot.lane.b32.xlu1 %v2609_v51, %s3059_s24 }
  0xaa   : > { %2710 = vrot.lane.b32.xlu0 %v3208_v29, %s3061_s29 }
  0xab   : > { %v3487_v18 = vpop.permute.xlu1 %2425 }
  0xac   : > { %v3489_v50 = vpop.permute.xlu0 %2430 }
  0xad   : > { %2715 = vrot.lane.b32.xlu1 %v3246_v63, %s3061_s29 }
  0xae   : > { %2720 = vrot.lane.b32.xlu0 %v3216_v37, %s3061_s29 }
  0xaf   : > { %v3495_v62 = vpop.permute.xlu1 %2435 }
  0xb0   : > { %v3497_v51 = vpop.permute.xlu0 %2440 }
  0xb1   : > { %4383 = vst [vmem:[#allocation11_spill] sm:$0xff] %v3497_v51  ;;  %2725 = vrot.lane.b32.xlu1 %v3250_v4, %s3061_s29 }
  0xb2   : > { %2730 = vrot.lane.b32.xlu0 %v3269_v23, %s3062_s30 }
  0xb3   : > { %v3503_v29 = vpop.permute.xlu1 %2445 }
  0xb4   : > { %4384 = vst [vmem:[#allocation12_spill] sm:$0xff] %v3503_v29  ;;  %v3505_v22 = vpop.permute.xlu0 %2450  ;;  %v447_v29 = vld [vmem:[#allocation2 + $0x151] sm:$0xff] }
  0xb5   : > { %4385 = vst [vmem:[#allocation13_spill] sm:$0xff] %v3505_v22  ;;  %2735 = vrot.lane.b32.xlu1 %v3296_v53, %s3062_s30  ;;  %v525_v22 = vld [vmem:[#allocation2 + $0x81] sm:$0xff] }
  0xb6   : > { %2740 = vrot.lane.b32.xlu0 %v3277_v31, %s3062_s30 }
  0xb7   : > { %v3511_v37 = vpop.permute.xlu1 %2455 }
  0xb8   : > { %4386 = vst [vmem:[#allocation14_spill] sm:$0xff] %v3511_v37  ;;  %v3513_v63 = vpop.permute.xlu0 %2460  ;;  %v524_v37 = vld [vmem:[#allocation2 + $0x79] sm:$0xff] }
  0xb9   : > { %2745 = vrot.lane.b32.xlu1 %v3300_v58, %s3062_s30 }
  0xba   : > { %2750 = vrot.lane.b32.xlu0 %v3250_v4, %s3057_s22 }
  0xbb   : > { %v3519_v23 = vpop.permute.xlu1 %2465 }
  0xbc   : > { %v2471_v52 = vpop.permute.xlu0 %2470 }
  0xbd   : > { %2755 = vrot.lane.b32.xlu1 %v3254_v5, %s3057_s22  ;;  %v2472_v41 = vunpack.i.l.bf16 %v2471_v52 }
  0xbe   : > { %2760 = vrot.lane.b32.xlu0 %v3277_v31, %s3058_s23 }
  0xbf   : > { %v2476_v53 = vpop.permute.xlu1 %2475 }
  0xc0   : > { %v3525_v48 = vpop.permute.xlu0 %2480 }
  0xc1   : > { %4387 = vst [vmem:[#allocation15_spill] sm:$0xff] %v3525_v48  ;;  %2765 = vrot.lane.b32.xlu1 %v3300_v58, %s3058_s23 }
  0xc2   : > { %2770 = vrot.lane.b32.xlu0 %v3281_v32, %s3058_s23 }
  0xc3   : > { %v3531_v44 = vpop.permute.xlu1 %2485 }
  0xc4   : > { %4388 = vst [vmem:[#allocation16_spill] sm:$0xff] %v3531_v44  ;;  %v3533_v4 = vpop.permute.xlu0 %2490  ;;  %v2478_v44 = vunpack.i.h.bf16 %v2476_v53 }
  0xc5   : > { %2775 = vrot.lane.b32.xlu1 %v3304_v59, %s3058_s23 }
  0xc6   : > { %2780 = vrot.lane.b32.xlu0 %v3354_v25, %s3059_s24  ;;  %v2809_v25 = vpack.i.bf16 %v525_v22, %v524_v37  ;;  %v446_v22 = vld [vmem:[#allocation2 + $0x141] sm:$0xff]  ;;  %v2473_v37 = vunpack.i.h.bf16 %v2471_v52  ;;  %v1634_v52 = vsel %vm172_vm0, %v3418_v0, %v2472_v41  ;;  %v1637_v41 = vsel %vm172_vm0, %v3424_v7, %v2478_v44 }
  0xc7   : > { %v3539_v31 = vpop.permute.xlu1 %2495  ;;  %v2422_v7 = vunpack.i.l.bf16 %v3479_v45 }
  0xc8   : > { %v3541_v46 = vpop.permute.xlu0 %2500 }
  0xc9   : > { %2785 = vrot.lane.b32.xlu1 %v3411_v60, %s3059_s24 }
  0xca   : > { %2790 = vrot.lane.b32.xlu0 %v3360_v26, %s3059_s24 }
  0xcb   : > { %v3547_v58 = vpop.permute.xlu1 %2505 }
  0xcc   : > { %v3549_v42 = vpop.permute.xlu0 %2510 }
  0xcd   : > { %2795 = vrot.lane.b32.xlu1 %v3416_v61, %s3059_s24 }
  0xce   : > { %2800 = vrot.lane.b32.xlu0 %v3222_v39, %s3061_s29 }
  0xcf   : > { %v3555_v43 = vpop.permute.xlu1 %2515 }
  0xd0   : > { %v3557_v38 = vpop.permute.xlu0 %2520 }
  0xd1   : > { %4389 = vst [vmem:[#allocation17_spill] sm:$0xff] %v3557_v38  ;;  %2805 = vrot.lane.b32.xlu1 %v3254_v5, %s3061_s29  ;;  %v445_v5 = vld [vmem:[#allocation2 + $0x139] sm:$0xff] }
  0xd2   : > { %2810 = vrot.lane.b32.xlu0 %v2809_v25, %s3061_s29 }
  0xd3   : > { %v3562_v26 = vpop.permute.xlu1 %2525 }
  0xd4   : > { %4390 = vst [vmem:[#allocation18_spill] sm:$0xff] %v3562_v26  ;;  %v3564_v60 = vpop.permute.xlu0 %2530  ;;  %v432_v26 = vld [vmem:[#allocation2 + $0x99] sm:$0xff] }
  0xd5   : > { %4391 = vst [vmem:[#allocation19_spill] sm:$0xff] %v3564_v60  ;;  %2815 = vrot.lane.b32.xlu1 %v3258_v10, %s3061_s29  ;;  %v431_v10 = vld [vmem:[#allocation2 + $0x91] sm:$0xff] }
  0xd6   : > { %2820 = vrot.lane.b32.xlu0 %v3281_v32, %s3062_s30  ;;  %v2844_v32 = vpack.i.bf16 %v446_v22, %v445_v5  ;;  %v3587_v8 = vpack.i.bf16 %v432_v26, %v431_v10  ;;  %v448_v5 = vld [vmem:[#allocation2 + $0x159] sm:$0xff]  ;;  %v2423_v26 = vunpack.i.h.bf16 %v3479_v45  ;;  %v2432_v10 = vunpack.i.l.bf16 %v3489_v50 }
  0xd7   : > { %v3570_v39 = vpop.permute.xlu1 %2535  ;;  %v2502_v45 = vunpack.i.l.bf16 %v3541_v46 }
  0xd8   : > { %4392 = vst [vmem:[#allocation20_spill] sm:$0xff] %v3570_v39  ;;  %v3572_v61 = vpop.permute.xlu0 %2540  ;;  %v2477_v39 = vunpack.i.l.bf16 %v2476_v53 }
  0xd9   : > { %2825 = vrot.lane.b32.xlu1 %v3304_v59, %s3062_s30  ;;  %v1635_v59 = vsel %vm172_vm0, %v3420_v1, %v2473_v37  ;;  %v2427_v37 = vunpack.i.l.bf16 %v3487_v18 }
  0xda   : > { %2830 = vrot.lane.b32.xlu0 %v3285_v40, %s3062_s30  ;;  %v1636_v0 = vsel %vm172_vm0, %v3422_v6, %v2477_v39  ;;  %v463_v6 = vld [vmem:[#allocation2 + $0x92] sm:$0xff]  ;;  %v464_v39 = vld [vmem:[#allocation2 + $0x9a] sm:$0xff] }
  0xdb   : > { %v3578_v60 = vpop.permute.xlu1 %2545 }
  0xdc   : > { %v2551_v38 = vpop.permute.xlu0 %2550 }
  0xdd   : > { %v2553_v48 = vunpack.i.h.bf16 %v2551_v38  ;;  %v2552_v9 = vunpack.i.l.bf16 %v2551_v38  ;;  %2835 = vrot.lane.b32.xlu1 %v3308_v2, %s3062_s30 }
  0xde   : > { %2840 = vrot.lane.b32.xlu0 %v2809_v25, %s3057_s22  ;;  %v3602_v25 = vpack.i.bf16 %v448_v5, %v447_v29  ;;  %v2428_v29 = vunpack.i.h.bf16 %v3487_v18  ;;  %v1615_v18 = vsel %vm172_vm0, %v3344_v20, %v2423_v26 }
  0xdf   : > { %v3590_v53 = vsel %vm1638_vm4, %v1634_v52, %v2552_v9  ;;  %v3593_v38 = vsel %vm1638_vm4, %v1635_v59, %v2553_v48  ;;  %v2556_v22 = vpop.permute.xlu1 %2555  ;;  %v3628_v59 = vpack.i.bf16 %v464_v39, %v463_v6  ;;  %v1614_v52 = vsel %vm172_vm0, %v3342_v19, %v2422_v7 }
  0xe0   : > { %v2558_v51 = vunpack.i.h.bf16 %v2556_v22  ;;  %v2557_v49 = vunpack.i.l.bf16 %v2556_v22  ;;  %v3595_v1 = vpop.permute.xlu0 %2560  ;;  %v1617_v5 = vsel %vm172_vm0, %v3348_v24, %v2428_v29  ;;  %v2508_v22 = vunpack.i.h.bf16 %v3547_v58 }
  0xe1   : > { %2845 = vrot.lane.b32.xlu1 %v2844_v32, %s3057_s22  ;;  %v2503_v32 = vunpack.i.h.bf16 %v3541_v46  ;;  %v1616_v46 = vsel %vm172_vm0, %v3346_v21, %v2427_v37  ;;  %v1618_v19 = vsel %vm172_vm0, %v3362_v27, %v2432_v10  ;;  %v1647_v24 = vsel %vm1638_vm4, %v1614_v52, %v2502_v45 }
  0xe2   : > { %v3605_v9 = vsel %vm1638_vm4, %v1637_v41, %v2558_v51  ;;  %v3608_v48 = vsel %vm1638_vm4, %v1636_v0, %v2557_v49  ;;  %2850 = vrot.lane.b32.xlu0 %v3587_v8, %s3057_s22  ;;  %v2433_v49 = vunpack.i.h.bf16 %v3489_v50  ;;  %v2513_v7 = vunpack.i.h.bf16 %v3549_v42 }
  0xe3   : > { %v3614_v44 = vpop.permute.xlu1 %2565  ;;  %v1648_v21 = vsel %vm1638_vm4, %v1615_v18, %v2503_v32  ;;  %v2437_v27 = vunpack.i.l.bf16 %v3495_v62  ;;  %v1650_v29 = vsel %vm1638_vm4, %v1617_v5, %v2508_v22  ;;  %v2518_v32 = vunpack.i.h.bf16 %v3555_v43 }
  0xe4   : > { %v3618_v51 = vpop.permute.xlu0 %2570  ;;  %v1619_v20 = vsel %vm172_vm0, %v3364_v28, %v2433_v49  ;;  %v2438_v28 = vunpack.i.h.bf16 %v3495_v62  ;;  %v2517_v45 = vunpack.i.l.bf16 %v3555_v43 }
  0xe5   : > { %2855 = vrot.lane.b32.xlu1 %v3602_v25, %s3057_s22 }
  0xe6   : > { %2860 = vrot.lane.b32.xlu0 %v3285_v40, %s3058_s23  ;;  %v2507_v40 = vunpack.i.l.bf16 %v3547_v58  ;;  %v2512_v58 = vunpack.i.l.bf16 %v3549_v42 }
  0xe7   : > { %v3634_v50 = vpop.permute.xlu1 %2575 }
  0xe8   : > { %v2581_v41 = vpop.permute.xlu0 %2580  ;;  %v1649_v37 = vsel %vm1638_vm4, %v1616_v46, %v2507_v40  ;;  %v1651_v52 = vsel %vm1638_vm4, %v1618_v19, %v2512_v58  ;;  %v1621_v40 = vsel %vm172_vm0, %v3368_v34, %v2438_v28  ;;  %v528_v34 = vld [vmem:[#allocation2 + $0xa9] sm:$0xff]  ;;  %v529_v58 = vld [vmem:[#allocation2 + $0xb1] sm:$0xff]  ;;  %v2463_v28 = vunpack.i.h.bf16 %v3513_v63 }
  0xe9   : > { %v2583_v0 = vunpack.i.h.bf16 %v2581_v41  ;;  %v2582_v26 = vunpack.i.l.bf16 %v2581_v41  ;;  %2865 = vrot.lane.b32.xlu1 %v3308_v2, %s3058_s23  ;;  %v1652_v41 = vsel %vm1638_vm4, %v1619_v20, %v2513_v7  ;;  %v1620_v20 = vsel %vm172_vm0, %v3366_v30, %v2437_v27 }
  0xea   : > { %2870 = vrot.lane.b32.xlu0 %v3628_v59, %s3058_s23  ;;  %v2462_v27 = vunpack.i.l.bf16 %v3513_v63  ;;  %v1631_v63 = vsel %vm172_vm0, %v3402_v55, %v2463_v28 }
  0xeb   : > { %v3657_v6 = vsel %vm1671_vm5, %v1647_v24, %v2582_v26  ;;  %v3660_v2 = vsel %vm1671_vm5, %v1648_v21, %v2583_v0  ;;  %v2586_v39 = vpop.permute.xlu1 %2585  ;;  %v1654_v24 = vsel %vm1638_vm4, %v1621_v40, %v2518_v32 }
  0xec   : > { %4393 = vst [vmem:[#allocation21_spill] sm:$0xff] %v3660_v2  ;;  %v2588_v49 = vunpack.i.h.bf16 %v2586_v39  ;;  %v2587_v42 = vunpack.i.l.bf16 %v2586_v39  ;;  %v2591_v10 = vpop.permute.xlu0 %2590  ;;  %v1630_v32 = vsel %vm172_vm0, %v3400_v54, %v2462_v27 }
  0xed   : > { %v2593_v18 = vunpack.i.h.bf16 %v2591_v10  ;;  %v2592_v62 = vunpack.i.l.bf16 %v2591_v10  ;;  %2875 = vrot.lane.b32.xlu1 %v3312_v3, %s3058_s23 }
  0xee   : > { %v3671_v5 = vsel %vm1671_vm5, %v1649_v37, %v2587_v42  ;;  %v3674_v46 = vsel %vm1671_vm5, %v1650_v29, %v2588_v49  ;;  %2880 = vrot.lane.b32.xlu0 %v3374_v35, %s3059_s24  ;;  %v1653_v35 = vsel %vm1638_vm4, %v1620_v20, %v2517_v45  ;;  %v545_v29 = vld [vmem:[#allocation2 + $0x171] sm:$0xff]  ;;  %v2543_v37 = vunpack.i.h.bf16 %v3572_v61 }
  0xef   : > { %4394 = vst [vmem:[#allocation22_spill] sm:$0xff] %v3671_v5  ;;  %4395 = vst [vmem:[#allocation23_spill] sm:$0xff] %v3674_v46  ;;  %v3679_v43 = vsel %vm1671_vm5, %v1651_v52, %v2592_v62  ;;  %v3682_v22 = vsel %vm1671_vm5, %v1652_v41, %v2593_v18  ;;  %v2596_v3 = vpop.permute.xlu1 %2595  ;;  %v2542_v49 = vunpack.i.l.bf16 %v3572_v61  ;;  %v2467_v45 = vunpack.i.l.bf16 %v3519_v23  ;;  %v574_v18 = vld [vmem:[#allocation2 + $0x152] sm:$0xff]  ;;  %v575_v62 = vld [vmem:[#allocation2 + $0x15a] sm:$0xff] }
  0xf0   : > { %4396 = vst [vmem:[#allocation24_spill] sm:$0xff] %v3679_v43  ;;  %4397 = vst [vmem:[#allocation25_spill] sm:$0xff] %v3682_v22  ;;  %v2598_v19 = vunpack.i.h.bf16 %v2596_v3  ;;  %v2597_v0 = vunpack.i.l.bf16 %v2596_v3  ;;  %v3688_v26 = vpop.permute.xlu0 %2600  ;;  %v2547_v52 = vunpack.i.l.bf16 %v3578_v60  ;;  %v1664_v54 = vsel %vm1638_vm4, %v1631_v63, %v2543_v37  ;;  %v577_v63 = vld [vmem:[#allocation2 + $0x172] sm:$0xff] }
  0xf1   : > { %2885 = vrot.lane.b32.xlu1 %v3430_v11, %s3059_s24  ;;  %v544_v11 = vld [vmem:[#allocation2 + $0x169] sm:$0xff]  ;;  %v1663_v55 = vsel %vm1638_vm4, %v1630_v32, %v2542_v49  ;;  %v2413_v32 = vunpack.i.h.bf16 %v3470_v47  ;;  %v4415_v22 = vld [vmem:[#allocation17_spill] sm:$0xff] }
  0xf2   : > { %v3695_v21 = vsel %vm1671_vm5, %v1653_v35, %v2597_v0  ;;  %v3698_v7 = vsel %vm1671_vm5, %v1654_v24, %v2598_v19  ;;  %2890 = vrot.lane.b32.xlu0 %v3380_v36, %s3059_s24  ;;  %v3714_v36 = vpack.i.bf16 %v529_v58, %v528_v34  ;;  %v3718_v10 = vpack.i.bf16 %v545_v29, %v544_v11  ;;  %v560_v19 = vld [vmem:[#allocation2 + $0xaa] sm:$0xff]  ;;  %v561_v0 = vld [vmem:[#allocation2 + $0xb2] sm:$0xff] }
  0xf3   : > { %4398 = vst [vmem:[#allocation26_spill] sm:$0xff] %v3695_v21  ;;  %4399 = vst [vmem:[#allocation27_spill] sm:$0xff] %v3698_v7  ;;  %v3702_v30 = vpop.permute.xlu1 %2605  ;;  %v1632_v24 = vsel %vm172_vm0, %v3404_v56, %v2467_v45  ;;  %v3756_v56 = vpack.i.bf16 %v561_v0, %v560_v19  ;;  %v576_v49 = vld [vmem:[#allocation2 + $0x16a] sm:$0xff]  ;;  %v451_v0 = vld [vmem:[#allocation2 + $0x181] sm:$0xff]  ;;  %v2522_v43 = vunpack.i.l.bf16 %v4415_v22 }
  0xf4   : > { %v3706_v39 = vpop.permute.xlu0 %2610  ;;  %v1665_v27 = vsel %vm1638_vm4, %v1632_v24, %v2547_v52  ;;  %v436_v19 = vld [vmem:[#allocation2 + $0xc9] sm:$0xff]  ;;  %v4418_v5 = vld [vmem:[#allocation9_spill] sm:$0xff] }
  0xf5   : > { %2895 = vrot.lane.b32.xlu1 %v3436_v12, %s3059_s24  ;;  %v2468_v12 = vunpack.i.h.bf16 %v3519_v23 }
  0xf6   : > { %2900 = vrot.lane.b32.xlu0 %v3587_v8, %s3061_s29  ;;  %v2548_v8 = vunpack.i.h.bf16 %v3578_v60  ;;  %v2924_v60 = vpack.i.bf16 %v575_v62, %v574_v18  ;;  %v2493_v62 = vunpack.i.h.bf16 %v3533_v4 }
  0xf7   : > { %v3716_v42 = vpop.permute.xlu1 %2615 }
  0xf8   : > { %v2621_v61 = vpop.permute.xlu0 %2620 }
  0xf9   : > { %v2623_v41 = vunpack.i.h.bf16 %v2621_v61  ;;  %v2622_v3 = vunpack.i.l.bf16 %v2621_v61  ;;  %2905 = vrot.lane.b32.xlu1 %v3602_v25, %s3061_s29  ;;  %v1633_v25 = vsel %vm172_vm0, %v3406_v57, %v2468_v12  ;;  %v2412_v12 = vunpack.i.l.bf16 %v3470_v47 }
  0xfa   : > { %2910 = vrot.lane.b32.xlu0 %v3714_v36, %s3061_s29  ;;  %v1666_v28 = vsel %vm1638_vm4, %v1633_v25, %v2548_v8  ;;  %v3773_v47 = vpack.i.bf16 %v577_v63, %v576_v49  ;;  %v467_v49 = vld [vmem:[#allocation2 + $0xc2] sm:$0xff]  ;;  %v468_v63 = vld [vmem:[#allocation2 + $0xca] sm:$0xff] }
  0xfb   : > { %v3735_v23 = vsel %vm1671_vm5, %v1663_v55, %v2622_v3  ;;  %v3738_v40 = vsel %vm1671_vm5, %v1664_v54, %v2623_v41  ;;  %v2626_v20 = vpop.permute.xlu1 %2625  ;;  %v2572_v3 = vunpack.i.l.bf16 %v3618_v51  ;;  %v435_v55 = vld [vmem:[#allocation2 + $0xc1] sm:$0xff]  ;;  %v1610_v54 = vsel %vm172_vm0, %v3324_v13, %v2412_v12 }
  0xfc   : > { %4400 = vst [vmem:[#allocation28_spill] sm:$0xff] %v3735_v23  ;;  %4401 = vst [vmem:[#allocation29_spill] sm:$0xff] %v3738_v40  ;;  %v2628_v35 = vunpack.i.h.bf16 %v2626_v20  ;;  %v2627_v34 = vunpack.i.l.bf16 %v2626_v20  ;;  %v2631_v58 = vpop.permute.xlu0 %2630  ;;  %v1611_v20 = vsel %vm172_vm0, %v3326_v14, %v2413_v32  ;;  %v2497_v13 = vunpack.i.l.bf16 %v3539_v31  ;;  %v483_v32 = vld [vmem:[#allocation2 + $0x182] sm:$0xff]  ;;  %v4419_v40 = vld [vmem:[#allocation8_spill] sm:$0xff] }
  0xfd   : > { %v2633_v11 = vunpack.i.h.bf16 %v2631_v58  ;;  %v2632_v29 = vunpack.i.l.bf16 %v2631_v58  ;;  %2915 = vrot.lane.b32.xlu1 %v3718_v10, %s3061_s29  ;;  %v1644_v25 = vsel %vm1638_vm4, %v1611_v20, %v2493_v62  ;;  %v2578_v14 = vunpack.i.h.bf16 %v3634_v50  ;;  %v3831_v20 = vld [vmem:[#allocation2 + $0x188] sm:$0xff]  ;;  %v4420_v23 = vld [vmem:[#allocation18_spill] sm:$0xff] }
  0xfe   : > { %v3749_v37 = vsel %vm1671_vm5, %v1665_v27, %v2627_v34  ;;  %v3752_v57 = vsel %vm1671_vm5, %v1666_v28, %v2628_v35  ;;  %2920 = vrot.lane.b32.xlu0 %v3628_v59, %s3062_s30  ;;  %v2492_v59 = vunpack.i.l.bf16 %v3533_v4  ;;  %v2498_v35 = vunpack.i.h.bf16 %v3539_v31 }
  0xff   : > { %4402 = vst [vmem:[#allocation30_spill] sm:$0xff] %v3749_v37  ;;  %4403 = vst [vmem:[#allocation31_spill] sm:$0xff] %v3752_v57  ;;  %v3762_v45 = vsel %vm1671_vm5, %v3590_v53, %v2632_v29  ;;  %v3766_v61 = vsel %vm1671_vm5, %v3593_v38, %v2633_v11  ;;  %v2636_v18 = vpop.permute.xlu1 %2635  ;;  %v2573_v53 = vunpack.i.h.bf16 %v3618_v51  ;;  %v2418_v51 = vunpack.i.h.bf16 %v3477_v17 }
 0x100   : > { %4404 = vst [vmem:[#allocation32_spill] sm:$0xff] %v3762_v45  ;;  %4405 = vst [vmem:[#allocation33_spill] sm:$0xff] %v3766_v61  ;;  %v2638_v8 = vunpack.i.h.bf16 %v2636_v18  ;;  %v2637_v52 = vunpack.i.l.bf16 %v2636_v18  ;;  %v3770_v41 = vpop.permute.xlu0 %2640  ;;  %v1643_v24 = vsel %vm1638_vm4, %v1610_v54, %v2492_v59  ;;  %v2577_v58 = vunpack.i.l.bf16 %v3634_v50  ;;  %v484_v59 = vld [vmem:[#allocation2 + $0x18a] sm:$0xff] }
 0x101   : > { %2925 = vrot.lane.b32.xlu1 %v2924_v60, %s3062_s30  ;;  %v2417_v60 = vunpack.i.l.bf16 %v3477_v17  ;;  %v1676_v27 = vsel %vm1671_vm5, %v1643_v24, %v2572_v3  ;;  %v1677_v11 = vsel %vm1671_vm5, %v1644_v25, %v2573_v53  ;;  %v3807_v29 = vpack.i.bf16 %v436_v19, %v435_v55  ;;  %v3841_v25 = vld [vmem:[#allocation2 + $0xe0] sm:$0xff]  ;;  %v3843_v24 = vld [vmem:[#allocation2 + $0x198] sm:$0xff] }
 0x102   : > { %v3779_v38 = vsel %vm1671_vm5, %v3608_v48, %v2637_v52  ;;  %v3783_v4 = vsel %vm1671_vm5, %v3605_v9, %v2638_v8  ;;  %2930 = vrot.lane.b32.xlu0 %v3756_v56, %s3062_s30  ;;  %v452_v9 = vld [vmem:[#allocation2 + $0x189] sm:$0xff]  ;;  %v1613_v50 = vsel %vm172_vm0, %v3330_v16, %v2418_v51  ;;  %v3821_v8 = vld [vmem:[#allocation2 + $0xc0] sm:$0xff]  ;;  %v3833_v51 = vld [vmem:[#allocation2 + $0xd8] sm:$0xff]  ;;  %v2402_v19 = vunpack.i.l.bf16 %v3461_v33 }
 0x103   : > { %4406 = vst [vmem:[#allocation34_spill] sm:$0xff] %v3779_v38  ;;  %4407 = vst [vmem:[#allocation35_spill] sm:$0xff] %v3783_v4  ;;  %v3793_v48 = vpop.permute.xlu1 %2645  ;;  %v3809_v31 = vpack.i.bf16 %v452_v9, %v451_v0  ;;  %v1612_v12 = vsel %vm172_vm0, %v3328_v15, %v2417_v60  ;;  %v3823_v52 = vld [vmem:[#allocation2 + $0xc8] sm:$0xff]  ;;  %v1646_v53 = vsel %vm1638_vm4, %v1613_v50, %v2498_v35  ;;  %v3829_v15 = vld [vmem:[#allocation2 + $0x180] sm:$0xff]  ;;  %v2403_v60 = vunpack.i.h.bf16 %v3461_v33 }
 0x104   : > { %v2651_v34 = vpop.permute.xlu0 %2650  ;;  %v1645_v3 = vsel %vm1638_vm4, %v1612_v12, %v2497_v13  ;;  %v1679_v9 = vsel %vm1671_vm5, %v1646_v53, %v2578_v14  ;;  %v3845_v35 = vld [vmem:[#allocation2 + $0x1a0] sm:$0xff]  ;;  %v294_v13 = vld [vmem:[#allocation2 + $0x8] sm:$0xff]  ;;  %v3863_v50 = vpack.i.bf16 %v484_v59, %v483_v32  ;;  %v4412_v38 = vld [vmem:[#allocation5_spill] sm:$0xff]  ;;  %v2528_v2 = vunpack.i.h.bf16 %v4420_v23 }
 0x105   : > { %v2653_v28 = vunpack.i.h.bf16 %v2651_v34  ;;  %v2652_v17 = vunpack.i.l.bf16 %v2651_v34  ;;  %2935 = vrot.lane.b32.xlu1 %v3773_v47, %s3062_s30  ;;  %v1678_v0 = vsel %vm1671_vm5, %v1645_v3, %v2577_v58  ;;  %v293_v34 = vld [vmem:[#allocation2] sm:$0xff]  ;;  %v1607_v32 = vsel %vm172_vm0, %v294_v13, %v2403_v60  ;;  %v4414_v60 = vld [vmem:[#allocation16_spill] sm:$0xff] }
 0x106   : > { %2940 = vrot.lane.b32.xlu0 %v3714_v36, %s3057_s22  ;;  %v3855_v14 = vld [vmem:[#allocation2 + $0xd9] sm:$0xff]  ;;  %v3865_v12 = vld [vmem:[#allocation2 + $0xe1] sm:$0xff]  ;;  %v1606_v59 = vsel %vm172_vm0, %v293_v34, %v2402_v19  ;;  %v2488_v45 = vunpack.i.h.bf16 %v4414_v60  ;;  %v2487_v19 = vunpack.i.l.bf16 %v4414_v60 }
 0x107   : > { %v3816_v18 = vsel %vm1704_vm6, %v1676_v27, %v2652_v17  ;;  %v3819_v62 = vsel %vm1704_vm6, %v1677_v11, %v2653_v28  ;;  %v2656_v36 = vpop.permute.xlu1 %2655  ;;  %v3861_v11 = vpack.i.bf16 %v468_v63, %v467_v49  ;;  %v3869_v53 = vld [vmem:[#allocation2 + $0x1a1] sm:$0xff] }
 0x108   : > { %v2658_v16 = vunpack.i.h.bf16 %v2656_v36  ;;  %v2657_v55 = vunpack.i.l.bf16 %v2656_v36  ;;  %v3827_v54 = vpop.permute.xlu0 %2660  ;;  %v3867_v36 = vld [vmem:[#allocation2 + $0x199] sm:$0xff]  ;;  %v3901_v34 = vld [vmem:[#allocation2 + $0x1a2] sm:$0xff] }
 0x109   : > { %2945 = vrot.lane.b32.xlu1 %v3718_v10, %s3057_s22  ;;  %v4408_v10 = vld [vmem:[#allocation10_spill] sm:$0xff] }
 0x10a   : > { %v3848_v28 = vsel %vm1704_vm6, %v1678_v0, %v2657_v55  ;;  %v3851_v33 = vsel %vm1704_vm6, %v1679_v9, %v2658_v16  ;;  %2950 = vrot.lane.b32.xlu0 %v3807_v29, %s3057_s22  ;;  %v2408_v58 = vunpack.i.h.bf16 %v4408_v10  ;;  %v2407_v17 = vunpack.i.l.bf16 %v4408_v10  ;;  %v4409_v0 = vld [vmem:[#allocation11_spill] sm:$0xff]  ;;  %v4410_v55 = vld [vmem:[#allocation12_spill] sm:$0xff]  ;;  %v3899_v13 = vld [vmem:[#allocation2 + $0x19a] sm:$0xff] }
 0x10b   : > { %v3859_v27 = vpop.permute.xlu1 %2665  ;;  %v2979_v16 = vpack.i.bf16 %v3823_v52, %v3821_v8  ;;  %v2443_v9 = vunpack.i.h.bf16 %v4409_v0  ;;  %v2442_v10 = vunpack.i.l.bf16 %v4409_v0  ;;  %v3887_v8 = vld [vmem:[#allocation2 + $0xda] sm:$0xff]  ;;  %v3889_v52 = vld [vmem:[#allocation2 + $0xe2] sm:$0xff]  ;;  %v2448_v49 = vunpack.i.h.bf16 %v4410_v55  ;;  %v4411_v0 = vld [vmem:[#allocation4_spill] sm:$0xff] }
 0x10c   : > { %v3871_v3 = vpop.permute.xlu0 %2670  ;;  %v2447_v4 = vunpack.i.l.bf16 %v4410_v55  ;;  %v1608_v63 = vsel %vm172_vm0, %v4411_v0, %v2407_v17  ;;  %v1609_v21 = vsel %vm172_vm0, %v4412_v38, %v2408_v58  ;;  %v4413_v55 = vld [vmem:[#allocation15_spill] sm:$0xff]  ;;  %v4417_v58 = vld [vmem:[#allocation6_spill] sm:$0xff]  ;;  %v3034_v60 = vpack.i.bf16 %v3901_v34, %v3899_v13 }
 0x10d   : > { %2955 = vrot.lane.b32.xlu1 %v3809_v31, %s3057_s22  ;;  %v2483_v7 = vunpack.i.h.bf16 %v4413_v55  ;;  %v4416_v0 = vld [vmem:[#allocation7_spill] sm:$0xff]  ;;  %v1622_v37 = vsel %vm172_vm0, %v4417_v58, %v2442_v10  ;;  %v1625_v46 = vsel %vm172_vm0, %v4418_v5, %v2448_v49  ;;  %v2563_v10 = vunpack.i.h.bf16 %v3595_v1 }
 0x10e   : > { %2960 = vrot.lane.b32.xlu0 %v3756_v56, %s3058_s23  ;;  %v2482_v56 = vunpack.i.l.bf16 %v4413_v55  ;;  %v1623_v38 = vsel %vm172_vm0, %v4416_v0, %v2443_v9  ;;  %v2523_v55 = vunpack.i.h.bf16 %v4415_v22  ;;  %v1624_v17 = vsel %vm172_vm0, %v4419_v40, %v2447_v4 }
 0x10f   : > { %v3909_v61 = vpop.permute.xlu1 %2675  ;;  %v2527_v9 = vunpack.i.l.bf16 %v4420_v23  ;;  %v1640_v22 = vsel %vm1638_vm4, %v1607_v32, %v2483_v7  ;;  %v2562_v0 = vunpack.i.l.bf16 %v3595_v1  ;;  %v1641_v5 = vsel %vm1638_vm4, %v1608_v63, %v2487_v19 }
 0x110   : > { %v3914_v57 = vpop.permute.xlu0 %2680  ;;  %v1642_v40 = vsel %vm1638_vm4, %v1609_v21, %v2488_v45  ;;  %v1655_v4 = vsel %vm1638_vm4, %v1622_v37, %v2522_v43  ;;  %v2567_v23 = vunpack.i.l.bf16 %v3614_v44  ;;  %v1656_v7 = vsel %vm1638_vm4, %v1623_v38, %v2523_v55 }
 0x111   : > { %2965 = vrot.lane.b32.xlu1 %v3773_v47, %s3058_s23  ;;  %v1639_v47 = vsel %vm1638_vm4, %v1606_v59, %v2482_v56  ;;  %v2568_v32 = vunpack.i.h.bf16 %v3614_v44  ;;  %v2603_v59 = vunpack.i.h.bf16 %v3688_v26  ;;  %v2602_v1 = vunpack.i.l.bf16 %v3688_v26 }
 0x112   : > { %2970 = vrot.lane.b32.xlu0 %v3861_v11, %s3058_s23  ;;  %v1658_v21 = vsel %vm1638_vm4, %v1625_v46, %v2528_v2  ;;  %v1657_v43 = vsel %vm1638_vm4, %v1624_v17, %v2527_v9  ;;  %v2608_v37 = vunpack.i.h.bf16 %v3702_v30  ;;  %v2607_v45 = vunpack.i.l.bf16 %v3702_v30 }
 0x113   : > { %v3939_v58 = vpop.permute.xlu1 %2685  ;;  %v1672_v63 = vsel %vm1671_vm5, %v1639_v47, %v2562_v0  ;;  %v1673_v44 = vsel %vm1671_vm5, %v1640_v22, %v2563_v10  ;;  %v2643_v19 = vunpack.i.h.bf16 %v3770_v41  ;;  %v2642_v26 = vunpack.i.l.bf16 %v3770_v41 }
 0x114   : > { %v3945_v49 = vpop.permute.xlu0 %2690  ;;  %v1674_v2 = vsel %vm1671_vm5, %v1641_v5, %v2567_v23  ;;  %v2648_v46 = vunpack.i.h.bf16 %v3793_v48  ;;  %v2647_v17 = vunpack.i.l.bf16 %v3793_v48  ;;  %v2662_v30 = vunpack.i.l.bf16 %v3827_v54 }
 0x115   : > { %2975 = vrot.lane.b32.xlu1 %v3863_v50, %s3058_s23  ;;  %v1675_v38 = vsel %vm1671_vm5, %v1642_v40, %v2568_v32  ;;  %v1688_v55 = vsel %vm1671_vm5, %v1655_v4, %v2602_v1  ;;  %v1689_v9 = vsel %vm1671_vm5, %v1656_v7, %v2603_v59  ;;  %v2663_v41 = vunpack.i.h.bf16 %v3827_v54 }
 0x116   : > { %2980 = vrot.lane.b32.xlu0 %v2979_v16, %s3059_s24  ;;  %v4421_v22 = vpack.i.bf16 %v3831_v20, %v3829_v15  ;;  %v1690_v48 = vsel %vm1671_vm5, %v1657_v43, %v2607_v45  ;;  %v1691_v47 = vsel %vm1671_vm5, %v1658_v21, %v2608_v37  ;;  %v2668_v10 = vunpack.i.h.bf16 %v3859_v27 }
 0x117   : > { %v3962_v56 = vpop.permute.xlu1 %2695  ;;  %v2667_v0 = vunpack.i.l.bf16 %v3859_v27  ;;  %v4422_v5 = vpack.i.bf16 %v3841_v25, %v3833_v51  ;;  %v1705_v54 = vsel %vm1704_vm6, %v1672_v63, %v2642_v26  ;;  %v1706_v40 = vsel %vm1704_vm6, %v1673_v44, %v2643_v19 }
 0x118   : > { %v3968_v16 = vpop.permute.xlu0 %2700  ;;  %v2673_v15 = vunpack.i.h.bf16 %v3871_v3  ;;  %v2672_v20 = vunpack.i.l.bf16 %v3871_v3  ;;  %v1707_v23 = vsel %vm1704_vm6, %v1674_v2, %v2647_v17  ;;  %v1708_v27 = vsel %vm1704_vm6, %v1675_v38, %v2648_v46 }
 0x119   : > { %2985 = vrot.lane.b32.xlu1 %v4421_v22, %s3059_s24  ;;  %v1721_v7 = vsel %vm1704_vm6, %v1688_v55, %v2662_v30  ;;  %v2677_v51 = vunpack.i.l.bf16 %v3909_v61  ;;  %v1722_v32 = vsel %vm1704_vm6, %v1689_v9, %v2663_v41  ;;  %v2678_v59 = vunpack.i.h.bf16 %v3909_v61 }
 0x11a   : > { %2990 = vrot.lane.b32.xlu0 %v4422_v5, %s3059_s24  ;;  %v2683_v1 = vunpack.i.h.bf16 %v3914_v57  ;;  %v2682_v3 = vunpack.i.l.bf16 %v3914_v57  ;;  %v4423_v21 = vpack.i.bf16 %v3845_v35, %v3843_v24  ;;  %v1723_v43 = vsel %vm1704_vm6, %v1690_v48, %v2667_v0 }
 0x11b   : > { %v3990_v4 = vpop.permute.xlu1 %2705  ;;  %v1724_v37 = vsel %vm1704_vm6, %v1691_v47, %v2668_v10  ;;  %v2688_v45 = vunpack.i.h.bf16 %v3939_v58  ;;  %v2687_v63 = vunpack.i.l.bf16 %v3939_v58  ;;  %v1738_v61 = vsel %vm1737_vm7, %v1705_v54, %v2672_v20 }
 0x11c   : > { %v2711_v25 = vpop.permute.xlu0 %2710  ;;  %v1739_v57 = vsel %vm1737_vm7, %v1706_v40, %v2673_v15  ;;  %v2693_v44 = vunpack.i.h.bf16 %v3945_v49  ;;  %v2692_v24 = vunpack.i.l.bf16 %v3945_v49  ;;  %v1754_v19 = vsel %vm1737_vm7, %v1721_v7, %v2677_v51 }
 0x11d   : > { %2995 = vrot.lane.b32.xlu1 %v4423_v21, %s3059_s24  ;;  %v2698_v26 = vunpack.i.h.bf16 %v3962_v56  ;;  %v2697_v2 = vunpack.i.l.bf16 %v3962_v56  ;;  %v2702_v58 = vunpack.i.l.bf16 %v3968_v16  ;;  %v1740_v17 = vsel %vm1737_vm7, %v1707_v23, %v2682_v3 }
 0x11e   : > { %3000 = vrot.lane.b32.xlu0 %v3807_v29, %s3061_s29  ;;  %v1755_v29 = vsel %vm1737_vm7, %v1722_v32, %v2678_v59  ;;  %v1741_v30 = vsel %vm1737_vm7, %v1708_v27, %v2683_v1  ;;  %v2703_v38 = vunpack.i.h.bf16 %v3968_v16  ;;  %v1756_v49 = vsel %vm1737_vm7, %v1723_v43, %v2687_v63 }
 0x11f   : > { %v2716_v35 = vpop.permute.xlu1 %2715  ;;  %v1757_v55 = vsel %vm1737_vm7, %v1724_v37, %v2688_v45  ;;  %v2713_v9 = vunpack.i.h.bf16 %v2711_v25  ;;  %v2712_v56 = vunpack.i.l.bf16 %v2711_v25  ;;  %v4424_v41 = vpack.i.bf16 %v3865_v12, %v3855_v14 }
 0x120   : > { %v2721_v46 = vpop.permute.xlu0 %2720  ;;  %v1771_v22 = vsel %vm1770_vm8, %v1738_v61, %v2692_v24  ;;  %v1772_v48 = vsel %vm1770_vm8, %v1739_v57, %v2693_v44  ;;  %v2718_v47 = vunpack.i.h.bf16 %v2716_v35  ;;  %v2717_v16 = vunpack.i.l.bf16 %v2716_v35 }
 0x121   : > { %3005 = vrot.lane.b32.xlu1 %v3809_v31, %s3061_s29  ;;  %v1787_v31 = vsel %vm1770_vm8, %v1754_v19, %v2697_v2  ;;  %v1788_v0 = vsel %vm1770_vm8, %v1755_v29, %v2698_v26  ;;  %v1773_v5 = vsel %vm1770_vm8, %v1740_v17, %v2702_v58  ;;  %v2722_v54 = vunpack.i.l.bf16 %v2721_v46 }
 0x122   : > { %3010 = vrot.lane.b32.xlu0 %v4424_v41, %s3061_s29  ;;  %v1774_v15 = vsel %vm1770_vm8, %v1741_v30, %v2703_v38  ;;  %v2708_v14 = vunpack.i.h.bf16 %v3990_v4  ;;  %v4425_v23 = vpack.i.bf16 %v3869_v53, %v3867_v36  ;;  %v2707_v27 = vunpack.i.l.bf16 %v3990_v4 }
 0x123   : > { %v2726_v10 = vpop.permute.xlu1 %2725  ;;  %v2723_v7 = vunpack.i.h.bf16 %v2721_v46  ;;  %v1804_v51 = vsel %vm1803_vm9, %v1771_v22, %v2712_v56  ;;  %v1805_v25 = vsel %vm1803_vm9, %v1772_v48, %v2713_v9  ;;  %v1820_v3 = vsel %vm1803_vm9, %v1787_v31, %v2717_v16 }
 0x124   : > { %v2731_v40 = vpop.permute.xlu0 %2730  ;;  %v1821_v36 = vsel %vm1803_vm9, %v1788_v0, %v2718_v47  ;;  %v1806_v53 = vsel %vm1803_vm9, %v1773_v5, %v2722_v54  ;;  %v2727_v45 = vunpack.i.l.bf16 %v2726_v10  ;;  %v4426_v44 = vpack.i.bf16 %v3889_v52, %v3887_v8  ;;  %v4427_v47 = vld [vmem:[#allocation13_spill] sm:$0xff]  ;;  %v4429_v5 = vld [vmem:[#allocation19_spill] sm:$0xff] }
 0x125   : > { %v2733_v12 = vunpack.i.h.bf16 %v2731_v40  ;;  %v2732_v20 = vunpack.i.l.bf16 %v2731_v40  ;;  %3015 = vrot.lane.b32.xlu1 %v4425_v23, %s3061_s29  ;;  %v1807_v57 = vsel %vm1803_vm9, %v1774_v15, %v2723_v7  ;;  %v1789_v19 = vsel %vm1770_vm8, %v1756_v49, %v2707_v27  ;;  %v4430_v15 = vld [vmem:[#allocation20_spill] sm:$0xff] }
 0x126   : > { %3020 = vrot.lane.b32.xlu0 %v3861_v11, %s3062_s30  ;;  %v2728_v11 = vunpack.i.h.bf16 %v2726_v10  ;;  %v1790_v46 = vsel %vm1770_vm8, %v1757_v55, %v2708_v14  ;;  %v1822_v30 = vsel %vm1803_vm9, %v1789_v19, %v2727_v45  ;;  %v2453_v13 = vunpack.i.h.bf16 %v4427_v47  ;;  %v4428_v10 = vld [vmem:[#allocation14_spill] sm:$0xff] }
 0x127   : > { %v2736_v32 = vpop.permute.xlu1 %2735  ;;  %v1837_v59 = vsel %vm1836_vm10, %v1804_v51, %v2732_v20  ;;  %v1838_v1 = vsel %vm1836_vm10, %v1805_v25, %v2733_v12  ;;  %v2458_v31 = vunpack.i.h.bf16 %v4428_v10  ;;  %v2457_v0 = vunpack.i.l.bf16 %v4428_v10  ;;  %v3041_v12 = vld [vmem:[#allocation2 + $0xf8] sm:$0xff]  ;;  %v3042_v25 = vld [vmem:[#allocation2 + $0xf0] sm:$0xff] }
 0x128   : > { %v2738_v4 = vunpack.i.h.bf16 %v2736_v32  ;;  %v2737_v21 = vunpack.i.l.bf16 %v2736_v32  ;;  %v2741_v43 = vpop.permute.xlu0 %2740  ;;  %v1869_v37 = vpack.c.bf16 %v1838_v1, %v1837_v59  ;;  %v1823_v38 = vsel %vm1803_vm9, %v1790_v46, %v2728_v11 }
 0x129   : > { %v2743_v63 = vunpack.i.h.bf16 %v2741_v43  ;;  %v2742_v61 = vunpack.i.l.bf16 %v2741_v43  ;;  %3025 = vrot.lane.b32.xlu1 %v3863_v50, %s3062_s30  ;;  %v2532_v54 = vunpack.i.l.bf16 %v4429_v5  ;;  %v2533_v40 = vunpack.i.h.bf16 %v4429_v5 }
 0x12a   : > { %3030 = vrot.lane.b32.xlu0 %v4426_v44, %s3062_s30  ;;  %2345 = vmatprep.mubr.msk.bf16.mxu0 %vm1907_vm11, %v1869_v37  ;;  %v1853_v24 = vsel %vm1836_vm10, %v1820_v3, %v2737_v21  ;;  %v1854_v35 = vsel %vm1836_vm10, %v1821_v36, %v2738_v4  ;;  %v2538_v14 = vunpack.i.h.bf16 %v4430_v15  ;;  %v1627_v20 = vsel %vm172_vm0, %v3041_v12, %v2453_v13  ;;  %v3044_v21 = vld [vmem:[#allocation2 + $0x108] sm:$0xff] }
 0x12b   : > { %v1839_v26 = vsel %vm1836_vm10, %v1806_v53, %v2742_v61  ;;  %v1840_v2 = vsel %vm1836_vm10, %v1807_v57, %v2743_v63  ;;  %v2746_v50 = vpop.permute.xlu1 %2745  ;;  %v1877_v58 = vpack.c.bf16 %v1854_v35, %v1853_v24  ;;  %v2537_v23 = vunpack.i.l.bf16 %v4430_v15  ;;  %v3043_v53 = vld [vmem:[#allocation2 + $0x110] sm:$0xff] }
 0x12c   : > { %v1870_v29 = vpack.c.bf16 %v1840_v2, %v1839_v26  ;;  %v2748_v17 = vunpack.i.h.bf16 %v2746_v50  ;;  %v2747_v8 = vunpack.i.l.bf16 %v2746_v50  ;;  %v2751_v52 = vpop.permute.xlu0 %2750  ;;  %v2613_v27 = vunpack.i.h.bf16 %v3706_v39 }
 0x12d   : > { %3035 = vrot.lane.b32.xlu1 %v3034_v60, %s3062_s30  ;;  %2361 = vmatprep.mubr.msk.bf16.mxu1 %vm1907_vm11, %v1877_v58  ;;  %v2452_v60 = vunpack.i.l.bf16 %v4427_v47  ;;  %v2612_v7 = vunpack.i.l.bf16 %v3706_v39  ;;  %v2618_v59 = vunpack.i.h.bf16 %v3716_v42  ;;  %v2617_v1 = vunpack.i.l.bf16 %v3716_v42 }
 0x12e   : > { %v1855_v49 = vsel %vm1836_vm10, %v1822_v30, %v2747_v8  ;;  %v1856_v9 = vsel %vm1836_vm10, %v1823_v38, %v2748_v17  ;;  %2346 = vmatmul.mubr.msk.bf16.vlgmr.msra.gmra.mxu0 %vm1907_vm11, %v1870_v29  ;;  %v2752_v3 = vunpack.i.l.bf16 %v2751_v52  ;;  %v1629_v4 = vsel %vm172_vm0, %v3043_v53, %v2458_v31 }
 0x12f   : > { %v1878_v55 = vpack.c.bf16 %v1856_v9, %v1855_v49  ;;  %v2756_v56 = vpop.permute.xlu1 %2755  ;;  %v1626_v32 = vsel %vm172_vm0, %v3042_v25, %v2452_v60  ;;  %v1628_v43 = vsel %vm172_vm0, %v3044_v21, %v2457_v0  ;;  %v2753_v11 = vunpack.i.h.bf16 %v2751_v52 }
 0x130   : > { %v2761_v41 = vpop.permute.xlu0 %2760  ;;  %v1659_v37 = vsel %vm1638_vm4, %v1626_v32, %v2532_v54  ;;  %v1660_v39 = vsel %vm1638_vm4, %v1627_v20, %v2533_v40  ;;  %v1662_v45 = vsel %vm1638_vm4, %v1629_v4, %v2538_v14  ;;  %v2758_v63 = vunpack.i.h.bf16 %v2756_v56 }
 0x131   : > { %2362 = vmatmul.mubr.msk.bf16.vlgmr.msra.gmra.mxu1 %vm1907_vm11, %v1878_v55  ;;  %v2757_v61 = vunpack.i.l.bf16 %v2756_v56  ;;  %v1661_v57 = vsel %vm1638_vm4, %v1628_v43, %v2537_v23  ;;  %v1692_v42 = vsel %vm1671_vm5, %v1659_v37, %v2612_v7  ;;  %v1693_v44 = vsel %vm1671_vm5, %v1660_v39, %v2613_v27 }
 0x132   : > { %v2762_v24 = vunpack.i.l.bf16 %v2761_v41  ;;  %v1694_v19 = vsel %vm1671_vm5, %v1661_v57, %v2617_v1  ;;  %v1695_v26 = vsel %vm1671_vm5, %v1662_v45, %v2618_v59  ;;  %v1725_v2 = vsel %vm1704_vm6, %v1692_v42, %v2752_v3 }
 0x133   : > { %v4076_v22 = vpop.permute.xlu1 %2765  ;;  %v2763_v50 = vunpack.i.h.bf16 %v2761_v41  ;;  %v1726_v46 = vsel %vm1704_vm6, %v1693_v44, %v2753_v11  ;;  %v1727_v52 = vsel %vm1704_vm6, %v1694_v19, %v2757_v61  ;;  %v1728_v30 = vsel %vm1704_vm6, %v1695_v26, %v2758_v63 }
 0x134   : > { %v4078_v48 = vpop.permute.xlu0 %2770  ;;  %v2768_v29 = vunpack.i.h.bf16 %v4076_v22  ;;  %v2767_v17 = vunpack.i.l.bf16 %v4076_v22  ;;  %v1742_v9 = vsel %vm1737_vm7, %v3816_v18, %v2762_v24 }
 0x135   : > { %v2773_v8 = vunpack.i.h.bf16 %v4078_v48  ;;  %v2772_v38 = vunpack.i.l.bf16 %v4078_v48  ;;  %v1743_v47 = vsel %vm1737_vm7, %v3819_v62, %v2763_v50 }
 0x136   : > { %v1758_v48 = vsel %vm1737_vm7, %v1725_v2, %v2767_v17  ;;  %v1759_v0 = vsel %vm1737_vm7, %v1726_v46, %v2768_v29 }
 0x137   : > { %v4081_v34 = vpop.permute.xlu1 %2775  ;;  %v1745_v18 = vsel %vm1737_vm7, %v3851_v33, %v2773_v8  ;;  %v1744_v5 = vsel %vm1737_vm7, %v3848_v28, %v2772_v38 }
 0x138   : > { %v4084_v16 = vpop.permute.xlu0 %2780  ;;  %v2777_v49 = vunpack.i.l.bf16 %v4081_v34  ;;  %v2778_v55 = vunpack.i.h.bf16 %v4081_v34 }
 0x139   : > { %v2783_v56 = vunpack.i.h.bf16 %v4084_v16  ;;  %v2782_v41 = vunpack.i.l.bf16 %v4084_v16 }
 0x13a   : > { %v1760_v16 = vsel %vm1737_vm7, %v1727_v52, %v2777_v49  ;;  %v1761_v62 = vsel %vm1737_vm7, %v1728_v30, %v2778_v55 }
 0x13b   : > { %v2786_v51 = vpop.permute.xlu1 %2785  ;;  %v1775_v15 = vsel %vm1770_vm8, %v1742_v9, %v2782_v41  ;;  %v1776_v14 = vsel %vm1770_vm8, %v1743_v47, %v2783_v56 }
 0x13c   : > { %v2791_v36 = vpop.permute.xlu0 %2790  ;;  %v2788_v13 = vunpack.i.h.bf16 %v2786_v51  ;;  %v2787_v60 = vunpack.i.l.bf16 %v2786_v51 }
 0x13d   : > { %v2792_v10 = vunpack.i.l.bf16 %v2791_v36  ;;  %v2793_v34 = vunpack.i.h.bf16 %v2791_v36 }
 0x13e   : > { %v1791_v23 = vsel %vm1770_vm8, %v1758_v48, %v2787_v60  ;;  %v1792_v33 = vsel %vm1770_vm8, %v1759_v0, %v2788_v13 }
 0x13f   : > { %v4106_v35 = vpop.permute.xlu1 %2795  ;;  %v1777_v27 = vsel %vm1770_vm8, %v1744_v5, %v2792_v10  ;;  %v1778_v51 = vsel %vm1770_vm8, %v1745_v18, %v2793_v34 }
 0x140   : > { %v2801_v58 = vpop.permute.xlu0 %2800  ;;  %v2798_v25 = vunpack.i.h.bf16 %v4106_v35  ;;  %v2797_v4 = vunpack.i.l.bf16 %v4106_v35 }
 0x141   : > { %v2803_v54 = vunpack.i.h.bf16 %v2801_v58  ;;  %v2802_v40 = vunpack.i.l.bf16 %v2801_v58 }
 0x142   : > { %v1793_v58 = vsel %vm1770_vm8, %v1760_v16, %v2797_v4  ;;  %v1794_v52 = vsel %vm1770_vm8, %v1761_v62, %v2798_v25  ;;  %v4432_v25 = vld [vmem:[#allocation28_spill] sm:$0xff] }
 0x143   : > { %v2806_v22 = vpop.permute.xlu1 %2805  ;;  %v1808_v1 = vsel %vm1803_vm9, %v1775_v15, %v2802_v40  ;;  %v1809_v3 = vsel %vm1803_vm9, %v1776_v14, %v2803_v54 }
 0x144   : > { %v2811_v31 = vpop.permute.xlu0 %2810  ;;  %v2807_v12 = vunpack.i.l.bf16 %v2806_v22  ;;  %v2808_v7 = vunpack.i.h.bf16 %v2806_v22 }
 0x145   : > { %v2813_v36 = vunpack.i.h.bf16 %v2811_v31  ;;  %v2812_v53 = vunpack.i.l.bf16 %v2811_v31 }
 0x146   : > { %v1824_v21 = vsel %vm1803_vm9, %v1791_v23, %v2807_v12  ;;  %v1825_v39 = vsel %vm1803_vm9, %v1792_v33, %v2808_v7 }
 0x147   : > { %v2816_v20 = vpop.permute.xlu1 %2815  ;;  %v1810_v26 = vsel %vm1803_vm9, %v1777_v27, %v2812_v53  ;;  %v1811_v35 = vsel %vm1803_vm9, %v1778_v51, %v2813_v36  ;;  %v4431_v27 = vld [vmem:[#allocation21_spill] sm:$0xff] }
 0x148   : > { %v2821_v28 = vpop.permute.xlu0 %2820  ;;  %v2818_v42 = vunpack.i.h.bf16 %v2816_v20  ;;  %v2817_v44 = vunpack.i.l.bf16 %v2816_v20 }
 0x149   : > { %v2823_v32 = vunpack.i.h.bf16 %v2821_v28  ;;  %v2822_v59 = vunpack.i.l.bf16 %v2821_v28 }
 0x14a   : > { %v1826_v55 = vsel %vm1803_vm9, %v1793_v58, %v2817_v44  ;;  %v1827_v56 = vsel %vm1803_vm9, %v1794_v52, %v2818_v42 }
 0x14b   : > { %v1841_v43 = vsel %vm1836_vm10, %v1808_v1, %v2822_v59  ;;  %v1842_v37 = vsel %vm1836_vm10, %v1809_v3, %v2823_v32  ;;  %v2826_v11 = vpop.permute.xlu1 %2825  ;;  %v4433_v59 = vld [vmem:[#allocation29_spill] sm:$0xff]  ;;  %v4434_v3 = vld [vmem:[#allocation23_spill] sm:$0xff] }
 0x14c   : > { %v1871_v45 = vpack.c.bf16 %v1842_v37, %v1841_v43  ;;  %v2828_v63 = vunpack.i.h.bf16 %v2826_v11  ;;  %v2827_v61 = vunpack.i.l.bf16 %v2826_v11  ;;  %v2831_v57 = vpop.permute.xlu0 %2830 }
 0x14d   : > { %v2833_v24 = vunpack.i.h.bf16 %v2831_v57  ;;  %v2832_v19 = vunpack.i.l.bf16 %v2831_v57 }
 0x14e   : > { %v1857_v2 = vsel %vm1836_vm10, %v1824_v21, %v2827_v61  ;;  %v1858_v50 = vsel %vm1836_vm10, %v1825_v39, %v2828_v63  ;;  %2349 = vmatprep.mubr.msk.bf16.mxu0 %vm1907_vm11, %v1871_v45  ;;  %v4435_v21 = vld [vmem:[#allocation22_spill] sm:$0xff]  ;;  %v4437_v63 = vld [vmem:[#allocation31_spill] sm:$0xff] }
 0x14f   : > { %v1879_v46 = vpack.c.bf16 %v1858_v50, %v1857_v2  ;;  %v1843_v29 = vsel %vm1836_vm10, %v1810_v26, %v2832_v19  ;;  %v1844_v17 = vsel %vm1836_vm10, %v1811_v35, %v2833_v24  ;;  %v2836_v8 = vpop.permute.xlu1 %2835  ;;  %v4436_v39 = vld [vmem:[#allocation30_spill] sm:$0xff] }
 0x150   : > { %v1872_v30 = vpack.c.bf16 %v1844_v17, %v1843_v29  ;;  %v2838_v38 = vunpack.i.h.bf16 %v2836_v8  ;;  %v2837_v49 = vunpack.i.l.bf16 %v2836_v8  ;;  %v2841_v9 = vpop.permute.xlu0 %2840 }
 0x151   : > { %2365 = vmatprep.mubr.msk.bf16.mxu1 %vm1907_vm11, %v1879_v46  ;;  %v2843_v5 = vunpack.i.h.bf16 %v2841_v9  ;;  %v2842_v16 = vunpack.i.l.bf16 %v2841_v9 }
 0x152   : > { %v1859_v41 = vsel %vm1836_vm10, %v1826_v55, %v2837_v49  ;;  %v1860_v22 = vsel %vm1836_vm10, %v1827_v56, %v2838_v38  ;;  %2350 = vmatmul.mubr.msk.bf16.gmra.mxu0 %vm1907_vm11, %v1872_v30 }
 0x153   : > { %v1880_v47 = vpack.c.bf16 %v1860_v22, %v1859_v41  ;;  %v2846_v13 = vpop.permute.xlu1 %2845  ;;  %v1713_v33 = vsel %vm1704_vm6, %v3657_v6, %v2842_v16  ;;  %v1714_v7 = vsel %vm1704_vm6, %v4431_v27, %v2843_v5 }
 0x154   : > { %v2851_v60 = vpop.permute.xlu0 %2850  ;;  %v2848_v40 = vunpack.i.h.bf16 %v2846_v13  ;;  %v2847_v62 = vunpack.i.l.bf16 %v2846_v13 }
 0x155   : > { %2366 = vmatmul.mubr.msk.bf16.gmra.mxu1 %vm1907_vm11, %v1880_v47  ;;  %v2853_v15 = vunpack.i.h.bf16 %v2851_v60  ;;  %v2852_v12 = vunpack.i.l.bf16 %v2851_v60 }
 0x156   : > { %v1729_v32 = vsel %vm1704_vm6, %v4432_v25, %v2847_v62  ;;  %v1730_v1 = vsel %vm1704_vm6, %v4433_v59, %v2848_v40 }
 0x157   : > { %v2856_v10 = vpop.permute.xlu1 %2855  ;;  %v1716_v36 = vsel %vm1704_vm6, %v4434_v3, %v2853_v15  ;;  %v1715_v6 = vsel %vm1704_vm6, %v4435_v21, %v2852_v12 }
 0x158   : > { %v2861_v31 = vpop.permute.xlu0 %2860  ;;  %v2858_v20 = vunpack.i.h.bf16 %v2856_v10  ;;  %v2857_v23 = vunpack.i.l.bf16 %v2856_v10 }
 0x159   : > { %v2862_v28 = vunpack.i.l.bf16 %v2861_v31  ;;  %v2863_v53 = vunpack.i.h.bf16 %v2861_v31 }
 0x15a   : > { %v1731_v45 = vsel %vm1704_vm6, %v4436_v39, %v2857_v23  ;;  %v1732_v61 = vsel %vm1704_vm6, %v4437_v63, %v2858_v20 }
 0x15b   : > { %v2866_v48 = vpop.permute.xlu1 %2865  ;;  %v1746_v44 = vsel %vm1737_vm7, %v1713_v33, %v2862_v28  ;;  %v1747_v2 = vsel %vm1737_vm7, %v1714_v7, %v2863_v53 }
 0x15c   : > { %v2871_v0 = vpop.permute.xlu0 %2870  ;;  %v2868_v43 = vunpack.i.h.bf16 %v2866_v48  ;;  %v2867_v37 = vunpack.i.l.bf16 %v2866_v48 }
 0x15d   : > { %v2872_v11 = vunpack.i.l.bf16 %v2871_v0  ;;  %v2873_v57 = vunpack.i.h.bf16 %v2871_v0 }
 0x15e   : > { %v1762_v17 = vsel %vm1737_vm7, %v1729_v32, %v2867_v37  ;;  %v1763_v8 = vsel %vm1737_vm7, %v1730_v1, %v2868_v43 }
 0x15f   : > { %v2876_v18 = vpop.permute.xlu1 %2875  ;;  %v1748_v52 = vsel %vm1737_vm7, %v1715_v6, %v2872_v11  ;;  %v1749_v38 = vsel %vm1737_vm7, %v1716_v36, %v2873_v57 }
 0x160   : > { %v2881_v34 = vpop.permute.xlu0 %2880  ;;  %v2877_v42 = vunpack.i.l.bf16 %v2876_v18  ;;  %v2878_v24 = vunpack.i.h.bf16 %v2876_v18 }
 0x161   : > { %v2883_v19 = vunpack.i.h.bf16 %v2881_v34  ;;  %v2882_v26 = vunpack.i.l.bf16 %v2881_v34 }
 0x162   : > { %v1764_v49 = vsel %vm1737_vm7, %v1731_v45, %v2877_v42  ;;  %v1765_v56 = vsel %vm1737_vm7, %v1732_v61, %v2878_v24 }
 0x163   : > { %v2886_v54 = vpop.permute.xlu1 %2885  ;;  %v1779_v41 = vsel %vm1770_vm8, %v1746_v44, %v2882_v26  ;;  %v1780_v22 = vsel %vm1770_vm8, %v1747_v2, %v2883_v19 }
 0x164   : > { %v2891_v14 = vpop.permute.xlu0 %2890  ;;  %v2888_v50 = vunpack.i.h.bf16 %v2886_v54  ;;  %v2887_v58 = vunpack.i.l.bf16 %v2886_v54 }
 0x165   : > { %v2892_v46 = vunpack.i.l.bf16 %v2891_v14  ;;  %v2893_v30 = vunpack.i.h.bf16 %v2891_v14 }
 0x166   : > { %v1795_v60 = vsel %vm1770_vm8, %v1762_v17, %v2887_v58  ;;  %v1796_v10 = vsel %vm1770_vm8, %v1763_v8, %v2888_v50 }
 0x167   : > { %v4168_v51 = vpop.permute.xlu1 %2895  ;;  %v1781_v31 = vsel %vm1770_vm8, %v1748_v52, %v2892_v46  ;;  %v1782_v18 = vsel %vm1770_vm8, %v1749_v38, %v2893_v30 }
 0x168   : > { %v2901_v4 = vpop.permute.xlu0 %2900  ;;  %v2898_v34 = vunpack.i.h.bf16 %v4168_v51  ;;  %v2897_v14 = vunpack.i.l.bf16 %v4168_v51 }
 0x169   : > { %v2903_v9 = vunpack.i.h.bf16 %v2901_v4  ;;  %v2902_v55 = vunpack.i.l.bf16 %v2901_v4 }
 0x16a   : > { %v1797_v6 = vsel %vm1770_vm8, %v1764_v49, %v2897_v14  ;;  %v1798_v45 = vsel %vm1770_vm8, %v1765_v56, %v2898_v34  ;;  %v4440_v34 = vld [vmem:[#allocation32_spill] sm:$0xff] }
 0x16b   : > { %v2906_v35 = vpop.permute.xlu1 %2905  ;;  %v1812_v54 = vsel %vm1803_vm9, %v1779_v41, %v2902_v55  ;;  %v1813_v40 = vsel %vm1803_vm9, %v1780_v22, %v2903_v9 }
 0x16c   : > { %v2911_v29 = vpop.permute.xlu0 %2910  ;;  %v2907_v47 = vunpack.i.l.bf16 %v2906_v35  ;;  %v2908_v48 = vunpack.i.h.bf16 %v2906_v35 }
 0x16d   : > { %v2913_v62 = vunpack.i.h.bf16 %v2911_v29  ;;  %v2912_v15 = vunpack.i.l.bf16 %v2911_v29 }
 0x16e   : > { %v1828_v12 = vsel %vm1803_vm9, %v1795_v60, %v2907_v47  ;;  %v1829_v27 = vsel %vm1803_vm9, %v1796_v10, %v2908_v48  ;;  %v4438_v60 = vld [vmem:[#allocation24_spill] sm:$0xff] }
 0x16f   : > { %v2916_v13 = vpop.permute.xlu1 %2915  ;;  %v1814_v53 = vsel %vm1803_vm9, %v1781_v31, %v2912_v15  ;;  %v1815_v51 = vsel %vm1803_vm9, %v1782_v18, %v2913_v62  ;;  %v4439_v31 = vld [vmem:[#allocation25_spill] sm:$0xff] }
 0x170   : > { %v2921_v0 = vpop.permute.xlu0 %2920  ;;  %v2918_v59 = vunpack.i.h.bf16 %v2916_v13  ;;  %v2917_v1 = vunpack.i.l.bf16 %v2916_v13 }
 0x171   : > { %v2923_v5 = vunpack.i.h.bf16 %v2921_v0  ;;  %v2922_v16 = vunpack.i.l.bf16 %v2921_v0 }
 0x172   : > { %v1830_v44 = vsel %vm1803_vm9, %v1797_v6, %v2917_v1  ;;  %v1831_v24 = vsel %vm1803_vm9, %v1798_v45, %v2918_v59 }
 0x173   : > { %v1845_v20 = vsel %vm1836_vm10, %v1812_v54, %v2922_v16  ;;  %v1846_v23 = vsel %vm1836_vm10, %v1813_v40, %v2923_v5  ;;  %v2926_v33 = vpop.permute.xlu1 %2925  ;;  %v4441_v16 = vld [vmem:[#allocation33_spill] sm:$0xff]  ;;  %v4442_v40 = vld [vmem:[#allocation27_spill] sm:$0xff] }
 0x174   : > { %v1873_v7 = vpack.c.bf16 %v1846_v23, %v1845_v20  ;;  %v2928_v28 = vunpack.i.h.bf16 %v2926_v33  ;;  %v2927_v25 = vunpack.i.l.bf16 %v2926_v33  ;;  %v2931_v32 = vpop.permute.xlu0 %2930 }
 0x175   : > { %v2933_v3 = vunpack.i.h.bf16 %v2931_v32  ;;  %v2932_v36 = vunpack.i.l.bf16 %v2931_v32 }
 0x176   : > { %v1861_v4 = vsel %vm1836_vm10, %v1828_v12, %v2927_v25  ;;  %v1862_v21 = vsel %vm1836_vm10, %v1829_v27, %v2928_v28  ;;  %2353 = vmatprep.mubr.msk.bf16.mxu0 %vm1907_vm11, %v1873_v7  ;;  %v4443_v12 = vld [vmem:[#allocation26_spill] sm:$0xff]  ;;  %v4445_v25 = vld [vmem:[#allocation35_spill] sm:$0xff] }
 0x177   : > { %v1881_v43 = vpack.c.bf16 %v1862_v21, %v1861_v4  ;;  %v1847_v37 = vsel %vm1836_vm10, %v1814_v53, %v2932_v36  ;;  %v1848_v11 = vsel %vm1836_vm10, %v1815_v51, %v2933_v3  ;;  %v2936_v39 = vpop.permute.xlu1 %2935  ;;  %v4444_v7 = vld [vmem:[#allocation34_spill] sm:$0xff] }
 0x178   : > { %v1874_v63 = vpack.c.bf16 %v1848_v11, %v1847_v37  ;;  %v2938_v61 = vunpack.i.h.bf16 %v2936_v39  ;;  %v2937_v57 = vunpack.i.l.bf16 %v2936_v39  ;;  %v2941_v42 = vpop.permute.xlu0 %2940 }
 0x179   : > { %2369 = vmatprep.mubr.msk.bf16.mxu1 %vm1907_vm11, %v1881_v43  ;;  %v2943_v30 = vunpack.i.h.bf16 %v2941_v42  ;;  %v2942_v38 = vunpack.i.l.bf16 %v2941_v42 }
 0x17a   : > { %v1863_v19 = vsel %vm1836_vm10, %v1830_v44, %v2937_v57  ;;  %v1864_v26 = vsel %vm1836_vm10, %v1831_v24, %v2938_v61  ;;  %2354 = vmatmul.mubr.msk.bf16.gmra.mxu0 %vm1907_vm11, %v1874_v63 }
 0x17b   : > { %v1882_v35 = vpack.c.bf16 %v1864_v26, %v1863_v19  ;;  %v2946_v2 = vpop.permute.xlu1 %2945  ;;  %v1717_v10 = vsel %vm1704_vm6, %v4438_v60, %v2942_v38  ;;  %v1718_v48 = vsel %vm1704_vm6, %v4439_v31, %v2943_v30 }
 0x17c   : > { %v2951_v50 = vpop.permute.xlu0 %2950  ;;  %v2948_v9 = vunpack.i.h.bf16 %v2946_v2  ;;  %v2947_v55 = vunpack.i.l.bf16 %v2946_v2 }
 0x17d   : > { %2370 = vmatmul.mubr.msk.bf16.gmra.mxu1 %vm1907_vm11, %v1882_v35  ;;  %v2953_v56 = vunpack.i.h.bf16 %v2951_v50  ;;  %v2952_v22 = vunpack.i.l.bf16 %v2951_v50 }
 0x17e   : > { %v1733_v5 = vsel %vm1704_vm6, %v4440_v34, %v2947_v55  ;;  %v1734_v54 = vsel %vm1704_vm6, %v4441_v16, %v2948_v9 }
 0x17f   : > { %v2956_v58 = vpop.permute.xlu1 %2955  ;;  %v1720_v62 = vsel %vm1704_vm6, %v4442_v40, %v2953_v56  ;;  %v1719_v20 = vsel %vm1704_vm6, %v4443_v12, %v2952_v22 }
 0x180   : > { %v2961_v46 = vpop.permute.xlu0 %2960  ;;  %v2958_v47 = vunpack.i.h.bf16 %v2956_v58  ;;  %v2957_v13 = vunpack.i.l.bf16 %v2956_v58 }
 0x181   : > { %v2962_v0 = vunpack.i.l.bf16 %v2961_v46  ;;  %v2963_v15 = vunpack.i.h.bf16 %v2961_v46 }
 0x182   : > { %v1735_v28 = vsel %vm1704_vm6, %v4444_v7, %v2957_v13  ;;  %v1736_v32 = vsel %vm1704_vm6, %v4445_v25, %v2958_v47 }
 0x183   : > { %v2966_v29 = vpop.permute.xlu1 %2965  ;;  %v1750_v3 = vsel %vm1737_vm7, %v1717_v10, %v2962_v0  ;;  %v1751_v21 = vsel %vm1737_vm7, %v1718_v48, %v2963_v15 }
 0x184   : > { %v2971_v17 = vpop.permute.xlu0 %2970  ;;  %v2968_v23 = vunpack.i.h.bf16 %v2966_v29  ;;  %v2967_v33 = vunpack.i.l.bf16 %v2966_v29 }
 0x185   : > { %v2972_v27 = vunpack.i.l.bf16 %v2971_v17  ;;  %v2973_v59 = vunpack.i.h.bf16 %v2971_v17 }
 0x186   : > { %v1766_v39 = vsel %vm1737_vm7, %v1733_v5, %v2967_v33  ;;  %v1767_v45 = vsel %vm1737_vm7, %v1734_v54, %v2968_v23 }
 0x187   : > { %v2976_v8 = vpop.permute.xlu1 %2975  ;;  %v1752_v63 = vsel %vm1737_vm7, %v1719_v20, %v2972_v27  ;;  %v1753_v57 = vsel %vm1737_vm7, %v1720_v62, %v2973_v59 }
 0x188   : > { %v2981_v52 = vpop.permute.xlu0 %2980  ;;  %v2977_v1 = vunpack.i.l.bf16 %v2976_v8  ;;  %v2978_v36 = vunpack.i.h.bf16 %v2976_v8 }
 0x189   : > { %v2983_v53 = vunpack.i.h.bf16 %v2981_v52  ;;  %v2982_v51 = vunpack.i.l.bf16 %v2981_v52 }
 0x18a   : > { %v1768_v42 = vsel %vm1737_vm7, %v1735_v28, %v2977_v1  ;;  %v1769_v19 = vsel %vm1737_vm7, %v1736_v32, %v2978_v36 }
 0x18b   : > { %v2986_v49 = vpop.permute.xlu1 %2985  ;;  %v1783_v26 = vsel %vm1770_vm8, %v1750_v3, %v2982_v51  ;;  %v1784_v35 = vsel %vm1770_vm8, %v1751_v21, %v2983_v53 }
 0x18c   : > { %v2991_v41 = vpop.permute.xlu0 %2990  ;;  %v2988_v6 = vunpack.i.h.bf16 %v2986_v49  ;;  %v2987_v43 = vunpack.i.l.bf16 %v2986_v49 }
 0x18d   : > { %v2992_v37 = vunpack.i.l.bf16 %v2991_v41  ;;  %v2993_v61 = vunpack.i.h.bf16 %v2991_v41 }
 0x18e   : > { %v1799_v58 = vsel %vm1770_vm8, %v1766_v39, %v2987_v43  ;;  %v1800_v46 = vsel %vm1770_vm8, %v1767_v45, %v2988_v6 }
 0x18f   : > { %v4224_v18 = vpop.permute.xlu1 %2995  ;;  %v1785_v29 = vsel %vm1770_vm8, %v1752_v63, %v2992_v37  ;;  %v1786_v52 = vsel %vm1770_vm8, %v1753_v57, %v2993_v61 }
 0x190   : > { %v3001_v14 = vpop.permute.xlu0 %3000  ;;  %v2998_v30 = vunpack.i.h.bf16 %v4224_v18  ;;  %v2997_v22 = vunpack.i.l.bf16 %v4224_v18 }
 0x191   : > { %v3003_v44 = vunpack.i.h.bf16 %v3001_v14  ;;  %v3002_v24 = vunpack.i.l.bf16 %v3001_v14 }
 0x192   : > { %v1801_v20 = vsel %vm1770_vm8, %v1768_v42, %v2997_v22  ;;  %v1802_v28 = vsel %vm1770_vm8, %v1769_v19, %v2998_v30 }
 0x193   : > { %v3006_v4 = vpop.permute.xlu1 %3005  ;;  %v1816_v9 = vsel %vm1803_vm9, %v1783_v26, %v3002_v24  ;;  %v1817_v55 = vsel %vm1803_vm9, %v1784_v35, %v3003_v44 }
 0x194   : > { %v3011_v11 = vpop.permute.xlu0 %3010  ;;  %v3007_v2 = vunpack.i.l.bf16 %v3006_v4  ;;  %v3008_v17 = vunpack.i.h.bf16 %v3006_v4  ;;  %v4279_v4 = vld [vmem:[%s4356_s2] ss:$0 sm:$0xff] }
 0x195   : > { %v3013_v56 = vunpack.i.h.bf16 %v3011_v11  ;;  %v3012_v41 = vunpack.i.l.bf16 %v3011_v11 }
 0x196   : > { %v1832_v47 = vsel %vm1803_vm9, %v1799_v58, %v3007_v2  ;;  %v1833_v31 = vsel %vm1803_vm9, %v1800_v46, %v3008_v17 }
 0x197   : > { %v3016_v50 = vpop.permute.xlu1 %3015  ;;  %v1818_v15 = vsel %vm1803_vm9, %v1785_v29, %v3012_v41  ;;  %v1819_v18 = vsel %vm1803_vm9, %v1786_v52, %v3013_v56 }
 0x198   : > { %v3021_v8 = vpop.permute.xlu0 %3020  ;;  %v3018_v16 = vunpack.i.h.bf16 %v3016_v50  ;;  %v3017_v54 = vunpack.i.l.bf16 %v3016_v50 }
 0x199   : > { %v3023_v38 = vunpack.i.h.bf16 %v3021_v8  ;;  %v3022_v49 = vunpack.i.l.bf16 %v3021_v8 }
 0x19a   : > { %v1834_v1 = vsel %vm1803_vm9, %v1801_v20, %v3017_v54  ;;  %v1835_v3 = vsel %vm1803_vm9, %v1802_v28, %v3018_v16 }
 0x19b   : > { %v1849_v13 = vsel %vm1836_vm10, %v1816_v9, %v3022_v49  ;;  %v1850_v60 = vsel %vm1836_vm10, %v1817_v55, %v3023_v38  ;;  %v3026_v10 = vpop.permute.xlu1 %3025 }
 0x19c   : > { %v1875_v48 = vpack.c.bf16 %v1850_v60, %v1849_v13  ;;  %v3028_v0 = vunpack.i.h.bf16 %v3026_v10  ;;  %v3027_v34 = vunpack.i.l.bf16 %v3026_v10  ;;  %v3031_v5 = vpop.permute.xlu0 %3030 }
 0x19d   : > { %v3033_v40 = vunpack.i.h.bf16 %v3031_v5  ;;  %v3032_v62 = vunpack.i.l.bf16 %v3031_v5 }
 0x19e   : > { %v1865_v14 = vsel %vm1836_vm10, %v1832_v47, %v3027_v34  ;;  %v1866_v12 = vsel %vm1836_vm10, %v1833_v31, %v3028_v0  ;;  %2357 = vmatprep.mubr.msk.bf16.mxu0 %vm1907_vm11, %v1875_v48 }
 0x19f   : > { %v1883_v23 = vpack.c.bf16 %v1866_v12, %v1865_v14  ;;  %v1851_v33 = vsel %vm1836_vm10, %v1818_v15, %v3032_v62  ;;  %v1852_v27 = vsel %vm1836_vm10, %v1819_v18, %v3033_v40  ;;  %v3036_v7 = vpop.permute.xlu1 %3035 }
 0x1a0   : > { %v1876_v25 = vpack.c.bf16 %v1852_v27, %v1851_v33  ;;  %v3038_v32 = vunpack.i.h.bf16 %v3036_v7  ;;  %v3037_v59 = vunpack.i.l.bf16 %v3036_v7 }
 0x1a1   : > { %2373 = vmatprep.mubr.msk.bf16.mxu1 %vm1907_vm11, %v1883_v23 }
 0x1a2   : > { %v1867_v36 = vsel %vm1836_vm10, %v1834_v1, %v3037_v59  ;;  %v1868_v53 = vsel %vm1836_vm10, %v1835_v3, %v3038_v32  ;;  %2358 = vmatmul.mubr.msk.bf16.gmra.mxu0 %vm1907_vm11, %v1876_v25 }
 0x1a3   : > { %v1884_v51 = vpack.c.bf16 %v1868_v53, %v1867_v36 }
 0x1a5   : > { %2374 = vmatmul.mubr.msk.bf16.gmra.mxu1 %vm1907_vm11, %v1884_v51 }
 0x1ee   : > { %v2347_v21 = vpop.f32.mrf.mxu0 }
 0x1ef   : > { %v2006_v6 = vadd.f32 %v2347_v21, %v4279_v4 }
 0x1f0   : > { %v1997_v43 = vpop.f32.mrf.mxu0 }
 0x1f1   : > { %v1998_v37 = vadd.f32 %v4279_v4, %v1997_v43  ;;  %v2363_v11 = vpop.f32.mrf.mxu1  ;;  %v2126_v63 = vmax.f32 %v2006_v6, 0.0 }
 0x1f2   : > { %v2348_v39 = vpop.f32.mrf.mxu0  ;;  %v2070_v45 = vadd.f32 %v2363_v11, %v4279_v4 }
 0x1f3   : > { %v2124_v61 = vmax.f32 %v1998_v37, 0.0  ;;  %v2009_v57 = vadd.f32 %v2348_v39, %v4279_v4  ;;  %v2061_v42 = vpop.f32.mrf.mxu1 }
 0x1f4   : > { %v2000_v44 = vpop.f32.mrf.mxu0  ;;  %v2062_v24 = vadd.f32 %v4279_v4, %v2061_v42  ;;  %v2142_v2 = vmax.f32 %v2070_v45, 0.0 }
 0x1f5   : > { %v2156_v19 = vmax.f32 %v2124_v61, %v2126_v63  ;;  %v2001_v26 = vadd.f32 %v4279_v4, %v2000_v44  ;;  %v2364_v35 = vpop.f32.mrf.mxu1  ;;  %v2127_v46 = vmax.f32 %v2009_v57, 0.0 }
 0x1f6   : > { %v2140_v50 = vmax.f32 %v2062_v24, 0.0  ;;  %v2073_v58 = vadd.f32 %v2364_v35, %v4279_v4 }
 0x1f7   : > { %2173 = vst.msk [vmem:[#allocation3] sm:$0xff] %vm2172_vm12, %v2156_v19  ;;  %v2125_v29 = vmax.f32 %v2001_v26, 0.0  ;;  %v2064_v17 = vpop.f32.mrf.mxu1 }
 0x1f8   : > { %v2164_v8 = vmax.f32 %v2140_v50, %v2142_v2  ;;  %v2065_v52 = vadd.f32 %v4279_v4, %v2064_v17  ;;  %v2143_v38 = vmax.f32 %v2073_v58, 0.0 }
 0x1f9   : > { %v2157_v30 = vmax.f32 %v2125_v29, %v2127_v46 }
 0x1fa   : > { %2181 = vst.msk [vmem:[#allocation3 + $0x40] sm:$0xff] %vm2172_vm12, %v2164_v8  ;;  %v2141_v49 = vmax.f32 %v2065_v52, 0.0 }
 0x1fb   : > { %2174 = vst.msk [vmem:[#allocation3 + $0x8] sm:$0xff] %vm2172_vm12, %v2157_v30 }
 0x1fc   : > { %v2165_v9 = vmax.f32 %v2141_v49, %v2143_v38 }
 0x1fe   : > { %2182 = vst.msk [vmem:[#allocation3 + $0x48] sm:$0xff] %vm2172_vm12, %v2165_v9 }
 0x202   : > { %v2189_v55 = vld [vmem:[#allocation3] ss:$2 sm:$0xff]  ;;  %v2205_v56 = vld [vmem:[#allocation3 + $0x1] ss:$2 sm:$0xff] }
 0x203   : > { %v2220_v41 = vmax.f32 %v2189_v55, %v2205_v56 }
 0x205   : > { %2228 = vst.msk [vmem:[%s4297_s9] sm:$0xff] %vm2172_vm12, %v2220_v41  ;;  %v2197_v22 = vld [vmem:[#allocation3 + $0x40] ss:$2 sm:$0xff]  ;;  %v2213_v47 = vld [vmem:[#allocation3 + $0x41] ss:$2 sm:$0xff] }
 0x206   : > { %v2224_v13 = vmax.f32 %v2197_v22, %v2213_v47 }
 0x208   : > { %2232 = vst.msk [vmem:[%s4297_s9 + $0x20] sm:$0xff] %vm2172_vm12, %v2224_v13 }
 0x212   : > { %v2351_v60 = vpop.f32.mrf.mxu0 }
 0x213   : > { %v2022_v10 = vadd.f32 %v2351_v60, %v4279_v4 }
 0x214   : > { %v2013_v31 = vpop.f32.mrf.mxu0 }
 0x215   : > { %v2014_v48 = vadd.f32 %v4279_v4, %v2013_v31  ;;  %v2367_v0 = vpop.f32.mrf.mxu1  ;;  %v2130_v16 = vmax.f32 %v2022_v10, 0.0 }
 0x216   : > { %v2352_v34 = vpop.f32.mrf.mxu0  ;;  %v2086_v5 = vadd.f32 %v2367_v0, %v4279_v4 }
 0x217   : > { %v2128_v54 = vmax.f32 %v2014_v48, 0.0  ;;  %v2025_v40 = vadd.f32 %v2352_v34, %v4279_v4  ;;  %v2077_v62 = vpop.f32.mrf.mxu1 }
 0x218   : > { %v2016_v15 = vpop.f32.mrf.mxu0  ;;  %v2078_v18 = vadd.f32 %v4279_v4, %v2077_v62  ;;  %v2146_v23 = vmax.f32 %v2086_v5, 0.0 }
 0x219   : > { %v2158_v14 = vmax.f32 %v2128_v54, %v2130_v16  ;;  %v2017_v12 = vadd.f32 %v4279_v4, %v2016_v15  ;;  %v2368_v20 = vpop.f32.mrf.mxu1  ;;  %v2131_v7 = vmax.f32 %v2025_v40, 0.0 }
 0x21a   : > { %v2144_v33 = vmax.f32 %v2078_v18, 0.0  ;;  %v2089_v27 = vadd.f32 %v2368_v20, %v4279_v4 }
 0x21b   : > { %2175 = vst.msk [vmem:[#allocation3 + $0x10] sm:$0xff] %vm2172_vm12, %v2158_v14  ;;  %v2129_v28 = vmax.f32 %v2017_v12, 0.0  ;;  %v2080_v25 = vpop.f32.mrf.mxu1 }
 0x21c   : > { %v2166_v32 = vmax.f32 %v2144_v33, %v2146_v23  ;;  %v2081_v59 = vadd.f32 %v4279_v4, %v2080_v25  ;;  %v2147_v3 = vmax.f32 %v2089_v27, 0.0 }
 0x21d   : > { %v2159_v1 = vmax.f32 %v2129_v28, %v2131_v7 }
 0x21e   : > { %2183 = vst.msk [vmem:[#allocation3 + $0x50] sm:$0xff] %vm2172_vm12, %v2166_v32  ;;  %v2145_v36 = vmax.f32 %v2081_v59, 0.0 }
 0x21f   : > { %2176 = vst.msk [vmem:[#allocation3 + $0x18] sm:$0xff] %vm2172_vm12, %v2159_v1 }
 0x220   : > { %v2167_v53 = vmax.f32 %v2145_v36, %v2147_v3 }
 0x222   : > { %2184 = vst.msk [vmem:[#allocation3 + $0x58] sm:$0xff] %vm2172_vm12, %v2167_v53 }
 0x226   : > { %v2191_v51 = vld [vmem:[#allocation3 + $0x10] ss:$2 sm:$0xff]  ;;  %v2207_v21 = vld [vmem:[#allocation3 + $0x11] ss:$2 sm:$0xff] }
 0x227   : > { %v2221_v6 = vmax.f32 %v2191_v51, %v2207_v21 }
 0x229   : > { %2229 = vst.msk [vmem:[%s4297_s9 + $0x8] sm:$0xff] %vm2172_vm12, %v2221_v6  ;;  %v2199_v43 = vld [vmem:[#allocation3 + $0x50] ss:$2 sm:$0xff]  ;;  %v2215_v37 = vld [vmem:[#allocation3 + $0x51] ss:$2 sm:$0xff] }
 0x22a   : > { %v2225_v11 = vmax.f32 %v2199_v43, %v2215_v37 }
 0x22c   : > { %2233 = vst.msk [vmem:[%s4297_s9 + $0x28] sm:$0xff] %vm2172_vm12, %v2225_v11 }
 0x23a   : > { %v2355_v39 = vpop.f32.mrf.mxu0 }
 0x23b   : > { %v2038_v45 = vadd.f32 %v2355_v39, %v4279_v4 }
 0x23c   : > { %v2029_v63 = vpop.f32.mrf.mxu0 }
 0x23d   : > { %v2030_v61 = vadd.f32 %v4279_v4, %v2029_v63  ;;  %v2371_v57 = vpop.f32.mrf.mxu1  ;;  %v2134_v24 = vmax.f32 %v2038_v45, 0.0 }
 0x23e   : > { %v2356_v42 = vpop.f32.mrf.mxu0  ;;  %v2102_v44 = vadd.f32 %v2371_v57, %v4279_v4 }
 0x23f   : > { %v2132_v19 = vmax.f32 %v2030_v61, 0.0  ;;  %v2041_v26 = vadd.f32 %v2356_v42, %v4279_v4  ;;  %v2093_v35 = vpop.f32.mrf.mxu1 }
 0x240   : > { %v2032_v2 = vpop.f32.mrf.mxu0  ;;  %v2094_v50 = vadd.f32 %v4279_v4, %v2093_v35  ;;  %v2150_v17 = vmax.f32 %v2102_v44, 0.0 }
 0x241   : > { %v2160_v58 = vmax.f32 %v2132_v19, %v2134_v24  ;;  %v2033_v46 = vadd.f32 %v4279_v4, %v2032_v2  ;;  %v2372_v29 = vpop.f32.mrf.mxu1  ;;  %v2135_v30 = vmax.f32 %v2041_v26, 0.0 }
 0x242   : > { %v2148_v8 = vmax.f32 %v2094_v50, 0.0  ;;  %v2105_v52 = vadd.f32 %v2372_v29, %v4279_v4 }
 0x243   : > { %2177 = vst.msk [vmem:[#allocation3 + $0x20] sm:$0xff] %vm2172_vm12, %v2160_v58  ;;  %v2133_v38 = vmax.f32 %v2033_v46, 0.0  ;;  %v2096_v49 = vpop.f32.mrf.mxu1 }
 0x244   : > { %v2168_v9 = vmax.f32 %v2148_v8, %v2150_v17  ;;  %v2097_v55 = vadd.f32 %v4279_v4, %v2096_v49  ;;  %v2151_v41 = vmax.f32 %v2105_v52, 0.0 }
 0x245   : > { %v2161_v56 = vmax.f32 %v2133_v38, %v2135_v30 }
 0x246   : > { %2185 = vst.msk [vmem:[#allocation3 + $0x60] sm:$0xff] %vm2172_vm12, %v2168_v9  ;;  %v2149_v22 = vmax.f32 %v2097_v55, 0.0 }
 0x247   : > { %2178 = vst.msk [vmem:[#allocation3 + $0x28] sm:$0xff] %vm2172_vm12, %v2161_v56 }
 0x248   : > { %v2169_v47 = vmax.f32 %v2149_v22, %v2151_v41 }
 0x24a   : > { %2186 = vst.msk [vmem:[#allocation3 + $0x68] sm:$0xff] %vm2172_vm12, %v2169_v47 }
 0x24e   : > { %v2193_v13 = vld [vmem:[#allocation3 + $0x20] ss:$2 sm:$0xff]  ;;  %v2209_v60 = vld [vmem:[#allocation3 + $0x21] ss:$2 sm:$0xff] }
 0x24f   : > { %v2222_v10 = vmax.f32 %v2193_v13, %v2209_v60 }
 0x251   : > { %2230 = vst.msk [vmem:[%s4297_s9 + $0x10] sm:$0xff] %vm2172_vm12, %v2222_v10  ;;  %v2201_v31 = vld [vmem:[#allocation3 + $0x60] ss:$2 sm:$0xff]  ;;  %v2217_v48 = vld [vmem:[#allocation3 + $0x61] ss:$2 sm:$0xff] }
 0x252   : > { %v2226_v0 = vmax.f32 %v2201_v31, %v2217_v48 }
 0x254   : > { %2234 = vst.msk [vmem:[%s4297_s9 + $0x30] sm:$0xff] %vm2172_vm12, %v2226_v0 }
 0x262   : > { %v2359_v34 = vpop.f32.mrf.mxu0 }
 0x263   : > { %v2054_v5 = vadd.f32 %v2359_v34, %v4279_v4 }
 0x264   : > { %v2045_v16 = vpop.f32.mrf.mxu0 }
 0x265   : > { %v2046_v54 = vadd.f32 %v4279_v4, %v2045_v16  ;;  %v2375_v40 = vpop.f32.mrf.mxu1  ;;  %v2138_v18 = vmax.f32 %v2054_v5, 0.0 }
 0x266   : > { %v2360_v62 = vpop.f32.mrf.mxu0  ;;  %v2118_v15 = vadd.f32 %v2375_v40, %v4279_v4 }
 0x267   : > { %v2136_v14 = vmax.f32 %v2046_v54, 0.0  ;;  %v2057_v12 = vadd.f32 %v2360_v62, %v4279_v4  ;;  %v2109_v20 = vpop.f32.mrf.mxu1 }
 0x268   : > { %v2048_v23 = vpop.f32.mrf.mxu0  ;;  %v2110_v33 = vadd.f32 %v4279_v4, %v2109_v20  ;;  %v2154_v25 = vmax.f32 %v2118_v15, 0.0 }
 0x269   : > { %v2162_v27 = vmax.f32 %v2136_v14, %v2138_v18  ;;  %v2049_v7 = vadd.f32 %v4279_v4, %v2048_v23  ;;  %v2376_v28 = vpop.f32.mrf.mxu1  ;;  %v2139_v1 = vmax.f32 %v2057_v12, 0.0 }
 0x26a   : > { %v2152_v32 = vmax.f32 %v2110_v33, 0.0  ;;  %v2121_v59 = vadd.f32 %v2376_v28, %v4279_v4 }
 0x26b   : > { %2179 = vst.msk [vmem:[#allocation3 + $0x30] sm:$0xff] %vm2172_vm12, %v2162_v27  ;;  %v2137_v3 = vmax.f32 %v2049_v7, 0.0  ;;  %v2112_v36 = vpop.f32.mrf.mxu1 }
 0x26c   : > { %v2170_v53 = vmax.f32 %v2152_v32, %v2154_v25  ;;  %v2113_v51 = vadd.f32 %v4279_v4, %v2112_v36  ;;  %v2155_v6 = vmax.f32 %v2121_v59, 0.0 }
 0x26d   : > { %v2163_v21 = vmax.f32 %v2137_v3, %v2139_v1 }
 0x26e   : > { %2187 = vst.msk [vmem:[#allocation3 + $0x70] sm:$0xff] %vm2172_vm12, %v2170_v53  ;;  %v2153_v43 = vmax.f32 %v2113_v51, 0.0 }
 0x26f   : > { %2180 = vst.msk [vmem:[#allocation3 + $0x38] sm:$0xff] %vm2172_vm12, %v2163_v21 }
 0x270   : > { %v2171_v37 = vmax.f32 %v2153_v43, %v2155_v6 }
 0x272   : > { %2188 = vst.msk [vmem:[#allocation3 + $0x78] sm:$0xff] %vm2172_vm12, %v2171_v37 }
 0x276   : > { %v2195_v11 = vld [vmem:[#allocation3 + $0x30] ss:$2 sm:$0xff]  ;;  %v2211_v39 = vld [vmem:[#allocation3 + $0x31] ss:$2 sm:$0xff] }
 0x277   : > { %v2223_v45 = vmax.f32 %v2195_v11, %v2211_v39 }
 0x279   : > { %2231 = vst.msk [vmem:[%s4297_s9 + $0x18] sm:$0xff] %vm2172_vm12, %v2223_v45  ;;  %v2203_v63 = vld [vmem:[#allocation3 + $0x70] ss:$2 sm:$0xff]  ;;  %v2219_v61 = vld [vmem:[#allocation3 + $0x71] ss:$2 sm:$0xff] }
 0x27a   : > { %v2227_v57 = vmax.f32 %v2203_v63, %v2219_v61 }
 0x27c   : > { %2235 = vst.msk [vmem:[%s4297_s9 + $0x38] sm:$0xff] %vm2172_vm12, %v2227_v57 }
 0x27d PF: > { %s13_s12 = sadd.s32 1, %s3051_s12  }
 0x27e   : > { %p10_p4 = scmp.ge.s32.totalorder %s13_s12, 4  }
 0x280   :  { %12 = sbr.rel (!%p10_p4) target bundleno = 1 (0x1), region = 79 }

</bundles_post_ra>
